<compile_context>
chip_gen: v5e
topology: v5e:2x2
jax: 0.10.0
libtpu: 0.0.40
codegen_flags: <defaults>
</compile_context>

<pallas_src>
import math

import jax
import jax.numpy as jnp
from jax import lax
from jax.experimental import pallas as pl
from jax.experimental.pallas import tpu as pltpu

_LANE = 128
_SUBLANE = 8
_PROJ_SCRATCH_BUDGET = 4 * 1024 * 1024   # bytes for the f32 projection chunk


def _round_up(n, m):
    return (n + m - 1) // m * m


def _choose_time_chunk(seq_len, bytes_per_step, budget):
    """Largest divisor of seq_len whose proj chunk fits within `budget`."""
    max_tc = max(1, budget // max(1, bytes_per_step))
    if max_tc >= seq_len:
        return seq_len
    tc = 1
    for d in range(2, seq_len + 1):
        if seq_len % d == 0 and d <= max_tc:
            tc = d
    return tc


def _choose_unroll(tc):
    if tc <= 8:
        return tc
    for u in (8, 4, 2):
        if tc % u == 0:
            return u
    return 1


def _make_lstm_kernel(num_layers, seq_len, time_chunk, batch_pad, hidden_pad,
                      n_seq, compute_dtype):
    L, T, TC, Bp, Hp = num_layers, seq_len, time_chunk, batch_pad, hidden_pad
    n_chunks = T // TC
    unroll = _choose_unroll(TC)

    def kernel(*refs):
        # ref order:
        #   x (T*Bp, Dp) bf16, h0 (L, Bp, Hp) f32,
        #   (w_ih_T, w_hh_T, bias) * L,
        #   fc_w_T (Hp, Op) bf16, fc_b (1, Op) f32,
        #   out (Bp, Op) f32,
        #   proj scratch (TC*Bp, 4Hp) f32, seq scratch * n_seq (T*Bp, Hp) bf16
        x_ref = refs[0]
        h0_ref = refs[1]
        w_refs = refs[2:2 + 3 * L]
        fcw_ref = refs[2 + 3 * L]
        fcb_ref = refs[3 + 3 * L]
        out_ref = refs[4 + 3 * L]
        proj_ref = refs[5 + 3 * L]
        seq_refs = refs[6 + 3 * L:]

        h = None
        for l in range(L):
            w_ih_t = w_refs[3 * l + 0][...]          # (Dl_pad, 4Hp) bf16
            w_hh_t = w_refs[3 * l + 1][...]          # (Hp, 4Hp)     bf16
            bias = w_refs[3 * l + 2][...]            # (1, 4Hp)      f32

            inp_ref = x_ref if l == 0 else seq_refs[(l - 1) % n_seq]

            # h carried in bf16 (only ever an MXU LHS); c stays f32.
            h = h0_ref[l].astype(compute_dtype)      # (Bp, Hp)
            c = jnp.zeros((Bp, Hp), jnp.float32)     # c0 == zeros (module spec)

            write_seq = l < L - 1                    # last layer: only need h_T
            out_seq_ref = seq_refs[l % n_seq] if write_seq else None

            for ci in range(n_chunks):
                base = ci * TC * Bp

                # ---- batched input projection for this time chunk: one
                #      (TC*Bp, D) @ (D, 4Hp) matmul off the serial path. ----
                proj_ref[...] = (
                    jnp.dot(inp_ref[pl.ds(base, TC * Bp), :], w_ih_t,
                            preferred_element_type=jnp.float32) + bias)

                def step(t, carry):
                    h_t, c_t = carry
                    row = pl.multiple_of(t * Bp, Bp)
                    gates = proj_ref[pl.ds(row, Bp), :] + jnp.dot(
                        h_t, w_hh_t,
                        preferred_element_type=jnp.float32)   # (Bp, 4Hp) f32
                    # i/f/o columns were pre-scaled by 0.5, so a single wide
                    # tanh + 0.5*t+0.5 gives the sigmoid; g column is plain.
                    tg = jnp.tanh(gates)
                    i_g = 0.5 * tg[:, 0 * Hp:1 * Hp] + 0.5
                    f_g = 0.5 * tg[:, 1 * Hp:2 * Hp] + 0.5
                    g_g = tg[:, 2 * Hp:3 * Hp]
                    o_g = 0.5 * tg[:, 3 * Hp:4 * Hp] + 0.5
                    c_new = f_g * c_t + i_g * g_g
                    h_new = (o_g * jnp.tanh(c_new)).astype(compute_dtype)
                    if write_seq:
                        out_seq_ref[pl.ds(base + row, Bp), :] = h_new
                    return (h_new, c_new)

                h, c = lax.fori_loop(0, TC, step, (h, c), unroll=unroll)

        out_ref[...] = (
            jnp.dot(h, fcw_ref[...], preferred_element_type=jnp.float32)
            + fcb_ref[...])

    return kernel


def prepare_params(lstm_params, fc_w, fc_b, hidden_d,
                   compute_dtype=jnp.bfloat16):
    """One-time weight prep (do NOT re-run per forward call): transpose to
    (in_dim, 4H), pad every gate block to a full 128-lane slot, fuse
    b_ih + b_hh, fold the sigmoid's 1/2 argument scaling into the i/f/o gate
    columns (sigmoid(z) = 0.5*tanh(z/2)+0.5), cast matmul operands to bf16.
    PyTorch shapes expected: w_ih (4H, D_l), w_hh (4H, H), b_* (4H,),
    fc_w (O, H), fc_b (O,)."""
    H = hidden_d
    Hp = _round_up(H, _LANE)
    layers = []
    for (w_ih, w_hh, b_ih, b_hh) in lstm_params:
        d_in = w_ih.shape[1]
        Dp = _round_up(d_in, _LANE)
        w_ih_t = jnp.zeros((Dp, 4 * Hp), jnp.float32)
        w_hh_t = jnp.zeros((Hp, 4 * Hp), jnp.float32)
        bias = jnp.zeros((1, 4 * Hp), jnp.float32)
        b = b_ih + b_hh
        for g in range(4):           # gate order [i, f, g, o]
            scale = 1.0 if g == 2 else 0.5      # pre-scale sigmoid gates
            w_ih_t = w_ih_t.at[:d_in, g * Hp:g * Hp + H].set(
                scale * jnp.transpose(w_ih[g * H:(g + 1) * H, :]))
            w_hh_t = w_hh_t.at[:H, g * Hp:g * Hp + H].set(
                scale * jnp.transpose(w_hh[g * H:(g + 1) * H, :]))
            bias = bias.at[0, g * Hp:g * Hp + H].set(
                scale * b[g * H:(g + 1) * H])
        layers.append((w_ih_t.astype(compute_dtype),
                       w_hh_t.astype(compute_dtype),
                       bias))
    O = fc_w.shape[0]
    Op = _round_up(O, _LANE)
    fc_w_t = (jnp.zeros((Hp, Op), jnp.float32)
              .at[:H, :O].set(jnp.transpose(fc_w))
              .astype(compute_dtype))
    fc_b_p = jnp.zeros((1, Op), jnp.float32).at[0, :O].set(fc_b)
    return {"layers": layers, "fc_w_t": fc_w_t, "fc_b": fc_b_p,
            "H": H, "Hp": Hp, "O": O, "Op": Op,
            "compute_dtype": compute_dtype}


def lstm_model_forward(x, h0, prepped):
    """x: (B, T, input_d) f32; h0: (L, B, H) f32 (c0 = zeros, as in the
    PyTorch module's forward).  Returns (B, output_d) f32."""
    layers = prepped["layers"]
    fc_w_t, fc_b = prepped["fc_w_t"], prepped["fc_b"]
    H, Hp, O, Op = prepped["H"], prepped["Hp"], prepped["O"], prepped["Op"]
    compute_dtype = prepped["compute_dtype"]

    B, T, D = x.shape
    L = len(layers)
    Bp = _round_up(B, _SUBLANE)
    Dp = layers[0][0].shape[0]
    cbytes = jnp.dtype(compute_dtype).itemsize

    # Time-major, padded input (bf16 — only ever an MXU LHS):
    # row t*Bp + b holds x[b, t, :].
    x_tm = jnp.transpose(x, (1, 0, 2))                        # (T, B, D)
    x_p = (jnp.zeros((T, Bp, Dp), compute_dtype)
           .at[:, :B, :D].set(x_tm.astype(compute_dtype))
           .reshape(T * Bp, Dp))
    h0_p = jnp.zeros((L, Bp, Hp), jnp.float32).at[:, :B, :H].set(h0)

    inputs = [x_p, h0_p]
    for (w_ih_t, w_hh_t, bias) in layers:
        inputs += [w_ih_t, w_hh_t, bias]
    inputs += [fc_w_t, fc_b]

    # Cap the projection scratch (the #1 VMEM consumer) independent of T.
    TC = _choose_time_chunk(T, Bp * 4 * Hp * 4, _PROJ_SCRATCH_BUDGET)

    n_seq = 0 if L == 1 else (1 if L == 2 else 2)   # ping-pong hidden seqs
    scratch_shapes = [pltpu.VMEM((TC * Bp, 4 * Hp), jnp.float32)]
    scratch_shapes += [pltpu.VMEM((T * Bp, Hp), compute_dtype)
                       for _ in range(n_seq)]

    # Advisory cost estimate.
    flops = 0
    for (w_ih_t, _, _) in layers:
        flops += 2 * T * Bp * w_ih_t.shape[0] * 4 * Hp   # batched input proj
        flops += 2 * T * Bp * Hp * 4 * Hp                # recurrent matmuls
    flops += 2 * Bp * Hp * Op                            # final FC
    transcendentals = L * T * Bp * 5 * Hp                # tanh work / step
    input_bytes = int(sum(a.size * a.dtype.itemsize for a in inputs))
    out_bytes = Bp * Op * 4
    bytes_accessed = input_bytes + out_bytes

    # Generation-aware scoped-VMEM budget (v7x has only 64 MiB per TC).
    try:
        phys_vmem = int(pltpu.get_tpu_info().vmem_capacity_bytes)
    except Exception:
        phys_vmem = 64 * 1024 * 1024                     # conservative floor
    vmem_cap = int(phys_vmem * 0.85)
    scratch_bytes = (TC * Bp * 4 * Hp * 4 + n_seq * T * Bp * Hp * cbytes)
    needed = input_bytes + out_bytes + scratch_bytes
    vmem_limit = int(min(max(int(needed * 1.5) + (4 << 20), 16 << 20),
                         vmem_cap))

    kernel = _make_lstm_kernel(L, T, TC, Bp, Hp, n_seq, compute_dtype)
    vmem_spec = pl.BlockSpec(memory_space=pltpu.MemorySpace.VMEM)
    out_p = pl.pallas_call(
        kernel,
        out_shape=jax.ShapeDtypeStruct((Bp, Op), jnp.float32),
        in_specs=[vmem_spec] * len(inputs),
        out_specs=vmem_spec,
        scratch_shapes=scratch_shapes,
        compiler_params=pltpu.CompilerParams(vmem_limit_bytes=vmem_limit),
        cost_estimate=pl.CostEstimate(
            flops=int(flops),
            transcendentals=int(transcendentals),
            bytes_accessed=int(bytes_accessed)),
    )(*inputs)
    return out_p[:B, :O]


def _init_params(key, input_d, hidden_d, layer_d, output_d):
    """Deterministic init matching PyTorch nn.LSTM / nn.Linear shapes
    (uniform(-1/sqrt(H), 1/sqrt(H)))."""
    params = []
    k = 1.0 / float(math.sqrt(hidden_d))
    keys = jax.random.split(key, 4 * layer_d + 2)
    idx = 0
    for l in range(layer_d):
        d_in = input_d if l == 0 else hidden_d
        w_ih = jax.random.uniform(keys[idx], (4 * hidden_d, d_in),
                                  minval=-k, maxval=k, dtype=jnp.float32); idx += 1
        w_hh = jax.random.uniform(keys[idx], (4 * hidden_d, hidden_d),
                                  minval=-k, maxval=k, dtype=jnp.float32); idx += 1
        b_ih = jax.random.uniform(keys[idx], (4 * hidden_d,),
                                  minval=-k, maxval=k, dtype=jnp.float32); idx += 1
        b_hh = jax.random.uniform(keys[idx], (4 * hidden_d,),
                                  minval=-k, maxval=k, dtype=jnp.float32); idx += 1
        params.append((w_ih, w_hh, b_ih, b_hh))
    fc_w = jax.random.uniform(keys[idx], (output_d, hidden_d),
                              minval=-k, maxval=k, dtype=jnp.float32); idx += 1
    fc_b = jax.random.uniform(keys[idx], (output_d,),
                              minval=-k, maxval=k, dtype=jnp.float32)
    return params, fc_w, fc_b


if __name__ == "__main__":
    # Small shapes consistent with the module's forward.
    batch, seq, input_d, hidden_d, layer_d, output_d = 2, 8, 16, 32, 2, 4

    root = jax.random.PRNGKey(0)
    k_x, k_h0, k_p = jax.random.split(root, 3)

    x = jax.random.normal(k_x, (batch, seq, input_d), dtype=jnp.float32)
    # Matches forward(): h0 ~ randn (deterministic here); c0 = zeros in-kernel.
    h0 = jax.random.normal(k_h0, (layer_d, batch, hidden_d), dtype=jnp.float32)

    lstm_params, fc_w, fc_b = _init_params(k_p, input_d, hidden_d, layer_d,
                                           output_d)
    prepped = prepare_params(lstm_params, fc_w, fc_b, hidden_d)  # one-time prep

    fwd = jax.jit(lambda xx, hh: lstm_model_forward(xx, hh, prepped))
    out = fwd(x, h0)
    jax.block_until_ready(out)
    assert out.shape == (batch, output_d)
    print("KERNEL_OK")
</pallas_src>

<mosaic_0001>
module attributes {stable_mosaic.version = 11 : i64} {
  func.func @kernel(%arg0: memref<64x128xbf16, #tpu.memory_space<vmem>>, %arg1: memref<2x8x128xf32, #tpu.memory_space<vmem>>, %arg2: memref<128x512xbf16, #tpu.memory_space<vmem>>, %arg3: memref<128x512xbf16, #tpu.memory_space<vmem>>, %arg4: memref<1x512xf32, #tpu.memory_space<vmem>>, %arg5: memref<128x512xbf16, #tpu.memory_space<vmem>>, %arg6: memref<128x512xbf16, #tpu.memory_space<vmem>>, %arg7: memref<1x512xf32, #tpu.memory_space<vmem>>, %arg8: memref<128x128xbf16, #tpu.memory_space<vmem>>, %arg9: memref<1x128xf32, #tpu.memory_space<vmem>>, %arg10: memref<8x128xf32, #tpu.memory_space<vmem>>, %arg11: memref<64x512xf32, #tpu.memory_space<vmem>>, %arg12: memref<64x128xbf16, #tpu.memory_space<vmem>>) attributes {dimension_semantics = [], scalar_prefetch = 0 : i64, scratch_operands = 2 : i64, tpu.core_type = #tpu.core_type<tc>} {
    %c0 = arith.constant 0 : index
    %c0_0 = arith.constant 0 : index
    %0 = vector.load %arg2[%c0, %c0_0] : memref<128x512xbf16, #tpu.memory_space<vmem>>, vector<128x512xbf16>
    %c0_1 = arith.constant 0 : index
    %c0_2 = arith.constant 0 : index
    %1 = vector.load %arg3[%c0_1, %c0_2] : memref<128x512xbf16, #tpu.memory_space<vmem>>, vector<128x512xbf16>
    %c0_3 = arith.constant 0 : index
    %c0_4 = arith.constant 0 : index
    %2 = vector.load %arg4[%c0_3, %c0_4] : memref<1x512xf32, #tpu.memory_space<vmem>>, vector<1x512xf32>
    %c0_5 = arith.constant 0 : index
    %c0_6 = arith.constant 0 : index
    %c0_7 = arith.constant 0 : index
    %3 = vector.load %arg1[%c0_5, %c0_6, %c0_7] : memref<2x8x128xf32, #tpu.memory_space<vmem>>, vector<1x8x128xf32>
    %4 = vector.shape_cast %3 : vector<1x8x128xf32> to vector<8x128xf32>
    %5 = arith.truncf %4 : vector<8x128xf32> to vector<8x128xbf16>
    %cst = arith.constant 0.000000e+00 : f32
    %6 = vector.broadcast %cst : f32 to vector<8x128xf32>
    %c0_8 = arith.constant 0 : index
    %c0_9 = arith.constant 0 : index
    %7 = vector.load %arg0[%c0_8, %c0_9] : memref<64x128xbf16, #tpu.memory_space<vmem>>, vector<64x128xbf16>
    %cst_10 = arith.constant dense<0.000000e+00> : vector<64x512xf32>
    %8 = tpu.matmul %7, %0, %cst_10 {dimension_numbers = #tpu.dot_dimension_numbers<[1], [0], [0], [1], [0, 0, 1, 1], [], []>} : vector<64x128xbf16>, vector<128x512xbf16>, vector<64x512xf32> -> vector<64x512xf32>
    %9 = vector.broadcast %2 : vector<1x512xf32> to vector<64x512xf32>
    %10 = arith.addf %8, %9 : vector<64x512xf32>
    %c0_11 = arith.constant 0 : index
    %c0_12 = arith.constant 0 : index
    %11 = vector.load %arg11[%c0_11, %c0_12] : memref<64x512xf32, #tpu.memory_space<vmem>>, vector<64x512xf32>
    tpu.vector_store %arg11[%c0_11, %c0_12], %10 {strides = array<i32>} : memref<64x512xf32, #tpu.memory_space<vmem>>, vector<64x512xf32>,
    %c0_i32 = arith.constant 0 : i32
    %c8_i32 = arith.constant 8 : i32
    %12 = arith.muli %c0_i32, %c8_i32 : i32
    %13 = tpu.assume_multiple %12, 8 : i32
    %14 = arith.index_cast %13 : i32 to index
    %c0_13 = arith.constant 0 : index
    %15 = vector.load %arg11[%14, %c0_13] : memref<64x512xf32, #tpu.memory_space<vmem>>, vector<8x512xf32>
    %cst_14 = arith.constant dense<0.000000e+00> : vector<8x512xf32>
    %16 = tpu.matmul %5, %1, %cst_14 {dimension_numbers = #tpu.dot_dimension_numbers<[1], [0], [0], [1], [0, 0, 1, 1], [], []>} : vector<8x128xbf16>, vector<128x512xbf16>, vector<8x512xf32> -> vector<8x512xf32>
    %17 = arith.addf %15, %16 : vector<8x512xf32>
    %18 = math.tanh %17 : vector<8x512xf32>
    %19 = vector.extract_strided_slice %18 {offsets = [0, 0], sizes = [8, 128], strides = [1, 1]} : vector<8x512xf32> to vector<8x128xf32>
    %cst_15 = arith.constant 5.000000e-01 : f32
    %20 = vector.broadcast %cst_15 : f32 to vector<8x128xf32>
    %21 = arith.mulf %20, %19 : vector<8x128xf32>
    %cst_16 = arith.constant 5.000000e-01 : f32
    %22 = vector.broadcast %cst_16 : f32 to vector<8x128xf32>
    %23 = arith.addf %21, %22 : vector<8x128xf32>
    %24 = vector.extract_strided_slice %18 {offsets = [0, 128], sizes = [8, 128], strides = [1, 1]} : vector<8x512xf32> to vector<8x128xf32>
    %cst_17 = arith.constant 5.000000e-01 : f32
    %25 = vector.broadcast %cst_17 : f32 to vector<8x128xf32>
    %26 = arith.mulf %25, %24 : vector<8x128xf32>
    %cst_18 = arith.constant 5.000000e-01 : f32
    %27 = vector.broadcast %cst_18 : f32 to vector<8x128xf32>
    %28 = arith.addf %26, %27 : vector<8x128xf32>
    %29 = vector.extract_strided_slice %18 {offsets = [0, 256], sizes = [8, 128], strides = [1, 1]} : vector<8x512xf32> to vector<8x128xf32>
    %30 = vector.extract_strided_slice %18 {offsets = [0, 384], sizes = [8, 128], strides = [1, 1]} : vector<8x512xf32> to vector<8x128xf32>
    %cst_19 = arith.constant 5.000000e-01 : f32
    %31 = vector.broadcast %cst_19 : f32 to vector<8x128xf32>
    %32 = arith.mulf %31, %30 : vector<8x128xf32>
    %cst_20 = arith.constant 5.000000e-01 : f32
    %33 = vector.broadcast %cst_20 : f32 to vector<8x128xf32>
    %34 = arith.addf %32, %33 : vector<8x128xf32>
    %35 = arith.mulf %28, %6 : vector<8x128xf32>
    %36 = arith.mulf %23, %29 : vector<8x128xf32>
    %37 = arith.addf %35, %36 : vector<8x128xf32>
    %38 = math.tanh %37 : vector<8x128xf32>
    %39 = arith.mulf %34, %38 : vector<8x128xf32>
    %40 = arith.truncf %39 : vector<8x128xf32> to vector<8x128xbf16>
    %c0_i32_21 = arith.constant 0 : i32
    %41 = arith.addi %c0_i32_21, %13 : i32
    %42 = arith.index_cast %41 : i32 to index
    %c0_22 = arith.constant 0 : index
    %43 = vector.load %arg12[%42, %c0_22] : memref<64x128xbf16, #tpu.memory_space<vmem>>, vector<8x128xbf16>
    tpu.vector_store %arg12[%42, %c0_22], %40 {strides = array<i32>} : memref<64x128xbf16, #tpu.memory_space<vmem>>, vector<8x128xbf16>,
    %c1_i32 = arith.constant 1 : i32
    %c8_i32_23 = arith.constant 8 : i32
    %44 = arith.muli %c1_i32, %c8_i32_23 : i32
    %45 = tpu.assume_multiple %44, 8 : i32
    %46 = arith.index_cast %45 : i32 to index
    %c0_24 = arith.constant 0 : index
    %47 = vector.load %arg11[%46, %c0_24] : memref<64x512xf32, #tpu.memory_space<vmem>>, vector<8x512xf32>
    %cst_25 = arith.constant dense<0.000000e+00> : vector<8x512xf32>
    %48 = tpu.matmul %40, %1, %cst_25 {dimension_numbers = #tpu.dot_dimension_numbers<[1], [0], [0], [1], [0, 0, 1, 1], [], []>} : vector<8x128xbf16>, vector<128x512xbf16>, vector<8x512xf32> -> vector<8x512xf32>
    %49 = arith.addf %47, %48 : vector<8x512xf32>
    %50 = math.tanh %49 : vector<8x512xf32>
    %51 = vector.extract_strided_slice %50 {offsets = [0, 0], sizes = [8, 128], strides = [1, 1]} : vector<8x512xf32> to vector<8x128xf32>
    %cst_26 = arith.constant 5.000000e-01 : f32
    %52 = vector.broadcast %cst_26 : f32 to vector<8x128xf32>
    %53 = arith.mulf %52, %51 : vector<8x128xf32>
    %cst_27 = arith.constant 5.000000e-01 : f32
    %54 = vector.broadcast %cst_27 : f32 to vector<8x128xf32>
    %55 = arith.addf %53, %54 : vector<8x128xf32>
    %56 = vector.extract_strided_slice %50 {offsets = [0, 128], sizes = [8, 128], strides = [1, 1]} : vector<8x512xf32> to vector<8x128xf32>
    %cst_28 = arith.constant 5.000000e-01 : f32
    %57 = vector.broadcast %cst_28 : f32 to vector<8x128xf32>
    %58 = arith.mulf %57, %56 : vector<8x128xf32>
    %cst_29 = arith.constant 5.000000e-01 : f32
    %59 = vector.broadcast %cst_29 : f32 to vector<8x128xf32>
    %60 = arith.addf %58, %59 : vector<8x128xf32>
    %61 = vector.extract_strided_slice %50 {offsets = [0, 256], sizes = [8, 128], strides = [1, 1]} : vector<8x512xf32> to vector<8x128xf32>
    %62 = vector.extract_strided_slice %50 {offsets = [0, 384], sizes = [8, 128], strides = [1, 1]} : vector<8x512xf32> to vector<8x128xf32>
    %cst_30 = arith.constant 5.000000e-01 : f32
    %63 = vector.broadcast %cst_30 : f32 to vector<8x128xf32>
    %64 = arith.mulf %63, %62 : vector<8x128xf32>
    %cst_31 = arith.constant 5.000000e-01 : f32
    %65 = vector.broadcast %cst_31 : f32 to vector<8x128xf32>
    %66 = arith.addf %64, %65 : vector<8x128xf32>
    %67 = arith.mulf %60, %37 : vector<8x128xf32>
    %68 = arith.mulf %55, %61 : vector<8x128xf32>
    %69 = arith.addf %67, %68 : vector<8x128xf32>
    %70 = math.tanh %69 : vector<8x128xf32>
    %71 = arith.mulf %66, %70 : vector<8x128xf32>
    %72 = arith.truncf %71 : vector<8x128xf32> to vector<8x128xbf16>
    %c0_i32_32 = arith.constant 0 : i32
    %73 = arith.addi %c0_i32_32, %45 : i32
    %74 = arith.index_cast %73 : i32 to index
    %c0_33 = arith.constant 0 : index
    %75 = vector.load %arg12[%74, %c0_33] : memref<64x128xbf16, #tpu.memory_space<vmem>>, vector<8x128xbf16>
    tpu.vector_store %arg12[%74, %c0_33], %72 {strides = array<i32>} : memref<64x128xbf16, #tpu.memory_space<vmem>>, vector<8x128xbf16>,
    %c2_i32 = arith.constant 2 : i32
    %c8_i32_34 = arith.constant 8 : i32
    %76 = arith.muli %c2_i32, %c8_i32_34 : i32
    %77 = tpu.assume_multiple %76, 8 : i32
    %78 = arith.index_cast %77 : i32 to index
    %c0_35 = arith.constant 0 : index
    %79 = vector.load %arg11[%78, %c0_35] : memref<64x512xf32, #tpu.memory_space<vmem>>, vector<8x512xf32>
    %cst_36 = arith.constant dense<0.000000e+00> : vector<8x512xf32>
    %80 = tpu.matmul %72, %1, %cst_36 {dimension_numbers = #tpu.dot_dimension_numbers<[1], [0], [0], [1], [0, 0, 1, 1], [], []>} : vector<8x128xbf16>, vector<128x512xbf16>, vector<8x512xf32> -> vector<8x512xf32>
    %81 = arith.addf %79, %80 : vector<8x512xf32>
    %82 = math.tanh %81 : vector<8x512xf32>
    %83 = vector.extract_strided_slice %82 {offsets = [0, 0], sizes = [8, 128], strides = [1, 1]} : vector<8x512xf32> to vector<8x128xf32>
    %cst_37 = arith.constant 5.000000e-01 : f32
    %84 = vector.broadcast %cst_37 : f32 to vector<8x128xf32>
    %85 = arith.mulf %84, %83 : vector<8x128xf32>
    %cst_38 = arith.constant 5.000000e-01 : f32
    %86 = vector.broadcast %cst_38 : f32 to vector<8x128xf32>
    %87 = arith.addf %85, %86 : vector<8x128xf32>
    %88 = vector.extract_strided_slice %82 {offsets = [0, 128], sizes = [8, 128], strides = [1, 1]} : vector<8x512xf32> to vector<8x128xf32>
    %cst_39 = arith.constant 5.000000e-01 : f32
    %89 = vector.broadcast %cst_39 : f32 to vector<8x128xf32>
    %90 = arith.mulf %89, %88 : vector<8x128xf32>
    %cst_40 = arith.constant 5.000000e-01 : f32
    %91 = vector.broadcast %cst_40 : f32 to vector<8x128xf32>
    %92 = arith.addf %90, %91 : vector<8x128xf32>
    %93 = vector.extract_strided_slice %82 {offsets = [0, 256], sizes = [8, 128], strides = [1, 1]} : vector<8x512xf32> to vector<8x128xf32>
    %94 = vector.extract_strided_slice %82 {offsets = [0, 384], sizes = [8, 128], strides = [1, 1]} : vector<8x512xf32> to vector<8x128xf32>
    %cst_41 = arith.constant 5.000000e-01 : f32
    %95 = vector.broadcast %cst_41 : f32 to vector<8x128xf32>
    %96 = arith.mulf %95, %94 : vector<8x128xf32>
    %cst_42 = arith.constant 5.000000e-01 : f32
    %97 = vector.broadcast %cst_42 : f32 to vector<8x128xf32>
    %98 = arith.addf %96, %97 : vector<8x128xf32>
    %99 = arith.mulf %92, %69 : vector<8x128xf32>
    %100 = arith.mulf %87, %93 : vector<8x128xf32>
    %101 = arith.addf %99, %100 : vector<8x128xf32>
    %102 = math.tanh %101 : vector<8x128xf32>
    %103 = arith.mulf %98, %102 : vector<8x128xf32>
    %104 = arith.truncf %103 : vector<8x128xf32> to vector<8x128xbf16>
    %c0_i32_43 = arith.constant 0 : i32
    %105 = arith.addi %c0_i32_43, %77 : i32
    %106 = arith.index_cast %105 : i32 to index
    %c0_44 = arith.constant 0 : index
    %107 = vector.load %arg12[%106, %c0_44] : memref<64x128xbf16, #tpu.memory_space<vmem>>, vector<8x128xbf16>
    tpu.vector_store %arg12[%106, %c0_44], %104 {strides = array<i32>} : memref<64x128xbf16, #tpu.memory_space<vmem>>, vector<8x128xbf16>,
    %c3_i32 = arith.constant 3 : i32
    %c8_i32_45 = arith.constant 8 : i32
    %108 = arith.muli %c3_i32, %c8_i32_45 : i32
    %109 = tpu.assume_multiple %108, 8 : i32
    %110 = arith.index_cast %109 : i32 to index
    %c0_46 = arith.constant 0 : index
    %111 = vector.load %arg11[%110, %c0_46] : memref<64x512xf32, #tpu.memory_space<vmem>>, vector<8x512xf32>
    %cst_47 = arith.constant dense<0.000000e+00> : vector<8x512xf32>
    %112 = tpu.matmul %104, %1, %cst_47 {dimension_numbers = #tpu.dot_dimension_numbers<[1], [0], [0], [1], [0, 0, 1, 1], [], []>} : vector<8x128xbf16>, vector<128x512xbf16>, vector<8x512xf32> -> vector<8x512xf32>
    %113 = arith.addf %111, %112 : vector<8x512xf32>
    %114 = math.tanh %113 : vector<8x512xf32>
    %115 = vector.extract_strided_slice %114 {offsets = [0, 0], sizes = [8, 128], strides = [1, 1]} : vector<8x512xf32> to vector<8x128xf32>
    %cst_48 = arith.constant 5.000000e-01 : f32
    %116 = vector.broadcast %cst_48 : f32 to vector<8x128xf32>
    %117 = arith.mulf %116, %115 : vector<8x128xf32>
    %cst_49 = arith.constant 5.000000e-01 : f32
    %118 = vector.broadcast %cst_49 : f32 to vector<8x128xf32>
    %119 = arith.addf %117, %118 : vector<8x128xf32>
    %120 = vector.extract_strided_slice %114 {offsets = [0, 128], sizes = [8, 128], strides = [1, 1]} : vector<8x512xf32> to vector<8x128xf32>
    %cst_50 = arith.constant 5.000000e-01 : f32
    %121 = vector.broadcast %cst_50 : f32 to vector<8x128xf32>
    %122 = arith.mulf %121, %120 : vector<8x128xf32>
    %cst_51 = arith.constant 5.000000e-01 : f32
    %123 = vector.broadcast %cst_51 : f32 to vector<8x128xf32>
    %124 = arith.addf %122, %123 : vector<8x128xf32>
    %125 = vector.extract_strided_slice %114 {offsets = [0, 256], sizes = [8, 128], strides = [1, 1]} : vector<8x512xf32> to vector<8x128xf32>
    %126 = vector.extract_strided_slice %114 {offsets = [0, 384], sizes = [8, 128], strides = [1, 1]} : vector<8x512xf32> to vector<8x128xf32>
    %cst_52 = arith.constant 5.000000e-01 : f32
    %127 = vector.broadcast %cst_52 : f32 to vector<8x128xf32>
    %128 = arith.mulf %127, %126 : vector<8x128xf32>
    %cst_53 = arith.constant 5.000000e-01 : f32
    %129 = vector.broadcast %cst_53 : f32 to vector<8x128xf32>
    %130 = arith.addf %128, %129 : vector<8x128xf32>
    %131 = arith.mulf %124, %101 : vector<8x128xf32>
    %132 = arith.mulf %119, %125 : vector<8x128xf32>
    %133 = arith.addf %131, %132 : vector<8x128xf32>
    %134 = math.tanh %133 : vector<8x128xf32>
    %135 = arith.mulf %130, %134 : vector<8x128xf32>
    %136 = arith.truncf %135 : vector<8x128xf32> to vector<8x128xbf16>
    %c0_i32_54 = arith.constant 0 : i32
    %137 = arith.addi %c0_i32_54, %109 : i32
    %138 = arith.index_cast %137 : i32 to index
    %c0_55 = arith.constant 0 : index
    %139 = vector.load %arg12[%138, %c0_55] : memref<64x128xbf16, #tpu.memory_space<vmem>>, vector<8x128xbf16>
    tpu.vector_store %arg12[%138, %c0_55], %136 {strides = array<i32>} : memref<64x128xbf16, #tpu.memory_space<vmem>>, vector<8x128xbf16>,
    %c4_i32 = arith.constant 4 : i32
    %c8_i32_56 = arith.constant 8 : i32
    %140 = arith.muli %c4_i32, %c8_i32_56 : i32
    %141 = tpu.assume_multiple %140, 8 : i32
    %142 = arith.index_cast %141 : i32 to index
    %c0_57 = arith.constant 0 : index
    %143 = vector.load %arg11[%142, %c0_57] : memref<64x512xf32, #tpu.memory_space<vmem>>, vector<8x512xf32>
    %cst_58 = arith.constant dense<0.000000e+00> : vector<8x512xf32>
    %144 = tpu.matmul %136, %1, %cst_58 {dimension_numbers = #tpu.dot_dimension_numbers<[1], [0], [0], [1], [0, 0, 1, 1], [], []>} : vector<8x128xbf16>, vector<128x512xbf16>, vector<8x512xf32> -> vector<8x512xf32>
    %145 = arith.addf %143, %144 : vector<8x512xf32>
    %146 = math.tanh %145 : vector<8x512xf32>
    %147 = vector.extract_strided_slice %146 {offsets = [0, 0], sizes = [8, 128], strides = [1, 1]} : vector<8x512xf32> to vector<8x128xf32>
    %cst_59 = arith.constant 5.000000e-01 : f32
    %148 = vector.broadcast %cst_59 : f32 to vector<8x128xf32>
    %149 = arith.mulf %148, %147 : vector<8x128xf32>
    %cst_60 = arith.constant 5.000000e-01 : f32
    %150 = vector.broadcast %cst_60 : f32 to vector<8x128xf32>
    %151 = arith.addf %149, %150 : vector<8x128xf32>
    %152 = vector.extract_strided_slice %146 {offsets = [0, 128], sizes = [8, 128], strides = [1, 1]} : vector<8x512xf32> to vector<8x128xf32>
    %cst_61 = arith.constant 5.000000e-01 : f32
    %153 = vector.broadcast %cst_61 : f32 to vector<8x128xf32>
    %154 = arith.mulf %153, %152 : vector<8x128xf32>
    %cst_62 = arith.constant 5.000000e-01 : f32
    %155 = vector.broadcast %cst_62 : f32 to vector<8x128xf32>
    %156 = arith.addf %154, %155 : vector<8x128xf32>
    %157 = vector.extract_strided_slice %146 {offsets = [0, 256], sizes = [8, 128], strides = [1, 1]} : vector<8x512xf32> to vector<8x128xf32>
    %158 = vector.extract_strided_slice %146 {offsets = [0, 384], sizes = [8, 128], strides = [1, 1]} : vector<8x512xf32> to vector<8x128xf32>
    %cst_63 = arith.constant 5.000000e-01 : f32
    %159 = vector.broadcast %cst_63 : f32 to vector<8x128xf32>
    %160 = arith.mulf %159, %158 : vector<8x128xf32>
    %cst_64 = arith.constant 5.000000e-01 : f32
    %161 = vector.broadcast %cst_64 : f32 to vector<8x128xf32>
    %162 = arith.addf %160, %161 : vector<8x128xf32>
    %163 = arith.mulf %156, %133 : vector<8x128xf32>
    %164 = arith.mulf %151, %157 : vector<8x128xf32>
    %165 = arith.addf %163, %164 : vector<8x128xf32>
    %166 = math.tanh %165 : vector<8x128xf32>
    %167 = arith.mulf %162, %166 : vector<8x128xf32>
    %168 = arith.truncf %167 : vector<8x128xf32> to vector<8x128xbf16>
    %c0_i32_65 = arith.constant 0 : i32
    %169 = arith.addi %c0_i32_65, %141 : i32
    %170 = arith.index_cast %169 : i32 to index
    %c0_66 = arith.constant 0 : index
    %171 = vector.load %arg12[%170, %c0_66] : memref<64x128xbf16, #tpu.memory_space<vmem>>, vector<8x128xbf16>
    tpu.vector_store %arg12[%170, %c0_66], %168 {strides = array<i32>} : memref<64x128xbf16, #tpu.memory_space<vmem>>, vector<8x128xbf16>,
    %c5_i32 = arith.constant 5 : i32
    %c8_i32_67 = arith.constant 8 : i32
    %172 = arith.muli %c5_i32, %c8_i32_67 : i32
    %173 = tpu.assume_multiple %172, 8 : i32
    %174 = arith.index_cast %173 : i32 to index
    %c0_68 = arith.constant 0 : index
    %175 = vector.load %arg11[%174, %c0_68] : memref<64x512xf32, #tpu.memory_space<vmem>>, vector<8x512xf32>
    %cst_69 = arith.constant dense<0.000000e+00> : vector<8x512xf32>
    %176 = tpu.matmul %168, %1, %cst_69 {dimension_numbers = #tpu.dot_dimension_numbers<[1], [0], [0], [1], [0, 0, 1, 1], [], []>} : vector<8x128xbf16>, vector<128x512xbf16>, vector<8x512xf32> -> vector<8x512xf32>
    %177 = arith.addf %175, %176 : vector<8x512xf32>
    %178 = math.tanh %177 : vector<8x512xf32>
    %179 = vector.extract_strided_slice %178 {offsets = [0, 0], sizes = [8, 128], strides = [1, 1]} : vector<8x512xf32> to vector<8x128xf32>
    %cst_70 = arith.constant 5.000000e-01 : f32
    %180 = vector.broadcast %cst_70 : f32 to vector<8x128xf32>
    %181 = arith.mulf %180, %179 : vector<8x128xf32>
    %cst_71 = arith.constant 5.000000e-01 : f32
    %182 = vector.broadcast %cst_71 : f32 to vector<8x128xf32>
    %183 = arith.addf %181, %182 : vector<8x128xf32>
    %184 = vector.extract_strided_slice %178 {offsets = [0, 128], sizes = [8, 128], strides = [1, 1]} : vector<8x512xf32> to vector<8x128xf32>
    %cst_72 = arith.constant 5.000000e-01 : f32
    %185 = vector.broadcast %cst_72 : f32 to vector<8x128xf32>
    %186 = arith.mulf %185, %184 : vector<8x128xf32>
    %cst_73 = arith.constant 5.000000e-01 : f32
    %187 = vector.broadcast %cst_73 : f32 to vector<8x128xf32>
    %188 = arith.addf %186, %187 : vector<8x128xf32>
    %189 = vector.extract_strided_slice %178 {offsets = [0, 256], sizes = [8, 128], strides = [1, 1]} : vector<8x512xf32> to vector<8x128xf32>
    %190 = vector.extract_strided_slice %178 {offsets = [0, 384], sizes = [8, 128], strides = [1, 1]} : vector<8x512xf32> to vector<8x128xf32>
    %cst_74 = arith.constant 5.000000e-01 : f32
    %191 = vector.broadcast %cst_74 : f32 to vector<8x128xf32>
    %192 = arith.mulf %191, %190 : vector<8x128xf32>
    %cst_75 = arith.constant 5.000000e-01 : f32
    %193 = vector.broadcast %cst_75 : f32 to vector<8x128xf32>
    %194 = arith.addf %192, %193 : vector<8x128xf32>
    %195 = arith.mulf %188, %165 : vector<8x128xf32>
    %196 = arith.mulf %183, %189 : vector<8x128xf32>
    %197 = arith.addf %195, %196 : vector<8x128xf32>
    %198 = math.tanh %197 : vector<8x128xf32>
    %199 = arith.mulf %194, %198 : vector<8x128xf32>
    %200 = arith.truncf %199 : vector<8x128xf32> to vector<8x128xbf16>
    %c0_i32_76 = arith.constant 0 : i32
    %201 = arith.addi %c0_i32_76, %173 : i32
    %202 = arith.index_cast %201 : i32 to index
    %c0_77 = arith.constant 0 : index
    %203 = vector.load %arg12[%202, %c0_77] : memref<64x128xbf16, #tpu.memory_space<vmem>>, vector<8x128xbf16>
    tpu.vector_store %arg12[%202, %c0_77], %200 {strides = array<i32>} : memref<64x128xbf16, #tpu.memory_space<vmem>>, vector<8x128xbf16>,
    %c6_i32 = arith.constant 6 : i32
    %c8_i32_78 = arith.constant 8 : i32
    %204 = arith.muli %c6_i32, %c8_i32_78 : i32
    %205 = tpu.assume_multiple %204, 8 : i32
    %206 = arith.index_cast %205 : i32 to index
    %c0_79 = arith.constant 0 : index
    %207 = vector.load %arg11[%206, %c0_79] : memref<64x512xf32, #tpu.memory_space<vmem>>, vector<8x512xf32>
    %cst_80 = arith.constant dense<0.000000e+00> : vector<8x512xf32>
    %208 = tpu.matmul %200, %1, %cst_80 {dimension_numbers = #tpu.dot_dimension_numbers<[1], [0], [0], [1], [0, 0, 1, 1], [], []>} : vector<8x128xbf16>, vector<128x512xbf16>, vector<8x512xf32> -> vector<8x512xf32>
    %209 = arith.addf %207, %208 : vector<8x512xf32>
    %210 = math.tanh %209 : vector<8x512xf32>
    %211 = vector.extract_strided_slice %210 {offsets = [0, 0], sizes = [8, 128], strides = [1, 1]} : vector<8x512xf32> to vector<8x128xf32>
    %cst_81 = arith.constant 5.000000e-01 : f32
    %212 = vector.broadcast %cst_81 : f32 to vector<8x128xf32>
    %213 = arith.mulf %212, %211 : vector<8x128xf32>
    %cst_82 = arith.constant 5.000000e-01 : f32
    %214 = vector.broadcast %cst_82 : f32 to vector<8x128xf32>
    %215 = arith.addf %213, %214 : vector<8x128xf32>
    %216 = vector.extract_strided_slice %210 {offsets = [0, 128], sizes = [8, 128], strides = [1, 1]} : vector<8x512xf32> to vector<8x128xf32>
    %cst_83 = arith.constant 5.000000e-01 : f32
    %217 = vector.broadcast %cst_83 : f32 to vector<8x128xf32>
    %218 = arith.mulf %217, %216 : vector<8x128xf32>
    %cst_84 = arith.constant 5.000000e-01 : f32
    %219 = vector.broadcast %cst_84 : f32 to vector<8x128xf32>
    %220 = arith.addf %218, %219 : vector<8x128xf32>
    %221 = vector.extract_strided_slice %210 {offsets = [0, 256], sizes = [8, 128], strides = [1, 1]} : vector<8x512xf32> to vector<8x128xf32>
    %222 = vector.extract_strided_slice %210 {offsets = [0, 384], sizes = [8, 128], strides = [1, 1]} : vector<8x512xf32> to vector<8x128xf32>
    %cst_85 = arith.constant 5.000000e-01 : f32
    %223 = vector.broadcast %cst_85 : f32 to vector<8x128xf32>
    %224 = arith.mulf %223, %222 : vector<8x128xf32>
    %cst_86 = arith.constant 5.000000e-01 : f32
    %225 = vector.broadcast %cst_86 : f32 to vector<8x128xf32>
    %226 = arith.addf %224, %225 : vector<8x128xf32>
    %227 = arith.mulf %220, %197 : vector<8x128xf32>
    %228 = arith.mulf %215, %221 : vector<8x128xf32>
    %229 = arith.addf %227, %228 : vector<8x128xf32>
    %230 = math.tanh %229 : vector<8x128xf32>
    %231 = arith.mulf %226, %230 : vector<8x128xf32>
    %232 = arith.truncf %231 : vector<8x128xf32> to vector<8x128xbf16>
    %c0_i32_87 = arith.constant 0 : i32
    %233 = arith.addi %c0_i32_87, %205 : i32
    %234 = arith.index_cast %233 : i32 to index
    %c0_88 = arith.constant 0 : index
    %235 = vector.load %arg12[%234, %c0_88] : memref<64x128xbf16, #tpu.memory_space<vmem>>, vector<8x128xbf16>
    tpu.vector_store %arg12[%234, %c0_88], %232 {strides = array<i32>} : memref<64x128xbf16, #tpu.memory_space<vmem>>, vector<8x128xbf16>,
    %c7_i32 = arith.constant 7 : i32
    %c8_i32_89 = arith.constant 8 : i32
    %236 = arith.muli %c7_i32, %c8_i32_89 : i32
    %237 = tpu.assume_multiple %236, 8 : i32
    %238 = arith.index_cast %237 : i32 to index
    %c0_90 = arith.constant 0 : index
    %239 = vector.load %arg11[%238, %c0_90] : memref<64x512xf32, #tpu.memory_space<vmem>>, vector<8x512xf32>
    %cst_91 = arith.constant dense<0.000000e+00> : vector<8x512xf32>
    %240 = tpu.matmul %232, %1, %cst_91 {dimension_numbers = #tpu.dot_dimension_numbers<[1], [0], [0], [1], [0, 0, 1, 1], [], []>} : vector<8x128xbf16>, vector<128x512xbf16>, vector<8x512xf32> -> vector<8x512xf32>
    %241 = arith.addf %239, %240 : vector<8x512xf32>
    %242 = math.tanh %241 : vector<8x512xf32>
    %243 = vector.extract_strided_slice %242 {offsets = [0, 0], sizes = [8, 128], strides = [1, 1]} : vector<8x512xf32> to vector<8x128xf32>
    %cst_92 = arith.constant 5.000000e-01 : f32
    %244 = vector.broadcast %cst_92 : f32 to vector<8x128xf32>
    %245 = arith.mulf %244, %243 : vector<8x128xf32>
    %cst_93 = arith.constant 5.000000e-01 : f32
    %246 = vector.broadcast %cst_93 : f32 to vector<8x128xf32>
    %247 = arith.addf %245, %246 : vector<8x128xf32>
    %248 = vector.extract_strided_slice %242 {offsets = [0, 128], sizes = [8, 128], strides = [1, 1]} : vector<8x512xf32> to vector<8x128xf32>
    %cst_94 = arith.constant 5.000000e-01 : f32
    %249 = vector.broadcast %cst_94 : f32 to vector<8x128xf32>
    %250 = arith.mulf %249, %248 : vector<8x128xf32>
    %cst_95 = arith.constant 5.000000e-01 : f32
    %251 = vector.broadcast %cst_95 : f32 to vector<8x128xf32>
    %252 = arith.addf %250, %251 : vector<8x128xf32>
    %253 = vector.extract_strided_slice %242 {offsets = [0, 256], sizes = [8, 128], strides = [1, 1]} : vector<8x512xf32> to vector<8x128xf32>
    %254 = vector.extract_strided_slice %242 {offsets = [0, 384], sizes = [8, 128], strides = [1, 1]} : vector<8x512xf32> to vector<8x128xf32>
    %cst_96 = arith.constant 5.000000e-01 : f32
    %255 = vector.broadcast %cst_96 : f32 to vector<8x128xf32>
    %256 = arith.mulf %255, %254 : vector<8x128xf32>
    %cst_97 = arith.constant 5.000000e-01 : f32
    %257 = vector.broadcast %cst_97 : f32 to vector<8x128xf32>
    %258 = arith.addf %256, %257 : vector<8x128xf32>
    %259 = arith.mulf %252, %229 : vector<8x128xf32>
    %260 = arith.mulf %247, %253 : vector<8x128xf32>
    %261 = arith.addf %259, %260 : vector<8x128xf32>
    %262 = math.tanh %261 : vector<8x128xf32>
    %263 = arith.mulf %258, %262 : vector<8x128xf32>
    %264 = arith.truncf %263 : vector<8x128xf32> to vector<8x128xbf16>
    %c0_i32_98 = arith.constant 0 : i32
    %265 = arith.addi %c0_i32_98, %237 : i32
    %266 = arith.index_cast %265 : i32 to index
    %c0_99 = arith.constant 0 : index
    %267 = vector.load %arg12[%266, %c0_99] : memref<64x128xbf16, #tpu.memory_space<vmem>>, vector<8x128xbf16>
    tpu.vector_store %arg12[%266, %c0_99], %264 {strides = array<i32>} : memref<64x128xbf16, #tpu.memory_space<vmem>>, vector<8x128xbf16>,
    %c8_i32_100 = arith.constant 8 : i32
    %c0_101 = arith.constant 0 : index
    %c0_102 = arith.constant 0 : index
    %268 = vector.load %arg5[%c0_101, %c0_102] : memref<128x512xbf16, #tpu.memory_space<vmem>>, vector<128x512xbf16>
    %c0_103 = arith.constant 0 : index
    %c0_104 = arith.constant 0 : index
    %269 = vector.load %arg6[%c0_103, %c0_104] : memref<128x512xbf16, #tpu.memory_space<vmem>>, vector<128x512xbf16>
    %c0_105 = arith.constant 0 : index
    %c0_106 = arith.constant 0 : index
    %270 = vector.load %arg7[%c0_105, %c0_106] : memref<1x512xf32, #tpu.memory_space<vmem>>, vector<1x512xf32>
    %c1 = arith.constant 1 : index
    %c0_107 = arith.constant 0 : index
    %c0_108 = arith.constant 0 : index
    %271 = vector.load %arg1[%c1, %c0_107, %c0_108] : memref<2x8x128xf32, #tpu.memory_space<vmem>>, vector<1x8x128xf32>
    %272 = vector.shape_cast %271 : vector<1x8x128xf32> to vector<8x128xf32>
    %273 = arith.truncf %272 : vector<8x128xf32> to vector<8x128xbf16>
    %cst_109 = arith.constant 0.000000e+00 : f32
    %274 = vector.broadcast %cst_109 : f32 to vector<8x128xf32>
    %c0_110 = arith.constant 0 : index
    %c0_111 = arith.constant 0 : index
    %275 = vector.load %arg12[%c0_110, %c0_111] : memref<64x128xbf16, #tpu.memory_space<vmem>>, vector<64x128xbf16>
    %cst_112 = arith.constant dense<0.000000e+00> : vector<64x512xf32>
    %276 = tpu.matmul %275, %268, %cst_112 {dimension_numbers = #tpu.dot_dimension_numbers<[1], [0], [0], [1], [0, 0, 1, 1], [], []>} : vector<64x128xbf16>, vector<128x512xbf16>, vector<64x512xf32> -> vector<64x512xf32>
    %277 = vector.broadcast %270 : vector<1x512xf32> to vector<64x512xf32>
    %278 = arith.addf %276, %277 : vector<64x512xf32>
    %c0_113 = arith.constant 0 : index
    %c0_114 = arith.constant 0 : index
    %279 = vector.load %arg11[%c0_113, %c0_114] : memref<64x512xf32, #tpu.memory_space<vmem>>, vector<64x512xf32>
    tpu.vector_store %arg11[%c0_113, %c0_114], %278 {strides = array<i32>} : memref<64x512xf32, #tpu.memory_space<vmem>>, vector<64x512xf32>,
    %c0_i32_115 = arith.constant 0 : i32
    %c8_i32_116 = arith.constant 8 : i32
    %280 = arith.muli %c0_i32_115, %c8_i32_116 : i32
    %281 = tpu.assume_multiple %280, 8 : i32
    %282 = arith.index_cast %281 : i32 to index
    %c0_117 = arith.constant 0 : index
    %283 = vector.load %arg11[%282, %c0_117] : memref<64x512xf32, #tpu.memory_space<vmem>>, vector<8x512xf32>
    %cst_118 = arith.constant dense<0.000000e+00> : vector<8x512xf32>
    %284 = tpu.matmul %273, %269, %cst_118 {dimension_numbers = #tpu.dot_dimension_numbers<[1], [0], [0], [1], [0, 0, 1, 1], [], []>} : vector<8x128xbf16>, vector<128x512xbf16>, vector<8x512xf32> -> vector<8x512xf32>
    %285 = arith.addf %283, %284 : vector<8x512xf32>
    %286 = math.tanh %285 : vector<8x512xf32>
    %287 = vector.extract_strided_slice %286 {offsets = [0, 0], sizes = [8, 128], strides = [1, 1]} : vector<8x512xf32> to vector<8x128xf32>
    %cst_119 = arith.constant 5.000000e-01 : f32
    %288 = vector.broadcast %cst_119 : f32 to vector<8x128xf32>
    %289 = arith.mulf %288, %287 : vector<8x128xf32>
    %cst_120 = arith.constant 5.000000e-01 : f32
    %290 = vector.broadcast %cst_120 : f32 to vector<8x128xf32>
    %291 = arith.addf %289, %290 : vector<8x128xf32>
    %292 = vector.extract_strided_slice %286 {offsets = [0, 128], sizes = [8, 128], strides = [1, 1]} : vector<8x512xf32> to vector<8x128xf32>
    %cst_121 = arith.constant 5.000000e-01 : f32
    %293 = vector.broadcast %cst_121 : f32 to vector<8x128xf32>
    %294 = arith.mulf %293, %292 : vector<8x128xf32>
    %cst_122 = arith.constant 5.000000e-01 : f32
    %295 = vector.broadcast %cst_122 : f32 to vector<8x128xf32>
    %296 = arith.addf %294, %295 : vector<8x128xf32>
    %297 = vector.extract_strided_slice %286 {offsets = [0, 256], sizes = [8, 128], strides = [1, 1]} : vector<8x512xf32> to vector<8x128xf32>
    %298 = vector.extract_strided_slice %286 {offsets = [0, 384], sizes = [8, 128], strides = [1, 1]} : vector<8x512xf32> to vector<8x128xf32>
    %cst_123 = arith.constant 5.000000e-01 : f32
    %299 = vector.broadcast %cst_123 : f32 to vector<8x128xf32>
    %300 = arith.mulf %299, %298 : vector<8x128xf32>
    %cst_124 = arith.constant 5.000000e-01 : f32
    %301 = vector.broadcast %cst_124 : f32 to vector<8x128xf32>
    %302 = arith.addf %300, %301 : vector<8x128xf32>
    %303 = arith.mulf %296, %274 : vector<8x128xf32>
    %304 = arith.mulf %291, %297 : vector<8x128xf32>
    %305 = arith.addf %303, %304 : vector<8x128xf32>
    %306 = math.tanh %305 : vector<8x128xf32>
    %307 = arith.mulf %302, %306 : vector<8x128xf32>
    %308 = arith.truncf %307 : vector<8x128xf32> to vector<8x128xbf16>
    %c1_i32_125 = arith.constant 1 : i32
    %c8_i32_126 = arith.constant 8 : i32
    %309 = arith.muli %c1_i32_125, %c8_i32_126 : i32
    %310 = tpu.assume_multiple %309, 8 : i32
    %311 = arith.index_cast %310 : i32 to index
    %c0_127 = arith.constant 0 : index
    %312 = vector.load %arg11[%311, %c0_127] : memref<64x512xf32, #tpu.memory_space<vmem>>, vector<8x512xf32>
    %cst_128 = arith.constant dense<0.000000e+00> : vector<8x512xf32>
    %313 = tpu.matmul %308, %269, %cst_128 {dimension_numbers = #tpu.dot_dimension_numbers<[1], [0], [0], [1], [0, 0, 1, 1], [], []>} : vector<8x128xbf16>, vector<128x512xbf16>, vector<8x512xf32> -> vector<8x512xf32>
    %314 = arith.addf %312, %313 : vector<8x512xf32>
    %315 = math.tanh %314 : vector<8x512xf32>
    %316 = vector.extract_strided_slice %315 {offsets = [0, 0], sizes = [8, 128], strides = [1, 1]} : vector<8x512xf32> to vector<8x128xf32>
    %cst_129 = arith.constant 5.000000e-01 : f32
    %317 = vector.broadcast %cst_129 : f32 to vector<8x128xf32>
    %318 = arith.mulf %317, %316 : vector<8x128xf32>
    %cst_130 = arith.constant 5.000000e-01 : f32
    %319 = vector.broadcast %cst_130 : f32 to vector<8x128xf32>
    %320 = arith.addf %318, %319 : vector<8x128xf32>
    %321 = vector.extract_strided_slice %315 {offsets = [0, 128], sizes = [8, 128], strides = [1, 1]} : vector<8x512xf32> to vector<8x128xf32>
    %cst_131 = arith.constant 5.000000e-01 : f32
    %322 = vector.broadcast %cst_131 : f32 to vector<8x128xf32>
    %323 = arith.mulf %322, %321 : vector<8x128xf32>
    %cst_132 = arith.constant 5.000000e-01 : f32
    %324 = vector.broadcast %cst_132 : f32 to vector<8x128xf32>
    %325 = arith.addf %323, %324 : vector<8x128xf32>
    %326 = vector.extract_strided_slice %315 {offsets = [0, 256], sizes = [8, 128], strides = [1, 1]} : vector<8x512xf32> to vector<8x128xf32>
    %327 = vector.extract_strided_slice %315 {offsets = [0, 384], sizes = [8, 128], strides = [1, 1]} : vector<8x512xf32> to vector<8x128xf32>
    %cst_133 = arith.constant 5.000000e-01 : f32
    %328 = vector.broadcast %cst_133 : f32 to vector<8x128xf32>
    %329 = arith.mulf %328, %327 : vector<8x128xf32>
    %cst_134 = arith.constant 5.000000e-01 : f32
    %330 = vector.broadcast %cst_134 : f32 to vector<8x128xf32>
    %331 = arith.addf %329, %330 : vector<8x128xf32>
    %332 = arith.mulf %325, %305 : vector<8x128xf32>
    %333 = arith.mulf %320, %326 : vector<8x128xf32>
    %334 = arith.addf %332, %333 : vector<8x128xf32>
    %335 = math.tanh %334 : vector<8x128xf32>
    %336 = arith.mulf %331, %335 : vector<8x128xf32>
    %337 = arith.truncf %336 : vector<8x128xf32> to vector<8x128xbf16>
    %c2_i32_135 = arith.constant 2 : i32
    %c8_i32_136 = arith.constant 8 : i32
    %338 = arith.muli %c2_i32_135, %c8_i32_136 : i32
    %339 = tpu.assume_multiple %338, 8 : i32
    %340 = arith.index_cast %339 : i32 to index
    %c0_137 = arith.constant 0 : index
    %341 = vector.load %arg11[%340, %c0_137] : memref<64x512xf32, #tpu.memory_space<vmem>>, vector<8x512xf32>
    %cst_138 = arith.constant dense<0.000000e+00> : vector<8x512xf32>
    %342 = tpu.matmul %337, %269, %cst_138 {dimension_numbers = #tpu.dot_dimension_numbers<[1], [0], [0], [1], [0, 0, 1, 1], [], []>} : vector<8x128xbf16>, vector<128x512xbf16>, vector<8x512xf32> -> vector<8x512xf32>
    %343 = arith.addf %341, %342 : vector<8x512xf32>
    %344 = math.tanh %343 : vector<8x512xf32>
    %345 = vector.extract_strided_slice %344 {offsets = [0, 0], sizes = [8, 128], strides = [1, 1]} : vector<8x512xf32> to vector<8x128xf32>
    %cst_139 = arith.constant 5.000000e-01 : f32
    %346 = vector.broadcast %cst_139 : f32 to vector<8x128xf32>
    %347 = arith.mulf %346, %345 : vector<8x128xf32>
    %cst_140 = arith.constant 5.000000e-01 : f32
    %348 = vector.broadcast %cst_140 : f32 to vector<8x128xf32>
    %349 = arith.addf %347, %348 : vector<8x128xf32>
    %350 = vector.extract_strided_slice %344 {offsets = [0, 128], sizes = [8, 128], strides = [1, 1]} : vector<8x512xf32> to vector<8x128xf32>
    %cst_141 = arith.constant 5.000000e-01 : f32
    %351 = vector.broadcast %cst_141 : f32 to vector<8x128xf32>
    %352 = arith.mulf %351, %350 : vector<8x128xf32>
    %cst_142 = arith.constant 5.000000e-01 : f32
    %353 = vector.broadcast %cst_142 : f32 to vector<8x128xf32>
    %354 = arith.addf %352, %353 : vector<8x128xf32>
    %355 = vector.extract_strided_slice %344 {offsets = [0, 256], sizes = [8, 128], strides = [1, 1]} : vector<8x512xf32> to vector<8x128xf32>
    %356 = vector.extract_strided_slice %344 {offsets = [0, 384], sizes = [8, 128], strides = [1, 1]} : vector<8x512xf32> to vector<8x128xf32>
    %cst_143 = arith.constant 5.000000e-01 : f32
    %357 = vector.broadcast %cst_143 : f32 to vector<8x128xf32>
    %358 = arith.mulf %357, %356 : vector<8x128xf32>
    %cst_144 = arith.constant 5.000000e-01 : f32
    %359 = vector.broadcast %cst_144 : f32 to vector<8x128xf32>
    %360 = arith.addf %358, %359 : vector<8x128xf32>
    %361 = arith.mulf %354, %334 : vector<8x128xf32>
    %362 = arith.mulf %349, %355 : vector<8x128xf32>
    %363 = arith.addf %361, %362 : vector<8x128xf32>
    %364 = math.tanh %363 : vector<8x128xf32>
    %365 = arith.mulf %360, %364 : vector<8x128xf32>
    %366 = arith.truncf %365 : vector<8x128xf32> to vector<8x128xbf16>
    %c3_i32_145 = arith.constant 3 : i32
    %c8_i32_146 = arith.constant 8 : i32
    %367 = arith.muli %c3_i32_145, %c8_i32_146 : i32
    %368 = tpu.assume_multiple %367, 8 : i32
    %369 = arith.index_cast %368 : i32 to index
    %c0_147 = arith.constant 0 : index
    %370 = vector.load %arg11[%369, %c0_147] : memref<64x512xf32, #tpu.memory_space<vmem>>, vector<8x512xf32>
    %cst_148 = arith.constant dense<0.000000e+00> : vector<8x512xf32>
    %371 = tpu.matmul %366, %269, %cst_148 {dimension_numbers = #tpu.dot_dimension_numbers<[1], [0], [0], [1], [0, 0, 1, 1], [], []>} : vector<8x128xbf16>, vector<128x512xbf16>, vector<8x512xf32> -> vector<8x512xf32>
    %372 = arith.addf %370, %371 : vector<8x512xf32>
    %373 = math.tanh %372 : vector<8x512xf32>
    %374 = vector.extract_strided_slice %373 {offsets = [0, 0], sizes = [8, 128], strides = [1, 1]} : vector<8x512xf32> to vector<8x128xf32>
    %cst_149 = arith.constant 5.000000e-01 : f32
    %375 = vector.broadcast %cst_149 : f32 to vector<8x128xf32>
    %376 = arith.mulf %375, %374 : vector<8x128xf32>
    %cst_150 = arith.constant 5.000000e-01 : f32
    %377 = vector.broadcast %cst_150 : f32 to vector<8x128xf32>
    %378 = arith.addf %376, %377 : vector<8x128xf32>
    %379 = vector.extract_strided_slice %373 {offsets = [0, 128], sizes = [8, 128], strides = [1, 1]} : vector<8x512xf32> to vector<8x128xf32>
    %cst_151 = arith.constant 5.000000e-01 : f32
    %380 = vector.broadcast %cst_151 : f32 to vector<8x128xf32>
    %381 = arith.mulf %380, %379 : vector<8x128xf32>
    %cst_152 = arith.constant 5.000000e-01 : f32
    %382 = vector.broadcast %cst_152 : f32 to vector<8x128xf32>
    %383 = arith.addf %381, %382 : vector<8x128xf32>
    %384 = vector.extract_strided_slice %373 {offsets = [0, 256], sizes = [8, 128], strides = [1, 1]} : vector<8x512xf32> to vector<8x128xf32>
    %385 = vector.extract_strided_slice %373 {offsets = [0, 384], sizes = [8, 128], strides = [1, 1]} : vector<8x512xf32> to vector<8x128xf32>
    %cst_153 = arith.constant 5.000000e-01 : f32
    %386 = vector.broadcast %cst_153 : f32 to vector<8x128xf32>
    %387 = arith.mulf %386, %385 : vector<8x128xf32>
    %cst_154 = arith.constant 5.000000e-01 : f32
    %388 = vector.broadcast %cst_154 : f32 to vector<8x128xf32>
    %389 = arith.addf %387, %388 : vector<8x128xf32>
    %390 = arith.mulf %383, %363 : vector<8x128xf32>
    %391 = arith.mulf %378, %384 : vector<8x128xf32>
    %392 = arith.addf %390, %391 : vector<8x128xf32>
    %393 = math.tanh %392 : vector<8x128xf32>
    %394 = arith.mulf %389, %393 : vector<8x128xf32>
    %395 = arith.truncf %394 : vector<8x128xf32> to vector<8x128xbf16>
    %c4_i32_155 = arith.constant 4 : i32
    %c8_i32_156 = arith.constant 8 : i32
    %396 = arith.muli %c4_i32_155, %c8_i32_156 : i32
    %397 = tpu.assume_multiple %396, 8 : i32
    %398 = arith.index_cast %397 : i32 to index
    %c0_157 = arith.constant 0 : index
    %399 = vector.load %arg11[%398, %c0_157] : memref<64x512xf32, #tpu.memory_space<vmem>>, vector<8x512xf32>
    %cst_158 = arith.constant dense<0.000000e+00> : vector<8x512xf32>
    %400 = tpu.matmul %395, %269, %cst_158 {dimension_numbers = #tpu.dot_dimension_numbers<[1], [0], [0], [1], [0, 0, 1, 1], [], []>} : vector<8x128xbf16>, vector<128x512xbf16>, vector<8x512xf32> -> vector<8x512xf32>
    %401 = arith.addf %399, %400 : vector<8x512xf32>
    %402 = math.tanh %401 : vector<8x512xf32>
    %403 = vector.extract_strided_slice %402 {offsets = [0, 0], sizes = [8, 128], strides = [1, 1]} : vector<8x512xf32> to vector<8x128xf32>
    %cst_159 = arith.constant 5.000000e-01 : f32
    %404 = vector.broadcast %cst_159 : f32 to vector<8x128xf32>
    %405 = arith.mulf %404, %403 : vector<8x128xf32>
    %cst_160 = arith.constant 5.000000e-01 : f32
    %406 = vector.broadcast %cst_160 : f32 to vector<8x128xf32>
    %407 = arith.addf %405, %406 : vector<8x128xf32>
    %408 = vector.extract_strided_slice %402 {offsets = [0, 128], sizes = [8, 128], strides = [1, 1]} : vector<8x512xf32> to vector<8x128xf32>
    %cst_161 = arith.constant 5.000000e-01 : f32
    %409 = vector.broadcast %cst_161 : f32 to vector<8x128xf32>
    %410 = arith.mulf %409, %408 : vector<8x128xf32>
    %cst_162 = arith.constant 5.000000e-01 : f32
    %411 = vector.broadcast %cst_162 : f32 to vector<8x128xf32>
    %412 = arith.addf %410, %411 : vector<8x128xf32>
    %413 = vector.extract_strided_slice %402 {offsets = [0, 256], sizes = [8, 128], strides = [1, 1]} : vector<8x512xf32> to vector<8x128xf32>
    %414 = vector.extract_strided_slice %402 {offsets = [0, 384], sizes = [8, 128], strides = [1, 1]} : vector<8x512xf32> to vector<8x128xf32>
    %cst_163 = arith.constant 5.000000e-01 : f32
    %415 = vector.broadcast %cst_163 : f32 to vector<8x128xf32>
    %416 = arith.mulf %415, %414 : vector<8x128xf32>
    %cst_164 = arith.constant 5.000000e-01 : f32
    %417 = vector.broadcast %cst_164 : f32 to vector<8x128xf32>
    %418 = arith.addf %416, %417 : vector<8x128xf32>
    %419 = arith.mulf %412, %392 : vector<8x128xf32>
    %420 = arith.mulf %407, %413 : vector<8x128xf32>
    %421 = arith.addf %419, %420 : vector<8x128xf32>
    %422 = math.tanh %421 : vector<8x128xf32>
    %423 = arith.mulf %418, %422 : vector<8x128xf32>
    %424 = arith.truncf %423 : vector<8x128xf32> to vector<8x128xbf16>
    %c5_i32_165 = arith.constant 5 : i32
    %c8_i32_166 = arith.constant 8 : i32
    %425 = arith.muli %c5_i32_165, %c8_i32_166 : i32
    %426 = tpu.assume_multiple %425, 8 : i32
    %427 = arith.index_cast %426 : i32 to index
    %c0_167 = arith.constant 0 : index
    %428 = vector.load %arg11[%427, %c0_167] : memref<64x512xf32, #tpu.memory_space<vmem>>, vector<8x512xf32>
    %cst_168 = arith.constant dense<0.000000e+00> : vector<8x512xf32>
    %429 = tpu.matmul %424, %269, %cst_168 {dimension_numbers = #tpu.dot_dimension_numbers<[1], [0], [0], [1], [0, 0, 1, 1], [], []>} : vector<8x128xbf16>, vector<128x512xbf16>, vector<8x512xf32> -> vector<8x512xf32>
    %430 = arith.addf %428, %429 : vector<8x512xf32>
    %431 = math.tanh %430 : vector<8x512xf32>
    %432 = vector.extract_strided_slice %431 {offsets = [0, 0], sizes = [8, 128], strides = [1, 1]} : vector<8x512xf32> to vector<8x128xf32>
    %cst_169 = arith.constant 5.000000e-01 : f32
    %433 = vector.broadcast %cst_169 : f32 to vector<8x128xf32>
    %434 = arith.mulf %433, %432 : vector<8x128xf32>
    %cst_170 = arith.constant 5.000000e-01 : f32
    %435 = vector.broadcast %cst_170 : f32 to vector<8x128xf32>
    %436 = arith.addf %434, %435 : vector<8x128xf32>
    %437 = vector.extract_strided_slice %431 {offsets = [0, 128], sizes = [8, 128], strides = [1, 1]} : vector<8x512xf32> to vector<8x128xf32>
    %cst_171 = arith.constant 5.000000e-01 : f32
    %438 = vector.broadcast %cst_171 : f32 to vector<8x128xf32>
    %439 = arith.mulf %438, %437 : vector<8x128xf32>
    %cst_172 = arith.constant 5.000000e-01 : f32
    %440 = vector.broadcast %cst_172 : f32 to vector<8x128xf32>
    %441 = arith.addf %439, %440 : vector<8x128xf32>
    %442 = vector.extract_strided_slice %431 {offsets = [0, 256], sizes = [8, 128], strides = [1, 1]} : vector<8x512xf32> to vector<8x128xf32>
    %443 = vector.extract_strided_slice %431 {offsets = [0, 384], sizes = [8, 128], strides = [1, 1]} : vector<8x512xf32> to vector<8x128xf32>
    %cst_173 = arith.constant 5.000000e-01 : f32
    %444 = vector.broadcast %cst_173 : f32 to vector<8x128xf32>
    %445 = arith.mulf %444, %443 : vector<8x128xf32>
    %cst_174 = arith.constant 5.000000e-01 : f32
    %446 = vector.broadcast %cst_174 : f32 to vector<8x128xf32>
    %447 = arith.addf %445, %446 : vector<8x128xf32>
    %448 = arith.mulf %441, %421 : vector<8x128xf32>
    %449 = arith.mulf %436, %442 : vector<8x128xf32>
    %450 = arith.addf %448, %449 : vector<8x128xf32>
    %451 = math.tanh %450 : vector<8x128xf32>
    %452 = arith.mulf %447, %451 : vector<8x128xf32>
    %453 = arith.truncf %452 : vector<8x128xf32> to vector<8x128xbf16>
    %c6_i32_175 = arith.constant 6 : i32
    %c8_i32_176 = arith.constant 8 : i32
    %454 = arith.muli %c6_i32_175, %c8_i32_176 : i32
    %455 = tpu.assume_multiple %454, 8 : i32
    %456 = arith.index_cast %455 : i32 to index
    %c0_177 = arith.constant 0 : index
    %457 = vector.load %arg11[%456, %c0_177] : memref<64x512xf32, #tpu.memory_space<vmem>>, vector<8x512xf32>
    %cst_178 = arith.constant dense<0.000000e+00> : vector<8x512xf32>
    %458 = tpu.matmul %453, %269, %cst_178 {dimension_numbers = #tpu.dot_dimension_numbers<[1], [0], [0], [1], [0, 0, 1, 1], [], []>} : vector<8x128xbf16>, vector<128x512xbf16>, vector<8x512xf32> -> vector<8x512xf32>
    %459 = arith.addf %457, %458 : vector<8x512xf32>
    %460 = math.tanh %459 : vector<8x512xf32>
    %461 = vector.extract_strided_slice %460 {offsets = [0, 0], sizes = [8, 128], strides = [1, 1]} : vector<8x512xf32> to vector<8x128xf32>
    %cst_179 = arith.constant 5.000000e-01 : f32
    %462 = vector.broadcast %cst_179 : f32 to vector<8x128xf32>
    %463 = arith.mulf %462, %461 : vector<8x128xf32>
    %cst_180 = arith.constant 5.000000e-01 : f32
    %464 = vector.broadcast %cst_180 : f32 to vector<8x128xf32>
    %465 = arith.addf %463, %464 : vector<8x128xf32>
    %466 = vector.extract_strided_slice %460 {offsets = [0, 128], sizes = [8, 128], strides = [1, 1]} : vector<8x512xf32> to vector<8x128xf32>
    %cst_181 = arith.constant 5.000000e-01 : f32
    %467 = vector.broadcast %cst_181 : f32 to vector<8x128xf32>
    %468 = arith.mulf %467, %466 : vector<8x128xf32>
    %cst_182 = arith.constant 5.000000e-01 : f32
    %469 = vector.broadcast %cst_182 : f32 to vector<8x128xf32>
    %470 = arith.addf %468, %469 : vector<8x128xf32>
    %471 = vector.extract_strided_slice %460 {offsets = [0, 256], sizes = [8, 128], strides = [1, 1]} : vector<8x512xf32> to vector<8x128xf32>
    %472 = vector.extract_strided_slice %460 {offsets = [0, 384], sizes = [8, 128], strides = [1, 1]} : vector<8x512xf32> to vector<8x128xf32>
    %cst_183 = arith.constant 5.000000e-01 : f32
    %473 = vector.broadcast %cst_183 : f32 to vector<8x128xf32>
    %474 = arith.mulf %473, %472 : vector<8x128xf32>
    %cst_184 = arith.constant 5.000000e-01 : f32
    %475 = vector.broadcast %cst_184 : f32 to vector<8x128xf32>
    %476 = arith.addf %474, %475 : vector<8x128xf32>
    %477 = arith.mulf %470, %450 : vector<8x128xf32>
    %478 = arith.mulf %465, %471 : vector<8x128xf32>
    %479 = arith.addf %477, %478 : vector<8x128xf32>
    %480 = math.tanh %479 : vector<8x128xf32>
    %481 = arith.mulf %476, %480 : vector<8x128xf32>
    %482 = arith.truncf %481 : vector<8x128xf32> to vector<8x128xbf16>
    %c7_i32_185 = arith.constant 7 : i32
    %c8_i32_186 = arith.constant 8 : i32
    %483 = arith.muli %c7_i32_185, %c8_i32_186 : i32
    %484 = tpu.assume_multiple %483, 8 : i32
    %485 = arith.index_cast %484 : i32 to index
    %c0_187 = arith.constant 0 : index
    %486 = vector.load %arg11[%485, %c0_187] : memref<64x512xf32, #tpu.memory_space<vmem>>, vector<8x512xf32>
    %cst_188 = arith.constant dense<0.000000e+00> : vector<8x512xf32>
    %487 = tpu.matmul %482, %269, %cst_188 {dimension_numbers = #tpu.dot_dimension_numbers<[1], [0], [0], [1], [0, 0, 1, 1], [], []>} : vector<8x128xbf16>, vector<128x512xbf16>, vector<8x512xf32> -> vector<8x512xf32>
    %488 = arith.addf %486, %487 : vector<8x512xf32>
    %489 = math.tanh %488 : vector<8x512xf32>
    %490 = vector.extract_strided_slice %489 {offsets = [0, 0], sizes = [8, 128], strides = [1, 1]} : vector<8x512xf32> to vector<8x128xf32>
    %cst_189 = arith.constant 5.000000e-01 : f32
    %491 = vector.broadcast %cst_189 : f32 to vector<8x128xf32>
    %492 = arith.mulf %491, %490 : vector<8x128xf32>
    %cst_190 = arith.constant 5.000000e-01 : f32
    %493 = vector.broadcast %cst_190 : f32 to vector<8x128xf32>
    %494 = arith.addf %492, %493 : vector<8x128xf32>
    %495 = vector.extract_strided_slice %489 {offsets = [0, 128], sizes = [8, 128], strides = [1, 1]} : vector<8x512xf32> to vector<8x128xf32>
    %cst_191 = arith.constant 5.000000e-01 : f32
    %496 = vector.broadcast %cst_191 : f32 to vector<8x128xf32>
    %497 = arith.mulf %496, %495 : vector<8x128xf32>
    %cst_192 = arith.constant 5.000000e-01 : f32
    %498 = vector.broadcast %cst_192 : f32 to vector<8x128xf32>
    %499 = arith.addf %497, %498 : vector<8x128xf32>
    %500 = vector.extract_strided_slice %489 {offsets = [0, 256], sizes = [8, 128], strides = [1, 1]} : vector<8x512xf32> to vector<8x128xf32>
    %501 = vector.extract_strided_slice %489 {offsets = [0, 384], sizes = [8, 128], strides = [1, 1]} : vector<8x512xf32> to vector<8x128xf32>
    %cst_193 = arith.constant 5.000000e-01 : f32
    %502 = vector.broadcast %cst_193 : f32 to vector<8x128xf32>
    %503 = arith.mulf %502, %501 : vector<8x128xf32>
    %cst_194 = arith.constant 5.000000e-01 : f32
    %504 = vector.broadcast %cst_194 : f32 to vector<8x128xf32>
    %505 = arith.addf %503, %504 : vector<8x128xf32>
    %506 = arith.mulf %499, %479 : vector<8x128xf32>
    %507 = arith.mulf %494, %500 : vector<8x128xf32>
    %508 = arith.addf %506, %507 : vector<8x128xf32>
    %509 = math.tanh %508 : vector<8x128xf32>
    %510 = arith.mulf %505, %509 : vector<8x128xf32>
    %511 = arith.truncf %510 : vector<8x128xf32> to vector<8x128xbf16>
    %c8_i32_195 = arith.constant 8 : i32
    %c0_196 = arith.constant 0 : index
    %c0_197 = arith.constant 0 : index
    %512 = vector.load %arg8[%c0_196, %c0_197] : memref<128x128xbf16, #tpu.memory_space<vmem>>, vector<128x128xbf16>
    %cst_198 = arith.constant dense<0.000000e+00> : vector<8x128xf32>
    %513 = tpu.matmul %511, %512, %cst_198 {dimension_numbers = #tpu.dot_dimension_numbers<[1], [0], [0], [1], [0, 0, 1, 1], [], []>} : vector<8x128xbf16>, vector<128x128xbf16>, vector<8x128xf32> -> vector<8x128xf32>
    %c0_199 = arith.constant 0 : index
    %c0_200 = arith.constant 0 : index
    %514 = vector.load %arg9[%c0_199, %c0_200] : memref<1x128xf32, #tpu.memory_space<vmem>>, vector<1x128xf32>
    %515 = vector.broadcast %514 : vector<1x128xf32> to vector<8x128xf32>
    %516 = arith.addf %513, %515 : vector<8x128xf32>
    %c0_201 = arith.constant 0 : index
    %c0_202 = arith.constant 0 : index
    %517 = vector.load %arg10[%c0_201, %c0_202] : memref<8x128xf32, #tpu.memory_space<vmem>>, vector<8x128xf32>
    tpu.vector_store %arg10[%c0_201, %c0_202], %516 {strides = array<i32>} : memref<8x128xf32, #tpu.memory_space<vmem>>, vector<8x128xf32>,
    return
  }
}

</mosaic_0001>

<bundles_post_ra>
// kernel: _lambda_.1
= control target key start
LH: loop header
LB: loop body
LE: loop exit
PB: predicated region body
PF: predicated region fallthrough
CT: control target
= control target key end

     0   :  { %15 = vsyncpa [#allocation5], 0  ;;  %s4655_s0 = inlined_call_operand.vmem [shape: bf16[64,128], index: 0, kind: input, shape index: {}]   ;;  %s4656_s1 = inlined_call_operand.vmem [shape: f32[2,8,128], index: 1, kind: input, shape index: {}]   ;;  %s4657_s2 = inlined_call_operand.hbm [shape: bf16[128,512], index: 2, kind: input, shape index: {}]   ;;  %s4658_s3 = inlined_call_operand.hbm [shape: bf16[128,512], index: 3, kind: input, shape index: {}]   ;;  %s4659_s4 = inlined_call_operand.vmem [shape: f32[1,512], index: 4, kind: input, shape index: {}]   ;;  %s4660_s5 = inlined_call_operand.hbm [shape: bf16[128,512], index: 5, kind: input, shape index: {}]   ;;  %s4661_s6 = inlined_call_operand.hbm [shape: bf16[128,512], index: 6, kind: input, shape index: {}]   ;;  %s4662_s7 = inlined_call_operand.vmem [shape: f32[1,512], index: 7, kind: input, shape index: {}]   ;;  %s4663_s8 = inlined_call_operand.vmem [shape: bf16[128,128], index: 8, kind: input, shape index: {}]   ;;  %s4664_s9 = inlined_call_operand.vmem [shape: f32[1,128], index: 9, kind: input, shape index: {}]   ;;  %s4665_s10 = inlined_call_operand.vmem [shape: f32[8,128], index: 10, kind: output, shape index: {}]  }
   0x1   :  { %16 = vsyncpa [#allocation7], 0 }
   0x2   :  { %17 = vsyncpa [#allocation10], 0  ;;  %s39_s15 = sshll.u32 %s4658_s3, 4  ;;  %s3592_s16 = smov [#allocation6]   ;;  %s40_s15 = int_to_ptr.hbm [resolvable:$true] %s39_s15 }
   0x3   :  { %s41_s17 = sshll.u32 %s3592_s16, 4  ;;  %s26_s20 = sshll.u32 %s4657_s2, 4  ;;  %s42_s17 = int_to_ptr.vmem [resolvable:$true] %s41_s17  ;;  %s27_s20 = int_to_ptr.hbm [resolvable:$true] %s26_s20 }
   0x4   :  { %s3593_s21 = smov 256   ;;  %s3594_s22 = smov 16  }
   0x5   :  { %47 = dma.hbm_to_vmem [thread:$0]  %s40_s15, 4096, %s42_s17, [#allocation7], %s3593_s21, %s3593_s21, %s3594_s22  }
   0x6   :  { %s3595_s23 = smov [#allocation4]   ;;  %s54_s27 = sshll.u32 %s4660_s5, 4  ;;  %s55_s27 = int_to_ptr.hbm [resolvable:$true] %s54_s27 }
   0x7   :  { %s28_s24 = sshll.u32 %s3595_s23, 4  ;;  %s67_s29 = sshll.u32 %s4661_s6, 4  ;;  %s29_s24 = int_to_ptr.vmem [resolvable:$true] %s28_s24  ;;  %s68_s29 = int_to_ptr.hbm [resolvable:$true] %s67_s29 }
   0x8   :  { %34 = dma.hbm_to_vmem [thread:$0]  %s27_s20, 4096, %s29_s24, [#allocation5], %s3593_s21, %s3593_s21, %s3594_s22  }
   0x9   :  { %s3596_s30 = smov [#allocation8]   ;;  %s3597_s2 = smov [#allocation9]  }
   0xa   :  { %s56_s11 = sshll.u32 %s3596_s30, 4  ;;  %s69_s12 = sshll.u32 %s3597_s2, 4  ;;  %s57_s11 = int_to_ptr.vmem [resolvable:$true] %s56_s11  ;;  %s70_s12 = int_to_ptr.vmem [resolvable:$true] %s69_s12 }
   0xb   :  { %62 = dma.hbm_to_vmem [thread:$0]  %s55_s27, 4096, %s57_s11, [#allocation7], %s3593_s21, %s3593_s21, %s3594_s22  }
   0xc   :  { %75 = dma.hbm_to_vmem [thread:$0]  %s68_s29, 4096, %s70_s12, [#allocation10], %s3593_s21, %s3593_s21, %s3594_s22  }
   0xd   :  { %3586 = dma.done.wait [#allocation5], 4096  }
   0xe   :  { %3587 = vsyncadd [#allocation5], 4294963200 }
   0xf   :  { %3588 = dma.done.wait [#allocation7], 8192  }
  0x10   :  { %3589 = vsyncadd [#allocation7], 4294959104 }
  0x11   :  { %3590 = dma.done.wait [#allocation10], 4096  }
  0x12   :  { %3591 = vsyncadd [#allocation10], 4294963200  ;;  %v2732_v0 = vld [vmem:[#allocation4 + $0xe0] sm:$0xf]  ;;  %v3209_v1 = vld [vmem:[#allocation4 + $0xec] sm:$0xf0] }
  0x13   :  { %v3207_v2 = vld [vmem:[#allocation4 + $0xe4] sm:$0xf]  ;;  %v2733_v3 = vor.u32 %v3209_v1, %v2732_v0  ;;  %v2734_v4 = vld [vmem:[#allocation4 + $0xf0] sm:$0xf0]  ;;  %v2740_v5 = vld [vmem:[#allocation4 + $0xe8] sm:$0xf] }
  0x14   :  { %v3210_v6 = vld [vmem:[#allocation4 + $0xf4] sm:$0xf0]  ;;  %v2737_v7 = vor.u32 %v3207_v2, %v2734_v4  ;;  %v3208_v9 = vld [vmem:[#allocation4 + $0xec] sm:$0xf]  ;;  %v2742_v10 = vld [vmem:[#allocation4 + $0xf8] sm:$0xf0] }
  0x15   :  { %v2741_v8 = vor.u32 %v3210_v6, %v2740_v5  ;;  %v2716_v11 = vld [vmem:[#allocation4 + $0xc0] sm:$0xf]  ;;  %366 = vmatpush.bf16.msra.mxu0 %v2733_v3  ;;  %v2745_v12 = vor.u32 %v3208_v9, %v2742_v10  ;;  %v3205_v13 = vld [vmem:[#allocation4 + $0xcc] sm:$0xf0]  ;;  %v3203_v14 = vld [vmem:[#allocation4 + $0xc4] sm:$0xf] }
  0x16   :  { %v2718_v15 = vld [vmem:[#allocation4 + $0xd0] sm:$0xf0]  ;;  %395 = vmatpush.bf16.msra.mxu1 %v2737_v7  ;;  %v2717_v16 = vor.u32 %v3205_v13, %v2716_v11  ;;  %v2724_v18 = vld [vmem:[#allocation4 + $0xc8] sm:$0xf]  ;;  %v3206_v19 = vld [vmem:[#allocation4 + $0xd4] sm:$0xf0] }
  0x17   :  { %424 = vmatpush.bf16.msra.mxu2 %v2741_v8  ;;  %v2721_v17 = vor.u32 %v3203_v14, %v2718_v15  ;;  %v3204_v20 = vld [vmem:[#allocation4 + $0xcc] sm:$0xf]  ;;  %453 = vmatpush.bf16.msra.mxu3 %v2745_v12  ;;  %v2725_v21 = vor.u32 %v3206_v19, %v2724_v18  ;;  %v2726_v22 = vld [vmem:[#allocation4 + $0xd8] sm:$0xf0]  ;;  %v2700_v23 = vld [vmem:[#allocation4 + $0xa0] sm:$0xf] }
  0x18   :  { %v3201_v24 = vld [vmem:[#allocation4 + $0xac] sm:$0xf0]  ;;  %v2729_v25 = vor.u32 %v3204_v20, %v2726_v22  ;;  %v3199_v26 = vld [vmem:[#allocation4 + $0xa4] sm:$0xf]  ;;  %v2702_v27 = vld [vmem:[#allocation4 + $0xb0] sm:$0xf0] }
  0x19   :  { %v2708_v28 = vld [vmem:[#allocation4 + $0xa8] sm:$0xf]  ;;  %367 = vmatpush.bf16.msra.mxu0 %v2717_v16  ;;  %v2701_v29 = vor.u32 %v3201_v24, %v2700_v23  ;;  %v3202_v30 = vld [vmem:[#allocation4 + $0xb4] sm:$0xf0]  ;;  %v3200_v31 = vld [vmem:[#allocation4 + $0xac] sm:$0xf]  ;;  %v2705_v33 = vor.u32 %v3199_v26, %v2702_v27 }
  0x1a   :  { %v2710_v32 = vld [vmem:[#allocation4 + $0xb8] sm:$0xf0]  ;;  %396 = vmatpush.bf16.msra.mxu1 %v2721_v17  ;;  %v2709_v34 = vor.u32 %v3202_v30, %v2708_v28  ;;  %v2684_v35 = vld [vmem:[#allocation4 + $0x80] sm:$0xf]  ;;  %v3197_v36 = vld [vmem:[#allocation4 + $0x8c] sm:$0xf0] }
  0x1b   :  { %425 = vmatpush.bf16.msra.mxu2 %v2725_v21  ;;  %v3195_v37 = vld [vmem:[#allocation4 + $0x84] sm:$0xf]  ;;  %454 = vmatpush.bf16.msra.mxu3 %v2729_v25  ;;  %v2713_v38 = vor.u32 %v3200_v31, %v2710_v32  ;;  %v2686_v39 = vld [vmem:[#allocation4 + $0x90] sm:$0xf0]  ;;  %v2692_v40 = vld [vmem:[#allocation4 + $0x88] sm:$0xf]  ;;  %v2685_v44 = vor.u32 %v3197_v36, %v2684_v35 }
  0x1c   :  { %v3198_v41 = vld [vmem:[#allocation4 + $0x94] sm:$0xf0]  ;;  %v3196_v42 = vld [vmem:[#allocation4 + $0x8c] sm:$0xf]  ;;  %v2694_v43 = vld [vmem:[#allocation4 + $0x98] sm:$0xf0]  ;;  %v2689_v45 = vor.u32 %v3195_v37, %v2686_v39 }
  0x1d   :  { %368 = vmatpush.bf16.msra.mxu0 %v2701_v29  ;;  %v2693_v46 = vor.u32 %v3198_v41, %v2692_v40  ;;  %v2668_v47 = vld [vmem:[#allocation4 + $0x60] sm:$0xf]  ;;  %v3193_v48 = vld [vmem:[#allocation4 + $0x6c] sm:$0xf0]  ;;  %v3191_v49 = vld [vmem:[#allocation4 + $0x64] sm:$0xf]  ;;  %v2697_v50 = vor.u32 %v3196_v42, %v2694_v43 }
  0x1e   :  { %397 = vmatpush.bf16.msra.mxu1 %v2705_v33  ;;  %v2670_v51 = vld [vmem:[#allocation4 + $0x70] sm:$0xf0]  ;;  %v2676_v52 = vld [vmem:[#allocation4 + $0x68] sm:$0xf]  ;;  %v3194_v53 = vld [vmem:[#allocation4 + $0x74] sm:$0xf0]  ;;  %v2669_v56 = vor.u32 %v3193_v48, %v2668_v47 }
  0x1f   :  { %426 = vmatpush.bf16.msra.mxu2 %v2709_v34  ;;  %455 = vmatpush.bf16.msra.mxu3 %v2713_v38  ;;  %v3192_v54 = vld [vmem:[#allocation4 + $0x6c] sm:$0xf]  ;;  %v2678_v55 = vld [vmem:[#allocation4 + $0x78] sm:$0xf0]  ;;  %v2673_v57 = vor.u32 %v3191_v49, %v2670_v51  ;;  %v2677_v58 = vor.u32 %v3194_v53, %v2676_v52  ;;  %v2652_v59 = vld [vmem:[#allocation4 + $0x40] sm:$0xf] }
  0x20   :  { %v3189_v60 = vld [vmem:[#allocation4 + $0x4c] sm:$0xf0]  ;;  %v3187_v61 = vld [vmem:[#allocation4 + $0x44] sm:$0xf]  ;;  %v2681_v62 = vor.u32 %v3192_v54, %v2678_v55  ;;  %v2654_v63 = vld [vmem:[#allocation4 + $0x50] sm:$0xf0] }
  0x21   :  { %369 = vmatpush.bf16.msra.mxu0 %v2685_v44  ;;  %v2660_v0 = vld [vmem:[#allocation4 + $0x48] sm:$0xf]  ;;  %v3190_v1 = vld [vmem:[#allocation4 + $0x54] sm:$0xf0]  ;;  %v3188_v2 = vld [vmem:[#allocation4 + $0x4c] sm:$0xf]  ;;  %v2653_v4 = vor.u32 %v3189_v60, %v2652_v59  ;;  %v2657_v5 = vor.u32 %v3187_v61, %v2654_v63 }
  0x22   :  { %398 = vmatpush.bf16.msra.mxu1 %v2689_v45  ;;  %v2662_v3 = vld [vmem:[#allocation4 + $0x58] sm:$0xf0]  ;;  %v2661_v6 = vor.u32 %v3190_v1, %v2660_v0  ;;  %v2636_v7 = vld [vmem:[#allocation4 + $0x20] sm:$0xf]  ;;  %v3185_v8 = vld [vmem:[#allocation4 + $0x2c] sm:$0xf0] }
  0x23   :  { %427 = vmatpush.bf16.msra.mxu2 %v2693_v46  ;;  %456 = vmatpush.bf16.msra.mxu3 %v2697_v50  ;;  %v3183_v9 = vld [vmem:[#allocation4 + $0x24] sm:$0xf]  ;;  %v2665_v10 = vor.u32 %v3188_v2, %v2662_v3  ;;  %v2638_v11 = vld [vmem:[#allocation4 + $0x30] sm:$0xf0]  ;;  %v2644_v12 = vld [vmem:[#allocation4 + $0x28] sm:$0xf]  ;;  %v2637_v16 = vor.u32 %v3185_v8, %v2636_v7 }
  0x24   :  { %v3186_v13 = vld [vmem:[#allocation4 + $0x34] sm:$0xf0]  ;;  %v3184_v14 = vld [vmem:[#allocation4 + $0x2c] sm:$0xf]  ;;  %v2646_v15 = vld [vmem:[#allocation4 + $0x38] sm:$0xf0]  ;;  %v2641_v18 = vor.u32 %v3183_v9, %v2638_v11 }
  0x25   :  { %370 = vmatpush.bf16.msra.mxu0 %v2669_v56  ;;  %v2620_v17 = vld [vmem:[#allocation4] sm:$0xf]  ;;  %v2645_v19 = vor.u32 %v3186_v13, %v2644_v12  ;;  %v3181_v20 = vld [vmem:[#allocation4 + $0xc] sm:$0xf0]  ;;  %v3179_v21 = vld [vmem:[#allocation4 + $0x4] sm:$0xf]  ;;  %v2649_v23 = vor.u32 %v3184_v14, %v2646_v15 }
  0x26   :  { %399 = vmatpush.bf16.msra.mxu1 %v2673_v57  ;;  %v2622_v22 = vld [vmem:[#allocation4 + $0x10] sm:$0xf0]  ;;  %v2628_v24 = vld [vmem:[#allocation4 + $0x8] sm:$0xf]  ;;  %v3182_v25 = vld [vmem:[#allocation4 + $0x14] sm:$0xf0]  ;;  %v2621_v30 = vor.u32 %v3181_v20, %v2620_v17 }
  0x27   :  { %428 = vmatpush.bf16.msra.mxu2 %v2677_v58  ;;  %457 = vmatpush.bf16.msra.mxu3 %v2681_v62  ;;  %v3180_v26 = vld [vmem:[#allocation4 + $0xc] sm:$0xf]  ;;  %v2630_v27 = vld [vmem:[#allocation4 + $0x18] sm:$0xf0]  ;;  %v2868_v28 = vld [vmem:[#allocation6 + $0xe8] sm:$0xf]  ;;  %v2625_v33 = vor.u32 %v3179_v21, %v2622_v22  ;;  %v2629_v34 = vor.u32 %v3182_v25, %v2628_v24 }
  0x28   :  { %v3242_v29 = vld [vmem:[#allocation6 + $0xf4] sm:$0xf0]  ;;  %v3239_v31 = vld [vmem:[#allocation6 + $0xe4] sm:$0xf]  ;;  %v2862_v32 = vld [vmem:[#allocation6 + $0xf0] sm:$0xf0]  ;;  %v2633_v36 = vor.u32 %v3180_v26, %v2630_v27 }
  0x29   :  { %371 = vmatpush.bf16.msra.mxu0 %v2653_v4  ;;  %v3243_v35 = vld [vmem:[%s4655_s0] sm:$0xff]  ;;  %v3668_v37 = vor.u32 %v3242_v29, %v2868_v28  ;;  %v3241_v39 = vld [vmem:[#allocation6 + $0xec] sm:$0xf0]  ;;  %v3240_v40 = vld [vmem:[#allocation6 + $0xec] sm:$0xf]  ;;  %v3670_v41 = vor.u32 %v3239_v31, %v2862_v32 }
  0x2a   :  { %400 = vmatpush.bf16.msra.mxu1 %v2657_v5  ;;  %v2860_v38 = vld [vmem:[#allocation6 + $0xe0] sm:$0xf]  ;;  %v2870_v42 = vld [vmem:[#allocation6 + $0xf8] sm:$0xf0]  ;;  %v2852_v43 = vld [vmem:[#allocation6 + $0xc8] sm:$0xf] }
  0x2b   :  { %429 = vmatpush.bf16.msra.mxu2 %v2661_v6  ;;  %458 = vmatpush.bf16.msra.mxu3 %v2665_v10  ;;  %v3238_v44 = vld [vmem:[#allocation6 + $0xd4] sm:$0xf0]  ;;  %v3235_v45 = vld [vmem:[#allocation6 + $0xc4] sm:$0xf]  ;;  %v2846_v46 = vld [vmem:[#allocation6 + $0xd0] sm:$0xf0]  ;;  %v3672_v47 = vor.u32 %v3241_v39, %v2860_v38  ;;  %v3675_v49 = vor.u32 %v3240_v40, %v2870_v42 }
  0x2c   :  { %v2844_v48 = vld [vmem:[#allocation6 + $0xc0] sm:$0xf]  ;;  %v3677_v50 = vor.u32 %v3238_v44, %v2852_v43  ;;  %v3237_v51 = vld [vmem:[#allocation6 + $0xcc] sm:$0xf0]  ;;  %v3236_v52 = vld [vmem:[#allocation6 + $0xcc] sm:$0xf]  ;;  %v3680_v53 = vor.u32 %v3235_v45, %v2846_v46 }
  0x2d   :  { %372 = vmatpush.bf16.msra.mxu0 %v2637_v16  ;;  %v2854_v54 = vld [vmem:[#allocation6 + $0xd8] sm:$0xf0]  ;;  %v2836_v55 = vld [vmem:[#allocation6 + $0xa8] sm:$0xf]  ;;  %v3234_v56 = vld [vmem:[#allocation6 + $0xb4] sm:$0xf0]  ;;  %v3683_v59 = vor.u32 %v3237_v51, %v2844_v48 }
  0x2e   :  { %401 = vmatpush.bf16.msra.mxu1 %v2641_v18  ;;  %v3231_v57 = vld [vmem:[#allocation6 + $0xa4] sm:$0xf]  ;;  %v2830_v58 = vld [vmem:[#allocation6 + $0xb0] sm:$0xf0]  ;;  %v3687_v60 = vor.u32 %v3236_v52, %v2854_v54  ;;  %v3689_v61 = vor.u32 %v3234_v56, %v2836_v55  ;;  %v2828_v62 = vld [vmem:[#allocation6 + $0xa0] sm:$0xf] }
  0x2f   :  { %430 = vmatpush.bf16.msra.mxu2 %v2645_v19  ;;  %459 = vmatpush.bf16.msra.mxu3 %v2649_v23  ;;  %v3233_v63 = vld [vmem:[#allocation6 + $0xac] sm:$0xf0]  ;;  %v3232_v0 = vld [vmem:[#allocation6 + $0xac] sm:$0xf]  ;;  %v3692_v1 = vor.u32 %v3231_v57, %v2830_v58  ;;  %v2838_v2 = vld [vmem:[#allocation6 + $0xb8] sm:$0xf0] }
  0x30   :  { %v2820_v3 = vld [vmem:[#allocation6 + $0x88] sm:$0xf]  ;;  %v3230_v4 = vld [vmem:[#allocation6 + $0x94] sm:$0xf0]  ;;  %v3227_v5 = vld [vmem:[#allocation6 + $0x84] sm:$0xf]  ;;  %v3695_v7 = vor.u32 %v3233_v63, %v2828_v62  ;;  %v3699_v8 = vor.u32 %v3232_v0, %v2838_v2 }
  0x31   :  { %373 = vmatpush.bf16.msra.mxu0 %v2621_v30  ;;  %v2814_v6 = vld [vmem:[#allocation6 + $0x90] sm:$0xf0]  ;;  %v3701_v9 = vor.u32 %v3230_v4, %v2820_v3  ;;  %v2812_v10 = vld [vmem:[#allocation6 + $0x80] sm:$0xf]  ;;  %v3229_v11 = vld [vmem:[#allocation6 + $0x8c] sm:$0xf0] }
  0x32   :  { %402 = vmatpush.bf16.msra.mxu1 %v2625_v33  ;;  %v3228_v12 = vld [vmem:[#allocation6 + $0x8c] sm:$0xf]  ;;  %v3704_v13 = vor.u32 %v3227_v5, %v2814_v6  ;;  %v2822_v14 = vld [vmem:[#allocation6 + $0x98] sm:$0xf0]  ;;  %v2804_v15 = vld [vmem:[#allocation6 + $0x68] sm:$0xf]  ;;  %v3710_v20 = vor.u32 %v3229_v11, %v2812_v10 }
  0x33   :  { %431 = vmatpush.bf16.msra.mxu2 %v2629_v34  ;;  %460 = vmatpush.bf16.msra.mxu3 %v2633_v36  ;;  %v3226_v16 = vld [vmem:[#allocation6 + $0x74] sm:$0xf0]  ;;  %v3223_v17 = vld [vmem:[#allocation6 + $0x64] sm:$0xf]  ;;  %v2798_v18 = vld [vmem:[#allocation6 + $0x70] sm:$0xf0]  ;;  %v3714_v21 = vor.u32 %v3228_v12, %v2822_v14 }
  0x34   :  { %374 = vmatmul.bf16.vlgmr.msra.gmra.mxu0 %v3243_v35  ;;  %v3244_v19 = vld [vmem:[%s4655_s0 + $0x8] sm:$0xff]  ;;  %v3716_v22 = vor.u32 %v3226_v16, %v2804_v15  ;;  %v2796_v23 = vld [vmem:[#allocation6 + $0x60] sm:$0xf]  ;;  %v3225_v24 = vld [vmem:[#allocation6 + $0x6c] sm:$0xf0]  ;;  %v3719_v26 = vor.u32 %v3223_v17, %v2798_v18 }
  0x35   :  { %403 = vmatmul.bf16.vlgmr.msra.gmra.mxu1 %v3243_v35  ;;  %681 = vmatpush.bf16.msrb.mxu0 %v3672_v47  ;;  %v3224_v25 = vld [vmem:[#allocation6 + $0x6c] sm:$0xf]  ;;  %v2806_v27 = vld [vmem:[#allocation6 + $0x78] sm:$0xf0]  ;;  %v2788_v28 = vld [vmem:[#allocation6 + $0x48] sm:$0xf]  ;;  %v3722_v32 = vor.u32 %v3225_v24, %v2796_v23 }
  0x36   :  { %694 = vmatpush.bf16.msrb.mxu1 %v3670_v41  ;;  %432 = vmatmul.bf16.vlgmr.msra.gmra.mxu2 %v3243_v35  ;;  %v3222_v29 = vld [vmem:[#allocation6 + $0x54] sm:$0xf0]  ;;  %v3219_v30 = vld [vmem:[#allocation6 + $0x44] sm:$0xf]  ;;  %v2782_v31 = vld [vmem:[#allocation6 + $0x50] sm:$0xf0]  ;;  %v3726_v33 = vor.u32 %v3224_v25, %v2806_v27 }
  0x37   :  { %707 = vmatpush.bf16.msrb.mxu2 %v3668_v37  ;;  %461 = vmatmul.bf16.vlgmr.msra.gmra.mxu3 %v3243_v35  ;;  %v3728_v34 = vor.u32 %v3222_v29, %v2788_v28  ;;  %v2780_v35 = vld [vmem:[#allocation6 + $0x40] sm:$0xf]  ;;  %v3221_v36 = vld [vmem:[#allocation6 + $0x4c] sm:$0xf0]  ;;  %v3731_v38 = vor.u32 %v3219_v30, %v2782_v31  ;;  %v3220_v39 = vld [vmem:[#allocation6 + $0x4c] sm:$0xf] }
  0x38   :  { %720 = vmatpush.bf16.msrb.mxu3 %v3675_v49  ;;  %v2790_v40 = vld [vmem:[#allocation6 + $0x58] sm:$0xf0]  ;;  %v3734_v42 = vor.u32 %v3221_v36, %v2780_v35  ;;  %v2772_v43 = vld [vmem:[#allocation6 + $0x28] sm:$0xf]  ;;  %v3218_v44 = vld [vmem:[#allocation6 + $0x34] sm:$0xf0] }
  0x39   :  { %682 = vmatpush.bf16.msrb.mxu0 %v3683_v59  ;;  %v2764_v45 = vld [vmem:[#allocation6 + $0x20] sm:$0xf]  ;;  %v3738_v46 = vor.u32 %v3220_v39, %v2790_v40  ;;  %v3740_v48 = vor.u32 %v3218_v44, %v2772_v43  ;;  %v3217_v51 = vld [vmem:[#allocation6 + $0x2c] sm:$0xf0]  ;;  %v3215_v52 = vld [vmem:[#allocation6 + $0x24] sm:$0xf] }
  0x3a   :  { %695 = vmatpush.bf16.msrb.mxu1 %v3680_v53  ;;  %v2766_v54 = vld [vmem:[#allocation6 + $0x30] sm:$0xf0]  ;;  %v3216_v56 = vld [vmem:[#allocation6 + $0x2c] sm:$0xf]  ;;  %v2774_v57 = vld [vmem:[#allocation6 + $0x38] sm:$0xf0]  ;;  %v3746_v63 = vor.u32 %v3217_v51, %v2764_v45 }
  0x3b   :  { %708 = vmatpush.bf16.msrb.mxu2 %v3677_v50  ;;  %v3743_v55 = vor.u32 %v3215_v52, %v2766_v54  ;;  %v2756_v58 = vld [vmem:[#allocation6 + $0x8] sm:$0xf]  ;;  %v3214_v62 = vld [vmem:[#allocation6 + $0x14] sm:$0xf0]  ;;  %v3211_v0 = vld [vmem:[#allocation6 + $0x4] sm:$0xf]  ;;  %v3750_v3 = vor.u32 %v3216_v56, %v2774_v57 }
  0x3c   :  { %721 = vmatpush.bf16.msrb.mxu3 %v3687_v60  ;;  %v2750_v2 = vld [vmem:[#allocation6 + $0x10] sm:$0xf0]  ;;  %v3752_v4 = vor.u32 %v3214_v62, %v2756_v58  ;;  %v2748_v5 = vld [vmem:[#allocation6] sm:$0xf]  ;;  %v3213_v6 = vld [vmem:[#allocation6 + $0xc] sm:$0xf0] }
  0x3d   :  { %683 = vmatpush.bf16.msrb.mxu0 %v3695_v7  ;;  %v3755_v10 = vor.u32 %v3211_v0, %v2750_v2  ;;  %v3212_v11 = vld [vmem:[#allocation6 + $0xc] sm:$0xf]  ;;  %v2758_v12 = vld [vmem:[#allocation6 + $0x18] sm:$0xf0]  ;;  %v3758_v14 = vor.u32 %v3213_v6, %v2748_v5  ;;  %v3245_v16 = vld [vmem:[%s4655_s0 + $0x10] sm:$0xff] }
  0x3e   :  { %696 = vmatpush.bf16.msrb.mxu1 %v3692_v1  ;;  %v3762_v15 = vor.u32 %v3212_v11, %v2758_v12  ;;  %v3246_v17 = vld [vmem:[%s4655_s0 + $0x18] sm:$0xff]  ;;  %v163_v18 = vld [vmem:[%s4656_s1] sm:$0xff] }
  0x3f   :  { %709 = vmatpush.bf16.msrb.mxu2 %v3689_v61  ;;  %v162_v30 = vld [vmem:[%s4659_s4] sm:$0xf] }
  0x40   :  { %722 = vmatpush.bf16.msrb.mxu3 %v3699_v8  ;;  %v3847_v31 = vperm.slane %v162_v30, 0  ;;  %v3851_v36 = vperm.slane %v162_v30, 1  ;;  %v3861_v51 = vperm.slane %v162_v30, 2  ;;  %v3863_v52 = vperm.slane %v162_v30, 3 }
  0x41   :  { %684 = vmatpush.bf16.msrb.mxu0 %v3710_v20 }
  0x42   :  { %697 = vmatpush.bf16.msrb.mxu1 %v3704_v13 }
  0x43   :  { %710 = vmatpush.bf16.msrb.mxu2 %v3701_v9 }
  0x44   :  { %723 = vmatpush.bf16.msrb.mxu3 %v3714_v21  ;;  %379 = vmatmul.bf16.gmra.mxu0 %v3244_v19 }
  0x45   :  { %408 = vmatmul.bf16.gmra.mxu1 %v3244_v19  ;;  %685 = vmatpush.bf16.msrb.mxu0 %v3722_v32 }
  0x46   :  { %698 = vmatpush.bf16.msrb.mxu1 %v3719_v26  ;;  %437 = vmatmul.bf16.gmra.mxu2 %v3244_v19 }
  0x47   :  { %711 = vmatpush.bf16.msrb.mxu2 %v3716_v22  ;;  %466 = vmatmul.bf16.gmra.mxu3 %v3244_v19  ;;  %v164_v19 = vpack.c.bf16 %v163_v18, %v163_v18 }
  0x48   :  { %724 = vmatpush.bf16.msrb.mxu3 %v3726_v33 }
  0x49   :  { %686 = vmatpush.bf16.msrb.mxu0 %v3734_v42 }
  0x4a   :  { %699 = vmatpush.bf16.msrb.mxu1 %v3731_v38 }
  0x4b   :  { %712 = vmatpush.bf16.msrb.mxu2 %v3728_v34 }
  0x4c   :  { %725 = vmatpush.bf16.msrb.mxu3 %v3738_v46 }
  0x4d   :  { %687 = vmatpush.bf16.msrb.mxu0 %v3746_v63 }
  0x4e   :  { %700 = vmatpush.bf16.msrb.mxu1 %v3743_v55 }
  0x4f   :  { %713 = vmatpush.bf16.msrb.mxu2 %v3740_v48 }
  0x50   :  { %726 = vmatpush.bf16.msrb.mxu3 %v3750_v3 }
  0x51   :  { %688 = vmatpush.bf16.msrb.mxu0 %v3758_v14 }
  0x52   :  { %701 = vmatpush.bf16.msrb.mxu1 %v3755_v10 }
  0x53   :  { %714 = vmatpush.bf16.msrb.mxu2 %v3752_v4 }
  0x54   :  { %727 = vmatpush.bf16.msrb.mxu3 %v3762_v15  ;;  %384 = vmatmul.bf16.gmra.mxu0 %v3245_v16 }
  0x55   :  { %761 = vmatpush.bf16.msra.mxu0 %v3672_v47  ;;  %413 = vmatmul.bf16.gmra.mxu1 %v3245_v16 }
  0x56   :  { %774 = vmatpush.bf16.msra.mxu1 %v3670_v41  ;;  %442 = vmatmul.bf16.gmra.mxu2 %v3245_v16 }
  0x57   :  { %787 = vmatpush.bf16.msra.mxu2 %v3668_v37  ;;  %471 = vmatmul.bf16.gmra.mxu3 %v3245_v16 }
  0x58   :  { %800 = vmatpush.bf16.msra.mxu3 %v3675_v49 }
  0x59   :  { %762 = vmatpush.bf16.msra.mxu0 %v3683_v59 }
  0x5a   :  { %775 = vmatpush.bf16.msra.mxu1 %v3680_v53 }
  0x5b   :  { %788 = vmatpush.bf16.msra.mxu2 %v3677_v50 }
  0x5c   :  { %801 = vmatpush.bf16.msra.mxu3 %v3687_v60 }
  0x5d   :  { %763 = vmatpush.bf16.msra.mxu0 %v3695_v7 }
  0x5e   :  { %776 = vmatpush.bf16.msra.mxu1 %v3692_v1 }
  0x5f   :  { %789 = vmatpush.bf16.msra.mxu2 %v3689_v61 }
  0x60   :  { %802 = vmatpush.bf16.msra.mxu3 %v3699_v8 }
  0x61   :  { %764 = vmatpush.bf16.msra.mxu0 %v3710_v20 }
  0x62   :  { %777 = vmatpush.bf16.msra.mxu1 %v3704_v13 }
  0x63   :  { %790 = vmatpush.bf16.msra.mxu2 %v3701_v9 }
  0x64   :  { %803 = vmatpush.bf16.msra.mxu3 %v3714_v21  ;;  %389 = vmatmul.bf16.gmra.mxu0 %v3246_v17 }
  0x65   :  { %765 = vmatpush.bf16.msra.mxu0 %v3722_v32  ;;  %418 = vmatmul.bf16.gmra.mxu1 %v3246_v17 }
  0x66   :  { %778 = vmatpush.bf16.msra.mxu1 %v3719_v26  ;;  %447 = vmatmul.bf16.gmra.mxu2 %v3246_v17 }
  0x67   :  { %791 = vmatpush.bf16.msra.mxu2 %v3716_v22  ;;  %476 = vmatmul.bf16.gmra.mxu3 %v3246_v17 }
  0x68   :  { %804 = vmatpush.bf16.msra.mxu3 %v3726_v33 }
  0x69   :  { %766 = vmatpush.bf16.msra.mxu0 %v3734_v42 }
  0x6a   :  { %779 = vmatpush.bf16.msra.mxu1 %v3731_v38 }
  0x6b   :  { %792 = vmatpush.bf16.msra.mxu2 %v3728_v34 }
  0x6c   :  { %805 = vmatpush.bf16.msra.mxu3 %v3738_v46 }
  0x6d   :  { %767 = vmatpush.bf16.msra.mxu0 %v3746_v63 }
  0x6e   :  { %780 = vmatpush.bf16.msra.mxu1 %v3743_v55 }
  0x6f   :  { %793 = vmatpush.bf16.msra.mxu2 %v3740_v48 }
  0x70   :  { %806 = vmatpush.bf16.msra.mxu3 %v3750_v3 }
  0x71   :  { %768 = vmatpush.bf16.msra.mxu0 %v3758_v14 }
  0x72   :  { %781 = vmatpush.bf16.msra.mxu1 %v3755_v10 }
  0x73   :  { %794 = vmatpush.bf16.msra.mxu2 %v3752_v4 }
  0x74   :  { %807 = vmatpush.bf16.msra.mxu3 %v3762_v15  ;;  %689 = vmatmul.bf16.vlgmr.msrb.gmra.mxu0 %v164_v19 }
  0x75   :  { %702 = vmatmul.bf16.vlgmr.msrb.gmra.mxu1 %v164_v19  ;;  %842 = vmatpush.bf16.msrb.mxu0 %v3672_v47 }
  0x76   :  { %715 = vmatmul.bf16.vlgmr.msrb.gmra.mxu2 %v164_v19  ;;  %855 = vmatpush.bf16.msrb.mxu1 %v3670_v41 }
  0x77   :  { %728 = vmatmul.bf16.vlgmr.msrb.gmra.mxu3 %v164_v19  ;;  %868 = vmatpush.bf16.msrb.mxu2 %v3668_v37 }
  0x78   :  { %881 = vmatpush.bf16.msrb.mxu3 %v3675_v49 }
  0x79   :  { %843 = vmatpush.bf16.msrb.mxu0 %v3683_v59 }
  0x7a   :  { %856 = vmatpush.bf16.msrb.mxu1 %v3680_v53 }
  0x7b   :  { %869 = vmatpush.bf16.msrb.mxu2 %v3677_v50 }
  0x7c   :  { %882 = vmatpush.bf16.msrb.mxu3 %v3687_v60 }
  0x7d   :  { %844 = vmatpush.bf16.msrb.mxu0 %v3695_v7 }
  0x7e   :  { %857 = vmatpush.bf16.msrb.mxu1 %v3692_v1 }
  0x7f   :  { %870 = vmatpush.bf16.msrb.mxu2 %v3689_v61 }
  0x80   :  { %883 = vmatpush.bf16.msrb.mxu3 %v3699_v8 }
  0x81   :  { %845 = vmatpush.bf16.msrb.mxu0 %v3710_v20 }
  0x82   :  { %858 = vmatpush.bf16.msrb.mxu1 %v3704_v13 }
  0x83   :  { %871 = vmatpush.bf16.msrb.mxu2 %v3701_v9 }
  0x84   :  { %884 = vmatpush.bf16.msrb.mxu3 %v3714_v21 }
  0x85   :  { %846 = vmatpush.bf16.msrb.mxu0 %v3722_v32 }
  0x86   :  { %859 = vmatpush.bf16.msrb.mxu1 %v3719_v26 }
  0x87   :  { %872 = vmatpush.bf16.msrb.mxu2 %v3716_v22 }
  0x88   :  { %885 = vmatpush.bf16.msrb.mxu3 %v3726_v33 }
  0x89   :  { %847 = vmatpush.bf16.msrb.mxu0 %v3734_v42 }
  0x8a   :  { %860 = vmatpush.bf16.msrb.mxu1 %v3731_v38 }
  0x8b   :  { %873 = vmatpush.bf16.msrb.mxu2 %v3728_v34 }
  0x8c   :  { %886 = vmatpush.bf16.msrb.mxu3 %v3738_v46 }
  0x8d   :  { %848 = vmatpush.bf16.msrb.mxu0 %v3746_v63 }
  0x8e   :  { %861 = vmatpush.bf16.msrb.mxu1 %v3743_v55 }
  0x8f   :  { %874 = vmatpush.bf16.msrb.mxu2 %v3740_v48 }
  0x90   :  { %887 = vmatpush.bf16.msrb.mxu3 %v3750_v3 }
  0x91   :  { %849 = vmatpush.bf16.msrb.mxu0 %v3758_v14 }
  0x92   :  { %862 = vmatpush.bf16.msrb.mxu1 %v3755_v10 }
  0x93   :  { %875 = vmatpush.bf16.msrb.mxu2 %v3752_v4 }
  0x94   :  { %888 = vmatpush.bf16.msrb.mxu3 %v3762_v15 }
  0xb1   :  { %v375_v23 = vpop.f32.mrf.mxu0 }
  0xb2   :  { %v404_v24 = vpop.f32.mrf.mxu1 }
  0xb9   :  { %v433_v25 = vpop.f32.mrf.mxu2  ;;  %v3840_v28 = vpop.f32.mrf.mxu0 }
  0xba   :  { %v462_v27 = vpop.f32.mrf.mxu3  ;;  %v3842_v29 = vpop.f32.mrf.mxu1 }
  0xc1   :  { %v3849_v35 = vpop.f32.mrf.mxu2  ;;  %v380_v40 = vpop.f32.mrf.mxu0 }
  0xc2   :  { %v3853_v39 = vpop.f32.mrf.mxu3  ;;  %v3856_v43 = vadd.f32 %v380_v40, %v3847_v31  ;;  %v409_v44 = vpop.f32.mrf.mxu1 }
  0xc3   :  { %v3859_v45 = vadd.f32 %v409_v44, %v3851_v36 }
  0xc9   :  { %v438_v54 = vpop.f32.mrf.mxu2  ;;  %v3868_v58 = vpop.f32.mrf.mxu0 }
  0xca   :  { %v3866_v56 = vadd.f32 %v438_v54, %v3861_v51  ;;  %v467_v57 = vpop.f32.mrf.mxu3  ;;  %4666 = vst [vmem:[#allocation14_spill] sm:$0xff] %v3868_v58  ;;  %v3873_v0 = vpop.f32.mrf.mxu1 }
  0xcb   :  { %v3871_v62 = vadd.f32 %v467_v57, %v3863_v52  ;;  %4668 = vst [vmem:[#allocation16_spill] sm:$0xff] %v3873_v0 }
  0xcd   :  { %4667 = vst [vmem:[#allocation15_spill] sm:$0xff] %v3871_v62 }
  0xd1   :  { %v3875_v2 = vpop.f32.mrf.mxu2  ;;  %v385_v6 = vpop.f32.mrf.mxu0 }
  0xd2   :  { %4669 = vst [vmem:[#allocation17_spill] sm:$0xff] %v3875_v2  ;;  %v3877_v5 = vpop.f32.mrf.mxu3  ;;  %v3880_v11 = vadd.f32 %v385_v6, %v3847_v31  ;;  %v414_v12 = vpop.f32.mrf.mxu1 }
  0xd3   :  { %4670 = vst [vmem:[#allocation18_spill] sm:$0xff] %v3877_v5  ;;  %v3883_v16 = vadd.f32 %v414_v12, %v3851_v36 }
  0xd4   :  { %4671 = vst [vmem:[#allocation19_spill] sm:$0xff] %v3880_v11 }
  0xd5   :  { %4672 = vst [vmem:[#allocation20_spill] sm:$0xff] %v3883_v16 }
  0xd9   :  { %v443_v17 = vpop.f32.mrf.mxu2  ;;  %v3888_v30 = vpop.f32.mrf.mxu0 }
  0xda   :  { %v3886_v18 = vadd.f32 %v443_v17, %v3861_v51  ;;  %v472_v19 = vpop.f32.mrf.mxu3  ;;  %4674 = vst [vmem:[#allocation22_spill] sm:$0xff] %v3888_v30  ;;  %v3893_v44 = vpop.f32.mrf.mxu1 }
  0xdb   :  { %v3891_v40 = vadd.f32 %v472_v19, %v3863_v52  ;;  %4676 = vst [vmem:[#allocation24_spill] sm:$0xff] %v3893_v44 }
  0xdc   :  { %4673 = vst [vmem:[#allocation21_spill] sm:$0xff] %v3886_v18 }
  0xdd   :  { %4675 = vst [vmem:[#allocation23_spill] sm:$0xff] %v3891_v40 }
  0xe1   :  { %v3895_v54 = vpop.f32.mrf.mxu2  ;;  %v390_v6 = vpop.f32.mrf.mxu0 }
  0xe2   :  { %4677 = vst [vmem:[#allocation25_spill] sm:$0xff] %v3895_v54  ;;  %v3897_v57 = vpop.f32.mrf.mxu3  ;;  %v3900_v12 = vadd.f32 %v390_v6, %v3847_v31  ;;  %v419_v16 = vpop.f32.mrf.mxu1 }
  0xe3   :  { %4678 = vst [vmem:[#allocation26_spill] sm:$0xff] %v3897_v57  ;;  %v3903_v17 = vadd.f32 %v419_v16, %v3851_v36  ;;  %v376_v57 = vadd.f32 %v375_v23, %v3847_v31 }
  0xe4   :  { %4679 = vst [vmem:[#allocation27_spill] sm:$0xff] %v3900_v12  ;;  %v405_v12 = vadd.f32 %v404_v24, %v3851_v36 }
  0xe5   :  { %4680 = vst [vmem:[#allocation28_spill] sm:$0xff] %v3903_v17 }
  0xe9   :  { %v448_v18 = vpop.f32.mrf.mxu2  ;;  %v3908_v40 = vpop.f32.mrf.mxu0 }
  0xea   :  { %v3906_v30 = vadd.f32 %v448_v18, %v3861_v51  ;;  %v477_v19 = vpop.f32.mrf.mxu3  ;;  %4682 = vst [vmem:[#allocation30_spill] sm:$0xff] %v3908_v40  ;;  %v3913_v54 = vpop.f32.mrf.mxu1  ;;  %v434_v40 = vadd.f32 %v433_v25, %v3861_v51 }
  0xeb   :  { %v3911_v44 = vadd.f32 %v477_v19, %v3863_v52  ;;  %4684 = vst [vmem:[#allocation32_spill] sm:$0xff] %v3913_v54  ;;  %v463_v19 = vadd.f32 %v462_v27, %v3863_v52 }
  0xec   :  { %4681 = vst [vmem:[#allocation29_spill] sm:$0xff] %v3906_v30 }
  0xed   :  { %4683 = vst [vmem:[#allocation31_spill] sm:$0xff] %v3911_v44 }
  0xf1   :  { %v3916_v6 = vpop.f32.mrf.mxu2  ;;  %v690_v17 = vpop.f32.mrf.mxu0 }
  0xf2   :  { %4685 = vst [vmem:[#allocation33_spill] sm:$0xff] %v3916_v6  ;;  %v3919_v16 = vpop.f32.mrf.mxu3  ;;  %v733_v11 = vadd.f32 %v690_v17, %v376_v57  ;;  %v703_v18 = vpop.f32.mrf.mxu1 }
  0xf3   :  { %4686 = vst [vmem:[#allocation34_spill] sm:$0xff] %v3919_v16  ;;  %v734_v30 = vadd.f32 %v703_v18, %v405_v12 }
  0xf4   :  { %3330 = vtanh.f32 %v733_v11 }
  0xf5   :  { %3332 = vtanh.f32 %v734_v30 }
  0xf9   :  { %v716_v44 = vpop.f32.mrf.mxu2  ;;  %v692_v23 = vpop.f32.mrf.mxu0 }
  0xfa   :  { %v735_v54 = vadd.f32 %v716_v44, %v434_v40  ;;  %v729_v5 = vpop.f32.mrf.mxu3  ;;  %v3331_v2 = vpop.eup %3330 }
  0xfb   :  { %v736_v6 = vadd.f32 %v729_v5, %v463_v19  ;;  %v705_v0 = vpop.f32.mrf.mxu1  ;;  %v3333_v24 = vpop.eup %3332  ;;  %v741_v16 = vmul.f32 0.5, %v3331_v2  ;;  %v407_v2 = vadd.f32 %v3842_v29, %v3851_v36 }
  0xfc   :  { %3334 = vtanh.f32 %v735_v54  ;;  %v743_v58 = vmul.f32 0.5, %v3333_v24  ;;  %v436_v24 = vadd.f32 %v3849_v35, %v3861_v51 }
  0xfd   :  { %3336 = vtanh.f32 %v736_v6  ;;  %v742_v12 = vadd.f32 0.5, %v741_v16 }
  0xfe   :  { %v744_v57 = vadd.f32 0.5, %v743_v58  ;;  %v378_v58 = vadd.f32 %v3840_v28, %v3847_v31 }
 0x100   :  { %v747_v25 = vmul.f32 0.0, %v744_v57  ;;  %v465_v57 = vadd.f32 %v3853_v39, %v3863_v52 }
 0x101   :  { %v718_v11 = vpop.f32.mrf.mxu2 }
 0x102   :  { %v3335_v30 = vpop.eup %3334  ;;  %v731_v17 = vpop.f32.mrf.mxu3 }
 0x103   :  { %v748_v18 = vmul.f32 %v3335_v30, %v742_v12  ;;  %v3337_v27 = vpop.eup %3336 }
 0x104   :  { %v745_v40 = vmul.f32 0.5, %v3337_v27 }
 0x105   :  { %v3923_v62 = vadd.f32 %v748_v18, %v747_v25 }
 0x106   :  { %v746_v5 = vadd.f32 0.5, %v745_v40 }
 0x107   :  { %3338 = vtanh.f32 %v3923_v62 }
 0x10d   :  { %v3339_v0 = vpop.eup %3338 }
 0x10e   :  { %v751_v44 = vmul.f32 %v3339_v0, %v746_v5 }
 0x110   :  { %v752_v54 = vpack.c.bf16 %v751_v44, %v751_v44 }
 0x112   :  { %753 = vst [vmem:[#allocation3] sm:$0xf] %v752_v54  ;;  %769 = vmatmul.bf16.vlgmr.msra.gmra.mxu0 %v752_v54  ;;  %782 = vmatmul.bf16.vlgmr.msra.gmra.mxu1 %v752_v54 }
 0x113   :  { %795 = vmatmul.bf16.vlgmr.msra.gmra.mxu2 %v752_v54  ;;  %808 = vmatmul.bf16.vlgmr.msra.gmra.mxu3 %v752_v54 }
 0x114   :  { %923 = vmatpush.bf16.msra.mxu0 %v3672_v47  ;;  %936 = vmatpush.bf16.msra.mxu1 %v3670_v41 }
 0x115   :  { %949 = vmatpush.bf16.msra.mxu2 %v3668_v37  ;;  %962 = vmatpush.bf16.msra.mxu3 %v3675_v49 }
 0x118   :  { %924 = vmatpush.bf16.msra.mxu0 %v3683_v59  ;;  %937 = vmatpush.bf16.msra.mxu1 %v3680_v53 }
 0x119   :  { %950 = vmatpush.bf16.msra.mxu2 %v3677_v50  ;;  %963 = vmatpush.bf16.msra.mxu3 %v3687_v60 }
 0x11c   :  { %925 = vmatpush.bf16.msra.mxu0 %v3695_v7  ;;  %938 = vmatpush.bf16.msra.mxu1 %v3692_v1 }
 0x11d   :  { %951 = vmatpush.bf16.msra.mxu2 %v3689_v61  ;;  %964 = vmatpush.bf16.msra.mxu3 %v3699_v8 }
 0x120   :  { %926 = vmatpush.bf16.msra.mxu0 %v3710_v20  ;;  %939 = vmatpush.bf16.msra.mxu1 %v3704_v13 }
 0x121   :  { %952 = vmatpush.bf16.msra.mxu2 %v3701_v9  ;;  %965 = vmatpush.bf16.msra.mxu3 %v3714_v21 }
 0x124   :  { %927 = vmatpush.bf16.msra.mxu0 %v3722_v32  ;;  %940 = vmatpush.bf16.msra.mxu1 %v3719_v26 }
 0x125   :  { %953 = vmatpush.bf16.msra.mxu2 %v3716_v22  ;;  %966 = vmatpush.bf16.msra.mxu3 %v3726_v33 }
 0x128   :  { %928 = vmatpush.bf16.msra.mxu0 %v3734_v42  ;;  %941 = vmatpush.bf16.msra.mxu1 %v3731_v38 }
 0x129   :  { %954 = vmatpush.bf16.msra.mxu2 %v3728_v34  ;;  %967 = vmatpush.bf16.msra.mxu3 %v3738_v46 }
 0x12c   :  { %929 = vmatpush.bf16.msra.mxu0 %v3746_v63  ;;  %942 = vmatpush.bf16.msra.mxu1 %v3743_v55 }
 0x12d   :  { %955 = vmatpush.bf16.msra.mxu2 %v3740_v48  ;;  %968 = vmatpush.bf16.msra.mxu3 %v3750_v3 }
 0x130   :  { %930 = vmatpush.bf16.msra.mxu0 %v3758_v14  ;;  %943 = vmatpush.bf16.msra.mxu1 %v3755_v10 }
 0x131   :  { %956 = vmatpush.bf16.msra.mxu2 %v3752_v4  ;;  %969 = vmatpush.bf16.msra.mxu3 %v3762_v15 }
 0x18f   :  { %v770_v6 = vpop.f32.mrf.mxu0  ;;  %v783_v16 = vpop.f32.mrf.mxu1 }
 0x190   :  { %v813_v19 = vadd.f32 %v770_v6, %v378_v58  ;;  %v814_v23 = vadd.f32 %v783_v16, %v407_v2 }
 0x192   :  { %3340 = vtanh.f32 %v813_v19 }
 0x193   :  { %3342 = vtanh.f32 %v814_v23 }
 0x196   :  { %v796_v12 = vpop.f32.mrf.mxu2  ;;  %v809_v11 = vpop.f32.mrf.mxu3 }
 0x197   :  { %v815_v30 = vadd.f32 %v796_v12, %v436_v24  ;;  %v772_v17 = vpop.f32.mrf.mxu0  ;;  %v785_v28 = vpop.f32.mrf.mxu1  ;;  %v816_v18 = vadd.f32 %v809_v11, %v465_v57 }
 0x198   :  { %v3341_v25 = vpop.eup %3340 }
 0x199   :  { %v3343_v29 = vpop.eup %3342  ;;  %3344 = vtanh.f32 %v815_v30  ;;  %v821_v27 = vmul.f32 0.5, %v3341_v25 }
 0x19a   :  { %v823_v40 = vmul.f32 0.5, %v3343_v29  ;;  %3346 = vtanh.f32 %v816_v18 }
 0x19b   :  { %v822_v0 = vadd.f32 0.5, %v821_v27 }
 0x19c   :  { %v824_v5 = vadd.f32 0.5, %v823_v40  ;;  %v4687_v40 = vld [vmem:[#allocation15_spill] sm:$0xff] }
 0x19e   :  { %v798_v44 = vpop.f32.mrf.mxu2  ;;  %v811_v54 = vpop.f32.mrf.mxu3  ;;  %v827_v58 = vmul.f32 %v824_v5, %v3923_v62 }
 0x19f   :  { %v3345_v35 = vpop.eup %3344 }
 0x1a0   :  { %v828_v39 = vmul.f32 %v3345_v35, %v822_v0  ;;  %v3347_v2 = vpop.eup %3346 }
 0x1a1   :  { %v825_v16 = vmul.f32 0.5, %v3347_v2 }
 0x1a2   :  { %v3967_v6 = vadd.f32 %v828_v39, %v827_v58 }
 0x1a3   :  { %v826_v19 = vadd.f32 0.5, %v825_v16 }
 0x1a4   :  { %3348 = vtanh.f32 %v3967_v6 }
 0x1aa   :  { %v3349_v23 = vpop.eup %3348 }
 0x1ab   :  { %v831_v24 = vmul.f32 %v3349_v23, %v826_v19 }
 0x1ad   :  { %v832_v57 = vpack.c.bf16 %v831_v24, %v831_v24 }
 0x1af   :  { %834 = vst [vmem:[#allocation3 + $0x4] sm:$0xf] %v832_v57  ;;  %850 = vmatmul.bf16.vlgmr.msrb.gmra.mxu0 %v832_v57  ;;  %863 = vmatmul.bf16.vlgmr.msrb.gmra.mxu1 %v832_v57 }
 0x1b0   :  { %876 = vmatmul.bf16.vlgmr.msrb.gmra.mxu2 %v832_v57  ;;  %889 = vmatmul.bf16.vlgmr.msrb.gmra.mxu3 %v832_v57 }
 0x1b1   :  { %1004 = vmatpush.bf16.msrb.mxu0 %v3672_v47  ;;  %1017 = vmatpush.bf16.msrb.mxu1 %v3670_v41 }
 0x1b2   :  { %1030 = vmatpush.bf16.msrb.mxu2 %v3668_v37  ;;  %1043 = vmatpush.bf16.msrb.mxu3 %v3675_v49 }
 0x1b5   :  { %1005 = vmatpush.bf16.msrb.mxu0 %v3683_v59  ;;  %1018 = vmatpush.bf16.msrb.mxu1 %v3680_v53 }
 0x1b6   :  { %1031 = vmatpush.bf16.msrb.mxu2 %v3677_v50  ;;  %1044 = vmatpush.bf16.msrb.mxu3 %v3687_v60 }
 0x1b9   :  { %1006 = vmatpush.bf16.msrb.mxu0 %v3695_v7  ;;  %1019 = vmatpush.bf16.msrb.mxu1 %v3692_v1 }
 0x1ba   :  { %1032 = vmatpush.bf16.msrb.mxu2 %v3689_v61  ;;  %1045 = vmatpush.bf16.msrb.mxu3 %v3699_v8 }
 0x1bd   :  { %1007 = vmatpush.bf16.msrb.mxu0 %v3710_v20  ;;  %1020 = vmatpush.bf16.msrb.mxu1 %v3704_v13 }
 0x1be   :  { %1033 = vmatpush.bf16.msrb.mxu2 %v3701_v9  ;;  %1046 = vmatpush.bf16.msrb.mxu3 %v3714_v21 }
 0x1c1   :  { %1008 = vmatpush.bf16.msrb.mxu0 %v3722_v32  ;;  %1021 = vmatpush.bf16.msrb.mxu1 %v3719_v26 }
 0x1c2   :  { %1034 = vmatpush.bf16.msrb.mxu2 %v3716_v22  ;;  %1047 = vmatpush.bf16.msrb.mxu3 %v3726_v33 }
 0x1c5   :  { %1009 = vmatpush.bf16.msrb.mxu0 %v3734_v42  ;;  %1022 = vmatpush.bf16.msrb.mxu1 %v3731_v38 }
 0x1c6   :  { %1035 = vmatpush.bf16.msrb.mxu2 %v3728_v34  ;;  %1048 = vmatpush.bf16.msrb.mxu3 %v3738_v46 }
 0x1c9   :  { %1010 = vmatpush.bf16.msrb.mxu0 %v3746_v63  ;;  %1023 = vmatpush.bf16.msrb.mxu1 %v3743_v55 }
 0x1ca   :  { %1036 = vmatpush.bf16.msrb.mxu2 %v3740_v48  ;;  %1049 = vmatpush.bf16.msrb.mxu3 %v3750_v3 }
 0x1cd   :  { %1011 = vmatpush.bf16.msrb.mxu0 %v3758_v14  ;;  %1024 = vmatpush.bf16.msrb.mxu1 %v3755_v10 }
 0x1ce   :  { %1037 = vmatpush.bf16.msrb.mxu2 %v3752_v4  ;;  %1050 = vmatpush.bf16.msrb.mxu3 %v3762_v15 }
 0x22c   :  { %v851_v62 = vpop.f32.mrf.mxu0  ;;  %v864_v12 = vpop.f32.mrf.mxu1 }
 0x22d   :  { %v894_v11 = vadd.f32 %v851_v62, %v3856_v43  ;;  %v895_v30 = vadd.f32 %v864_v12, %v3859_v45 }
 0x22f   :  { %3350 = vtanh.f32 %v894_v11 }
 0x230   :  { %3352 = vtanh.f32 %v895_v30  ;;  %v4689_v30 = vld [vmem:[#allocation16_spill] sm:$0xff] }
 0x233   :  { %v877_v17 = vpop.f32.mrf.mxu2  ;;  %v890_v28 = vpop.f32.mrf.mxu3 }
 0x234   :  { %v896_v25 = vadd.f32 %v877_v17, %v3866_v56  ;;  %v853_v18 = vpop.f32.mrf.mxu0  ;;  %v866_v29 = vpop.f32.mrf.mxu1  ;;  %v897_v5 = vadd.f32 %v890_v28, %v4687_v40  ;;  %v412_v17 = vadd.f32 %v4689_v30, %v3851_v36 }
 0x235   :  { %v3351_v27 = vpop.eup %3350 }
 0x236   :  { %v3353_v0 = vpop.eup %3352  ;;  %3354 = vtanh.f32 %v896_v25  ;;  %v902_v44 = vmul.f32 0.5, %v3351_v27  ;;  %v4690_v27 = vld [vmem:[#allocation17_spill] sm:$0xff] }
 0x237   :  { %v904_v54 = vmul.f32 0.5, %v3353_v0  ;;  %3356 = vtanh.f32 %v897_v5  ;;  %v441_v40 = vadd.f32 %v4690_v27, %v3861_v51  ;;  %v4691_v5 = vld [vmem:[#allocation18_spill] sm:$0xff] }
 0x238   :  { %v903_v43 = vadd.f32 0.5, %v902_v44  ;;  %v470_v0 = vadd.f32 %v4691_v5, %v3863_v52  ;;  %v4692_v5 = vld [vmem:[#allocation19_spill] sm:$0xff] }
 0x239   :  { %v905_v35 = vadd.f32 0.5, %v904_v54 }
 0x23b   :  { %v879_v58 = vpop.f32.mrf.mxu2  ;;  %v892_v45 = vpop.f32.mrf.mxu3  ;;  %v908_v2 = vmul.f32 %v905_v35, %v3967_v6  ;;  %v4688_v6 = vld [vmem:[#allocation14_spill] sm:$0xff] }
 0x23c   :  { %v3355_v39 = vpop.eup %3354  ;;  %v383_v11 = vadd.f32 %v4688_v6, %v3847_v31 }
 0x23d   :  { %v909_v16 = vmul.f32 %v3355_v39, %v903_v43  ;;  %v3357_v19 = vpop.eup %3356 }
 0x23e   :  { %v906_v23 = vmul.f32 0.5, %v3357_v19 }
 0x23f   :  { %v4007_v56 = vadd.f32 %v909_v16, %v908_v2 }
 0x240   :  { %v907_v24 = vadd.f32 0.5, %v906_v23 }
 0x241   :  { %3358 = vtanh.f32 %v4007_v56 }
 0x247   :  { %v3359_v57 = vpop.eup %3358 }
 0x248   :  { %v912_v62 = vmul.f32 %v3359_v57, %v907_v24 }
 0x24a   :  { %v913_v12 = vpack.c.bf16 %v912_v62, %v912_v62 }
 0x24c   :  { %915 = vst [vmem:[#allocation3 + $0x8] sm:$0xf] %v913_v12  ;;  %931 = vmatmul.bf16.vlgmr.msra.gmra.mxu0 %v913_v12  ;;  %944 = vmatmul.bf16.vlgmr.msra.gmra.mxu1 %v913_v12 }
 0x24d   :  { %957 = vmatmul.bf16.vlgmr.msra.gmra.mxu2 %v913_v12  ;;  %970 = vmatmul.bf16.vlgmr.msra.gmra.mxu3 %v913_v12 }
 0x24e   :  { %1085 = vmatpush.bf16.msra.mxu0 %v3672_v47  ;;  %1098 = vmatpush.bf16.msra.mxu1 %v3670_v41 }
 0x24f   :  { %1111 = vmatpush.bf16.msra.mxu2 %v3668_v37  ;;  %1124 = vmatpush.bf16.msra.mxu3 %v3675_v49 }
 0x252   :  { %1086 = vmatpush.bf16.msra.mxu0 %v3683_v59  ;;  %1099 = vmatpush.bf16.msra.mxu1 %v3680_v53 }
 0x253   :  { %1112 = vmatpush.bf16.msra.mxu2 %v3677_v50  ;;  %1125 = vmatpush.bf16.msra.mxu3 %v3687_v60 }
 0x256   :  { %1087 = vmatpush.bf16.msra.mxu0 %v3695_v7  ;;  %1100 = vmatpush.bf16.msra.mxu1 %v3692_v1 }
 0x257   :  { %1113 = vmatpush.bf16.msra.mxu2 %v3689_v61  ;;  %1126 = vmatpush.bf16.msra.mxu3 %v3699_v8 }
 0x25a   :  { %1088 = vmatpush.bf16.msra.mxu0 %v3710_v20  ;;  %1101 = vmatpush.bf16.msra.mxu1 %v3704_v13 }
 0x25b   :  { %1114 = vmatpush.bf16.msra.mxu2 %v3701_v9  ;;  %1127 = vmatpush.bf16.msra.mxu3 %v3714_v21 }
 0x25e   :  { %1089 = vmatpush.bf16.msra.mxu0 %v3722_v32  ;;  %1102 = vmatpush.bf16.msra.mxu1 %v3719_v26 }
 0x25f   :  { %1115 = vmatpush.bf16.msra.mxu2 %v3716_v22  ;;  %1128 = vmatpush.bf16.msra.mxu3 %v3726_v33 }
 0x262   :  { %1090 = vmatpush.bf16.msra.mxu0 %v3734_v42  ;;  %1103 = vmatpush.bf16.msra.mxu1 %v3731_v38 }
 0x263   :  { %1116 = vmatpush.bf16.msra.mxu2 %v3728_v34  ;;  %1129 = vmatpush.bf16.msra.mxu3 %v3738_v46 }
 0x266   :  { %1091 = vmatpush.bf16.msra.mxu0 %v3746_v63  ;;  %1104 = vmatpush.bf16.msra.mxu1 %v3743_v55 }
 0x267   :  { %1117 = vmatpush.bf16.msra.mxu2 %v3740_v48  ;;  %1130 = vmatpush.bf16.msra.mxu3 %v3750_v3 }
 0x26a   :  { %1092 = vmatpush.bf16.msra.mxu0 %v3758_v14  ;;  %1105 = vmatpush.bf16.msra.mxu1 %v3755_v10 }
 0x26b   :  { %1118 = vmatpush.bf16.msra.mxu2 %v3752_v4  ;;  %1131 = vmatpush.bf16.msra.mxu3 %v3762_v15 }
 0x2c9   :  { %v932_v28 = vpop.f32.mrf.mxu0  ;;  %v945_v25 = vpop.f32.mrf.mxu1 }
 0x2ca   :  { %v975_v18 = vadd.f32 %v932_v28, %v383_v11  ;;  %v976_v29 = vadd.f32 %v945_v25, %v412_v17 }
 0x2cc   :  { %3360 = vtanh.f32 %v975_v18 }
 0x2cd   :  { %3362 = vtanh.f32 %v976_v29 }
 0x2d0   :  { %v958_v44 = vpop.f32.mrf.mxu2  ;;  %v971_v54 = vpop.f32.mrf.mxu3 }
 0x2d1   :  { %v977_v35 = vadd.f32 %v958_v44, %v441_v40  ;;  %v934_v43 = vpop.f32.mrf.mxu0  ;;  %v947_v58 = vpop.f32.mrf.mxu1  ;;  %v978_v39 = vadd.f32 %v971_v54, %v470_v0  ;;  %v4693_v44 = vld [vmem:[#allocation20_spill] sm:$0xff] }
 0x2d2   :  { %v3361_v45 = vpop.eup %3360  ;;  %v4694_v58 = vld [vmem:[#allocation21_spill] sm:$0xff] }
 0x2d3   :  { %v3363_v2 = vpop.eup %3362  ;;  %3364 = vtanh.f32 %v977_v35  ;;  %v983_v16 = vmul.f32 0.5, %v3361_v45 }
 0x2d4   :  { %v985_v19 = vmul.f32 0.5, %v3363_v2  ;;  %3366 = vtanh.f32 %v978_v39 }
 0x2d5   :  { %v984_v24 = vadd.f32 0.5, %v983_v16 }
 0x2d6   :  { %v986_v23 = vadd.f32 0.5, %v985_v19  ;;  %v4695_v19 = vld [vmem:[#allocation23_spill] sm:$0xff] }
 0x2d8   :  { %v960_v57 = vpop.f32.mrf.mxu2  ;;  %v973_v62 = vpop.f32.mrf.mxu3  ;;  %v989_v6 = vmul.f32 %v986_v23, %v4007_v56 }
 0x2d9   :  { %v3365_v12 = vpop.eup %3364 }
 0x2da   :  { %v990_v11 = vmul.f32 %v3365_v12, %v984_v24  ;;  %v3367_v30 = vpop.eup %3366 }
 0x2db   :  { %v987_v28 = vmul.f32 0.5, %v3367_v30 }
 0x2dc   :  { %v4051_v17 = vadd.f32 %v990_v11, %v989_v6 }
 0x2dd   :  { %v988_v25 = vadd.f32 0.5, %v987_v28 }
 0x2de   :  { %3368 = vtanh.f32 %v4051_v17 }
 0x2e4   :  { %v3369_v18 = vpop.eup %3368 }
 0x2e5   :  { %v993_v29 = vmul.f32 %v3369_v18, %v988_v25 }
 0x2e7   :  { %v994_v27 = vpack.c.bf16 %v993_v29, %v993_v29 }
 0x2e9   :  { %996 = vst [vmem:[#allocation3 + $0xc] sm:$0xf] %v994_v27  ;;  %1012 = vmatmul.bf16.vlgmr.msrb.gmra.mxu0 %v994_v27  ;;  %1025 = vmatmul.bf16.vlgmr.msrb.gmra.mxu1 %v994_v27 }
 0x2ea   :  { %1038 = vmatmul.bf16.vlgmr.msrb.gmra.mxu2 %v994_v27  ;;  %1051 = vmatmul.bf16.vlgmr.msrb.gmra.mxu3 %v994_v27 }
 0x2eb   :  { %1166 = vmatpush.bf16.msrb.mxu0 %v3672_v47  ;;  %1179 = vmatpush.bf16.msrb.mxu1 %v3670_v41 }
 0x2ec   :  { %1192 = vmatpush.bf16.msrb.mxu2 %v3668_v37  ;;  %1205 = vmatpush.bf16.msrb.mxu3 %v3675_v49 }
 0x2ef   :  { %1167 = vmatpush.bf16.msrb.mxu0 %v3683_v59  ;;  %1180 = vmatpush.bf16.msrb.mxu1 %v3680_v53 }
 0x2f0   :  { %1193 = vmatpush.bf16.msrb.mxu2 %v3677_v50  ;;  %1206 = vmatpush.bf16.msrb.mxu3 %v3687_v60 }
 0x2f3   :  { %1168 = vmatpush.bf16.msrb.mxu0 %v3695_v7  ;;  %1181 = vmatpush.bf16.msrb.mxu1 %v3692_v1 }
 0x2f4   :  { %1194 = vmatpush.bf16.msrb.mxu2 %v3689_v61  ;;  %1207 = vmatpush.bf16.msrb.mxu3 %v3699_v8 }
 0x2f7   :  { %1169 = vmatpush.bf16.msrb.mxu0 %v3710_v20  ;;  %1182 = vmatpush.bf16.msrb.mxu1 %v3704_v13 }
 0x2f8   :  { %1195 = vmatpush.bf16.msrb.mxu2 %v3701_v9  ;;  %1208 = vmatpush.bf16.msrb.mxu3 %v3714_v21 }
 0x2fb   :  { %1170 = vmatpush.bf16.msrb.mxu0 %v3722_v32  ;;  %1183 = vmatpush.bf16.msrb.mxu1 %v3719_v26 }
 0x2fc   :  { %1196 = vmatpush.bf16.msrb.mxu2 %v3716_v22  ;;  %1209 = vmatpush.bf16.msrb.mxu3 %v3726_v33 }
 0x2ff   :  { %1171 = vmatpush.bf16.msrb.mxu0 %v3734_v42  ;;  %1184 = vmatpush.bf16.msrb.mxu1 %v3731_v38 }
 0x300   :  { %1197 = vmatpush.bf16.msrb.mxu2 %v3728_v34  ;;  %1210 = vmatpush.bf16.msrb.mxu3 %v3738_v46 }
 0x303   :  { %1172 = vmatpush.bf16.msrb.mxu0 %v3746_v63  ;;  %1185 = vmatpush.bf16.msrb.mxu1 %v3743_v55 }
 0x304   :  { %1198 = vmatpush.bf16.msrb.mxu2 %v3740_v48  ;;  %1211 = vmatpush.bf16.msrb.mxu3 %v3750_v3 }
 0x307   :  { %1173 = vmatpush.bf16.msrb.mxu0 %v3758_v14  ;;  %1186 = vmatpush.bf16.msrb.mxu1 %v3755_v10 }
 0x308   :  { %1199 = vmatpush.bf16.msrb.mxu2 %v3752_v4  ;;  %1212 = vmatpush.bf16.msrb.mxu3 %v3762_v15 }
 0x366   :  { %v1013_v56 = vpop.f32.mrf.mxu0  ;;  %v1026_v40 = vpop.f32.mrf.mxu1 }
 0x367   :  { %v1056_v0 = vadd.f32 %v1013_v56, %v4692_v5  ;;  %v1057_v54 = vadd.f32 %v1026_v40, %v4693_v44 }
 0x369   :  { %3370 = vtanh.f32 %v1056_v0 }
 0x36a   :  { %3372 = vtanh.f32 %v1057_v54 }
 0x36d   :  { %v1039_v35 = vpop.f32.mrf.mxu2  ;;  %v1052_v43 = vpop.f32.mrf.mxu3 }
 0x36e   :  { %v1058_v45 = vadd.f32 %v1039_v35, %v4694_v58  ;;  %v1015_v39 = vpop.f32.mrf.mxu0  ;;  %v1028_v2 = vpop.f32.mrf.mxu1  ;;  %v1059_v23 = vadd.f32 %v1052_v43, %v4695_v19  ;;  %v3005_v58 = vld [vmem:[#allocation8 + $0xe0] sm:$0xf]  ;;  %v3013_v19 = vld [vmem:[#allocation8 + $0xe8] sm:$0xf] }
 0x36f   :  { %v3371_v16 = vpop.eup %3370  ;;  %v3275_v39 = vld [vmem:[#allocation8 + $0xe4] sm:$0xf] }
 0x370   :  { %v3373_v24 = vpop.eup %3372  ;;  %3374 = vtanh.f32 %v1058_v45  ;;  %v1064_v57 = vmul.f32 0.5, %v3371_v16  ;;  %v3277_v45 = vld [vmem:[#allocation8 + $0xec] sm:$0xf0]  ;;  %v3007_v16 = vld [vmem:[#allocation8 + $0xf0] sm:$0xf0] }
 0x371   :  { %v1066_v62 = vmul.f32 0.5, %v3373_v24  ;;  %3376 = vtanh.f32 %v1059_v23  ;;  %v3006_v2 = vor.u32 %v3277_v45, %v3005_v58  ;;  %v3278_v23 = vld [vmem:[#allocation8 + $0xf4] sm:$0xf0]  ;;  %v3010_v24 = vor.u32 %v3275_v39, %v3007_v16  ;;  %v4701_v58 = vld [vmem:[#allocation28_spill] sm:$0xff]  ;;  %v3260_v16 = vld [vmem:[#allocation8 + $0x6c] sm:$0xf] }
 0x372   :  { %v1065_v6 = vadd.f32 0.5, %v1064_v57  ;;  %v3014_v57 = vor.u32 %v3278_v23, %v3013_v19  ;;  %v2951_v19 = vld [vmem:[#allocation8 + $0x78] sm:$0xf0]  ;;  %v2925_v23 = vld [vmem:[#allocation8 + $0x40] sm:$0xf] }
 0x373   :  { %v1067_v12 = vadd.f32 0.5, %v1066_v62  ;;  %v3276_v62 = vld [vmem:[#allocation8 + $0xec] sm:$0xf] }
 0x375   :  { %v1041_v11 = vpop.f32.mrf.mxu2  ;;  %v1054_v30 = vpop.f32.mrf.mxu3  ;;  %v1070_v25 = vmul.f32 %v1067_v12, %v4051_v17  ;;  %v3015_v12 = vld [vmem:[#allocation8 + $0xf8] sm:$0xf0] }
 0x376   :  { %v3375_v28 = vpop.eup %3374  ;;  %v2989_v11 = vld [vmem:[#allocation8 + $0xc0] sm:$0xf]  ;;  %v3273_v30 = vld [vmem:[#allocation8 + $0xcc] sm:$0xf0] }
 0x377   :  { %v1071_v18 = vmul.f32 %v3375_v28, %v1065_v6  ;;  %v3377_v29 = vpop.eup %3376  ;;  %v3018_v6 = vor.u32 %v3276_v62, %v3015_v12  ;;  %v3271_v28 = vld [vmem:[#allocation8 + $0xc4] sm:$0xf]  ;;  %v2927_v12 = vld [vmem:[#allocation8 + $0x50] sm:$0xf0] }
 0x378   :  { %v1068_v56 = vmul.f32 0.5, %v3377_v29  ;;  %v2997_v29 = vld [vmem:[#allocation8 + $0xc8] sm:$0xf]  ;;  %v3255_v62 = vld [vmem:[#allocation8 + $0x44] sm:$0xf] }
 0x379   :  { %v4091_v27 = vadd.f32 %v1071_v18, %v1070_v25  ;;  %v2990_v25 = vor.u32 %v3273_v30, %v2989_v11  ;;  %v2991_v18 = vld [vmem:[#allocation8 + $0xd0] sm:$0xf0]  ;;  %v2930_v11 = vor.u32 %v3255_v62, %v2927_v12  ;;  %v2933_v30 = vld [vmem:[#allocation8 + $0x48] sm:$0xf]  ;;  %v3311_v12 = vld [vmem:[#allocation3] sm:$0xff] }
 0x37a   :  { %v1069_v40 = vadd.f32 0.5, %v1068_v56  ;;  %v2994_v56 = vor.u32 %v3271_v28, %v2991_v18  ;;  %v3258_v28 = vld [vmem:[#allocation8 + $0x54] sm:$0xf0] }
 0x37b   :  { %3378 = vtanh.f32 %v4091_v27  ;;  %v2934_v18 = vor.u32 %v3258_v28, %v2933_v30  ;;  %v3309_v28 = vld [vmem:[#allocation9 + $0xec] sm:$0xf0] }
 0x381   :  { %v3379_v5 = vpop.eup %3378 }
 0x382   :  { %v1074_v0 = vmul.f32 %v3379_v5, %v1069_v40  ;;  %v3272_v5 = vld [vmem:[#allocation8 + $0xcc] sm:$0xf] }
 0x384   :  { %v1075_v44 = vpack.c.bf16 %v1074_v0, %v1074_v0  ;;  %v2999_v0 = vld [vmem:[#allocation8 + $0xd8] sm:$0xf0] }
 0x386   :  { %1077 = vst [vmem:[#allocation3 + $0x10] sm:$0xf] %v1075_v44  ;;  %1093 = vmatmul.bf16.vlgmr.msra.gmra.mxu0 %v1075_v44  ;;  %1106 = vmatmul.bf16.vlgmr.msra.gmra.mxu1 %v1075_v44 }
 0x387   :  { %1119 = vmatmul.bf16.vlgmr.msra.gmra.mxu2 %v1075_v44  ;;  %1132 = vmatmul.bf16.vlgmr.msra.gmra.mxu3 %v1075_v44  ;;  %v3002_v44 = vor.u32 %v3272_v5, %v2999_v0  ;;  %v3251_v5 = vld [vmem:[#allocation8 + $0x24] sm:$0xf]  ;;  %v2911_v0 = vld [vmem:[#allocation8 + $0x30] sm:$0xf0] }
 0x388   :  { %1247 = vmatpush.bf16.msra.mxu0 %v3672_v47  ;;  %1260 = vmatpush.bf16.msra.mxu1 %v3670_v41  ;;  %v4697_v47 = vld [vmem:[#allocation24_spill] sm:$0xff] }
 0x389   :  { %1273 = vmatpush.bf16.msra.mxu2 %v3668_v37  ;;  %1286 = vmatpush.bf16.msra.mxu3 %v3675_v49  ;;  %v4696_v37 = vld [vmem:[#allocation22_spill] sm:$0xff]  ;;  %v417_v49 = vadd.f32 %v4697_v47, %v3851_v36 }
 0x38a   :  { %v388_v41 = vadd.f32 %v4696_v37, %v3847_v31  ;;  %v2973_v37 = vld [vmem:[#allocation8 + $0xa0] sm:$0xf]  ;;  %v3267_v47 = vld [vmem:[#allocation8 + $0xa4] sm:$0xf] }
 0x38c   :  { %1248 = vmatpush.bf16.msra.mxu0 %v3683_v59  ;;  %1261 = vmatpush.bf16.msra.mxu1 %v3680_v53 }
 0x38d   :  { %1274 = vmatpush.bf16.msra.mxu2 %v3677_v50  ;;  %1287 = vmatpush.bf16.msra.mxu3 %v3687_v60 }
 0x390   :  { %1249 = vmatpush.bf16.msra.mxu0 %v3695_v7  ;;  %1262 = vmatpush.bf16.msra.mxu1 %v3692_v1  ;;  %v4699_v7 = vld [vmem:[#allocation26_spill] sm:$0xff] }
 0x391   :  { %1275 = vmatpush.bf16.msra.mxu2 %v3689_v61  ;;  %1288 = vmatpush.bf16.msra.mxu3 %v3699_v8  ;;  %v4698_v61 = vld [vmem:[#allocation25_spill] sm:$0xff]  ;;  %v475_v8 = vadd.f32 %v4699_v7, %v3863_v52 }
 0x392   :  { %v446_v1 = vadd.f32 %v4698_v61, %v3861_v51  ;;  %v2983_v7 = vld [vmem:[#allocation8 + $0xb8] sm:$0xf0] }
 0x394   :  { %1250 = vmatpush.bf16.msra.mxu0 %v3710_v20  ;;  %1263 = vmatpush.bf16.msra.mxu1 %v3704_v13 }
 0x395   :  { %1276 = vmatpush.bf16.msra.mxu2 %v3701_v9  ;;  %1289 = vmatpush.bf16.msra.mxu3 %v3714_v21 }
 0x398   :  { %1251 = vmatpush.bf16.msra.mxu0 %v3722_v32  ;;  %1264 = vmatpush.bf16.msra.mxu1 %v3719_v26 }
 0x399   :  { %1277 = vmatpush.bf16.msra.mxu2 %v3716_v22  ;;  %1290 = vmatpush.bf16.msra.mxu3 %v3726_v33 }
 0x39c   :  { %1252 = vmatpush.bf16.msra.mxu0 %v3734_v42  ;;  %1265 = vmatpush.bf16.msra.mxu1 %v3731_v38 }
 0x39d   :  { %1278 = vmatpush.bf16.msra.mxu2 %v3728_v34  ;;  %1291 = vmatpush.bf16.msra.mxu3 %v3738_v46 }
 0x3a0   :  { %1253 = vmatpush.bf16.msra.mxu0 %v3746_v63  ;;  %1266 = vmatpush.bf16.msra.mxu1 %v3743_v55 }
 0x3a1   :  { %1279 = vmatpush.bf16.msra.mxu2 %v3740_v48  ;;  %1292 = vmatpush.bf16.msra.mxu3 %v3750_v3 }
 0x3a4   :  { %1254 = vmatpush.bf16.msra.mxu0 %v3758_v14  ;;  %1267 = vmatpush.bf16.msra.mxu1 %v3755_v10 }
 0x3a5   :  { %1280 = vmatpush.bf16.msra.mxu2 %v3752_v4  ;;  %1293 = vmatpush.bf16.msra.mxu3 %v3762_v15 }
 0x403   :  { %v1094_v50 = vpop.f32.mrf.mxu0  ;;  %v1107_v53 = vpop.f32.mrf.mxu1 }
 0x404   :  { %v1137_v59 = vadd.f32 %v1094_v50, %v388_v41  ;;  %v1138_v60 = vadd.f32 %v1107_v53, %v417_v49  ;;  %v3269_v41 = vld [vmem:[#allocation8 + $0xac] sm:$0xf0]  ;;  %v2975_v50 = vld [vmem:[#allocation8 + $0xb0] sm:$0xf0]  ;;  %v2981_v53 = vld [vmem:[#allocation8 + $0xa8] sm:$0xf] }
 0x405   :  { %v2974_v49 = vor.u32 %v3269_v41, %v2973_v37  ;;  %v3254_v41 = vld [vmem:[#allocation8 + $0x34] sm:$0xf0] }
 0x406   :  { %3380 = vtanh.f32 %v1137_v59  ;;  %v3270_v59 = vld [vmem:[#allocation8 + $0xb4] sm:$0xf0] }
 0x407   :  { %3382 = vtanh.f32 %v1138_v60  ;;  %v2978_v60 = vor.u32 %v3267_v47, %v2975_v50  ;;  %v2982_v61 = vor.u32 %v3270_v59, %v2981_v53  ;;  %v3252_v47 = vld [vmem:[#allocation8 + $0x2c] sm:$0xf]  ;;  %v2914_v59 = vor.u32 %v3251_v5, %v2911_v0  ;;  %v3143_v0 = vld [vmem:[#allocation9 + $0xf8] sm:$0xf0] }
 0x408   :  { %v3308_v5 = vld [vmem:[#allocation9 + $0xec] sm:$0xf] }
 0x40a   :  { %v1120_v9 = vpop.f32.mrf.mxu2  ;;  %v1133_v13 = vpop.f32.mrf.mxu3 }
 0x40b   :  { %v1139_v20 = vadd.f32 %v1120_v9, %v446_v1  ;;  %v1096_v21 = vpop.f32.mrf.mxu0  ;;  %v1109_v22 = vpop.f32.mrf.mxu1  ;;  %v1140_v32 = vadd.f32 %v1133_v13, %v475_v8  ;;  %v3268_v1 = vld [vmem:[#allocation8 + $0xac] sm:$0xf]  ;;  %v2957_v9 = vld [vmem:[#allocation8 + $0x80] sm:$0xf]  ;;  %v3265_v13 = vld [vmem:[#allocation8 + $0x8c] sm:$0xf0] }
 0x40c   :  { %v3381_v26 = vpop.eup %3380  ;;  %v2986_v8 = vor.u32 %v3268_v1, %v2983_v7  ;;  %v2958_v21 = vor.u32 %v3265_v13, %v2957_v9  ;;  %v2959_v22 = vld [vmem:[#allocation8 + $0x90] sm:$0xf0]  ;;  %v3249_v1 = vld [vmem:[#allocation8 + $0xc] sm:$0xf0]  ;;  %v3247_v7 = vld [vmem:[#allocation8 + $0x4] sm:$0xf] }
 0x40d   :  { %v3383_v33 = vpop.eup %3382  ;;  %3384 = vtanh.f32 %v1139_v20  ;;  %v1145_v34 = vmul.f32 0.5, %v3381_v26  ;;  %v3263_v20 = vld [vmem:[#allocation8 + $0x84] sm:$0xf]  ;;  %v2965_v26 = vld [vmem:[#allocation8 + $0x88] sm:$0xf] }
 0x40e   :  { %v1147_v38 = vmul.f32 0.5, %v3383_v33  ;;  %3386 = vtanh.f32 %v1140_v32  ;;  %v3266_v32 = vld [vmem:[#allocation8 + $0x94] sm:$0xf0]  ;;  %v2962_v33 = vor.u32 %v3263_v20, %v2959_v22  ;;  %v2895_v22 = vld [vmem:[#allocation8 + $0x10] sm:$0xf0] }
 0x40f   :  { %v1146_v46 = vadd.f32 0.5, %v1145_v34  ;;  %v2966_v34 = vor.u32 %v3266_v32, %v2965_v26  ;;  %v2901_v26 = vld [vmem:[#allocation8 + $0x8] sm:$0xf]  ;;  %v3250_v32 = vld [vmem:[#allocation8 + $0x14] sm:$0xf0] }
 0x410   :  { %v1148_v42 = vadd.f32 0.5, %v1147_v38  ;;  %v3264_v38 = vld [vmem:[#allocation8 + $0x8c] sm:$0xf] }
 0x412   :  { %v1122_v48 = vpop.f32.mrf.mxu2  ;;  %v1135_v55 = vpop.f32.mrf.mxu3  ;;  %v1151_v3 = vmul.f32 %v1148_v42, %v4091_v27  ;;  %v3274_v27 = vld [vmem:[#allocation8 + $0xd4] sm:$0xf0]  ;;  %v2967_v42 = vld [vmem:[#allocation8 + $0x98] sm:$0xf0] }
 0x413   :  { %v3385_v63 = vpop.eup %3384  ;;  %v2998_v40 = vor.u32 %v3274_v27, %v2997_v29  ;;  %v2941_v48 = vld [vmem:[#allocation8 + $0x60] sm:$0xf]  ;;  %v3261_v55 = vld [vmem:[#allocation8 + $0x6c] sm:$0xf0]  ;;  %v2935_v29 = vld [vmem:[#allocation8 + $0x58] sm:$0xf0] }
 0x414   :  { %v1152_v4 = vmul.f32 %v3385_v63, %v1146_v46  ;;  %v3387_v10 = vpop.eup %3386  ;;  %v2970_v46 = vor.u32 %v3264_v38, %v2967_v42  ;;  %v3259_v63 = vld [vmem:[#allocation8 + $0x64] sm:$0xf]  ;;  %v2909_v27 = vld [vmem:[#allocation8 + $0x20] sm:$0xf]  ;;  %v3248_v42 = vld [vmem:[#allocation8 + $0xc] sm:$0xf] }
 0x415   :  { %v1149_v15 = vmul.f32 0.5, %v3387_v10  ;;  %v2942_v10 = vor.u32 %v3261_v55, %v2941_v48 }
 0x416   :  { %v4135_v14 = vadd.f32 %v1152_v4, %v1151_v3 }
 0x417   :  { %v1150_v17 = vadd.f32 0.5, %v1149_v15  ;;  %v2943_v15 = vld [vmem:[#allocation8 + $0x70] sm:$0xf0] }
 0x418   :  { %3388 = vtanh.f32 %v4135_v14  ;;  %v2946_v39 = vor.u32 %v3259_v63, %v2943_v15 }
 0x41e   :  { %v3389_v54 = vpop.eup %3388 }
 0x41f   :  { %v1155_v35 = vmul.f32 %v3389_v54, %v1150_v17  ;;  %v2949_v17 = vld [vmem:[#allocation8 + $0x68] sm:$0xf]  ;;  %v3262_v54 = vld [vmem:[#allocation8 + $0x74] sm:$0xf0] }
 0x421   :  { %v1156_v43 = vpack.c.bf16 %v1155_v35, %v1155_v35  ;;  %v4700_v35 = vld [vmem:[#allocation27_spill] sm:$0xff] }
 0x423   :  { %1158 = vst [vmem:[#allocation3 + $0x14] sm:$0xf] %v1156_v43  ;;  %1174 = vmatmul.bf16.vlgmr.msrb.gmra.mxu0 %v1156_v43  ;;  %1187 = vmatmul.bf16.vlgmr.msrb.gmra.mxu1 %v1156_v43 }
 0x424   :  { %1200 = vmatmul.bf16.vlgmr.msrb.gmra.mxu2 %v1156_v43  ;;  %1213 = vmatmul.bf16.vlgmr.msrb.gmra.mxu3 %v1156_v43 }
 0x425   :  { %1590 = vmatpush.bf16.msrb.mxu0 %v3006_v2  ;;  %1619 = vmatpush.bf16.msrb.mxu1 %v3010_v24  ;;  %v2950_v2 = vor.u32 %v3262_v54, %v2949_v17  ;;  %v2954_v24 = vor.u32 %v3260_v16, %v2951_v19 }
 0x426   :  { %1648 = vmatpush.bf16.msrb.mxu2 %v3014_v57  ;;  %1677 = vmatpush.bf16.msrb.mxu3 %v3018_v6  ;;  %v3257_v57 = vld [vmem:[#allocation8 + $0x4c] sm:$0xf0] }
 0x427   :  { %v2926_v6 = vor.u32 %v3257_v57, %v2925_v23 }
 0x429   :  { %1591 = vmatpush.bf16.msrb.mxu0 %v2990_v25  ;;  %1620 = vmatpush.bf16.msrb.mxu1 %v2994_v56  ;;  %v3256_v25 = vld [vmem:[#allocation8 + $0x4c] sm:$0xf]  ;;  %v3253_v56 = vld [vmem:[#allocation8 + $0x2c] sm:$0xf0] }
 0x42a   :  { %1649 = vmatpush.bf16.msrb.mxu2 %v2998_v40  ;;  %1678 = vmatpush.bf16.msrb.mxu3 %v3002_v44  ;;  %v2938_v40 = vor.u32 %v3256_v25, %v2935_v29  ;;  %v2917_v44 = vld [vmem:[#allocation8 + $0x28] sm:$0xf]  ;;  %v2910_v37 = vor.u32 %v3253_v56, %v2909_v27  ;;  %v3307_v25 = vld [vmem:[#allocation9 + $0xe4] sm:$0xf] }
 0x42b   :  { %v3312_v56 = vld [vmem:[#allocation3 + $0x8] sm:$0xff] }
 0x42d   :  { %1592 = vmatpush.bf16.msrb.mxu0 %v2974_v49  ;;  %1621 = vmatpush.bf16.msrb.mxu1 %v2978_v60  ;;  %v2919_v49 = vld [vmem:[#allocation8 + $0x38] sm:$0xf0]  ;;  %v2918_v60 = vor.u32 %v3254_v41, %v2917_v44  ;;  %v3125_v44 = vld [vmem:[#allocation9 + $0xc8] sm:$0xf]  ;;  %v3306_v41 = vld [vmem:[#allocation9 + $0xd4] sm:$0xf0] }
 0x42e   :  { %1650 = vmatpush.bf16.msrb.mxu2 %v2982_v61  ;;  %1679 = vmatpush.bf16.msrb.mxu3 %v2986_v8  ;;  %v2893_v61 = vld [vmem:[#allocation8] sm:$0xf]  ;;  %v4702_v8 = vld [vmem:[#allocation29_spill] sm:$0xff] }
 0x42f   :  { %v2894_v55 = vor.u32 %v3249_v1, %v2893_v61  ;;  %v3304_v1 = vld [vmem:[#allocation9 + $0xcc] sm:$0xf] }
 0x431   :  { %1593 = vmatpush.bf16.msrb.mxu0 %v2958_v21  ;;  %1622 = vmatpush.bf16.msrb.mxu1 %v2962_v33  ;;  %v2922_v21 = vor.u32 %v3252_v47, %v2919_v49  ;;  %v3117_v47 = vld [vmem:[#allocation9 + $0xc0] sm:$0xf]  ;;  %v3305_v49 = vld [vmem:[#allocation9 + $0xcc] sm:$0xf0] }
 0x432   :  { %1651 = vmatpush.bf16.msrb.mxu2 %v2966_v34  ;;  %1680 = vmatpush.bf16.msrb.mxu3 %v2970_v46  ;;  %v4703_v34 = vld [vmem:[#allocation31_spill] sm:$0xff]  ;;  %v2903_v46 = vld [vmem:[#allocation8 + $0x18] sm:$0xf0] }
 0x433   :  { %v2906_v15 = vor.u32 %v3248_v42, %v2903_v46 }
 0x435   :  { %1594 = vmatpush.bf16.msrb.mxu0 %v2942_v10  ;;  %1623 = vmatpush.bf16.msrb.mxu1 %v2946_v39  ;;  %v2902_v10 = vor.u32 %v3250_v32, %v2901_v26  ;;  %v3109_v32 = vld [vmem:[#allocation9 + $0xa8] sm:$0xf] }
 0x436   :  { %1652 = vmatpush.bf16.msrb.mxu2 %v2950_v2  ;;  %1681 = vmatpush.bf16.msrb.mxu3 %v2954_v24 }
 0x439   :  { %1595 = vmatpush.bf16.msrb.mxu0 %v2926_v6  ;;  %1624 = vmatpush.bf16.msrb.mxu1 %v2930_v11  ;;  %v3310_v6 = vld [vmem:[#allocation9 + $0xf4] sm:$0xf0]  ;;  %v3133_v11 = vld [vmem:[#allocation9 + $0xe0] sm:$0xf] }
 0x43a   :  { %1653 = vmatpush.bf16.msrb.mxu2 %v2934_v18  ;;  %1682 = vmatpush.bf16.msrb.mxu3 %v2938_v40  ;;  %v3135_v18 = vld [vmem:[#allocation9 + $0xf0] sm:$0xf0]  ;;  %v4148_v29 = vor.u32 %v3309_v28, %v3133_v11  ;;  %v3293_v11 = vld [vmem:[#allocation9 + $0x6c] sm:$0xf0]  ;;  %v3291_v28 = vld [vmem:[#allocation9 + $0x64] sm:$0xf] }
 0x43b   :  { %v4150_v27 = vor.u32 %v3307_v25, %v3135_v18  ;;  %v3313_v40 = vld [vmem:[#allocation3 + $0x10] sm:$0xff]  ;;  %v4707_v25 = vld [vmem:[#allocation34_spill] sm:$0xff] }
 0x43c   :  { %v480_v18 = vadd.f32 %v4707_v25, %v3863_v52  ;;  %v3061_v52 = vld [vmem:[#allocation9 + $0x48] sm:$0xf] }
 0x43d   :  { %1596 = vmatpush.bf16.msrb.mxu0 %v2910_v37  ;;  %1625 = vmatpush.bf16.msrb.mxu1 %v2914_v59  ;;  %v4155_v37 = vor.u32 %v3308_v5, %v3143_v0  ;;  %v3303_v59 = vld [vmem:[#allocation9 + $0xc4] sm:$0xf]  ;;  %v3071_v0 = vld [vmem:[#allocation9 + $0x70] sm:$0xf0] }
 0x43e   :  { %1654 = vmatpush.bf16.msrb.mxu2 %v2918_v60  ;;  %1683 = vmatpush.bf16.msrb.mxu3 %v2922_v21  ;;  %v3119_v60 = vld [vmem:[#allocation9 + $0xd0] sm:$0xf0] }
 0x43f   :  { %v4162_v61 = vor.u32 %v3303_v59, %v3119_v60  ;;  %v4205_v60 = vor.u32 %v3291_v28, %v3071_v0  ;;  %v3047_v28 = vld [vmem:[#allocation9 + $0x38] sm:$0xf0]  ;;  %v3282_v0 = vld [vmem:[#allocation9 + $0x14] sm:$0xf0] }
 0x441   :  { %1597 = vmatpush.bf16.msrb.mxu0 %v2894_v55  ;;  %v3299_v55 = vld [vmem:[#allocation9 + $0xa4] sm:$0xf] }
 0x442   :  { %1655 = vmatpush.bf16.msrb.mxu2 %v2902_v10  ;;  %1684 = vmatpush.bf16.msrb.mxu3 %v2906_v15  ;;  %v3093_v10 = vld [vmem:[#allocation9 + $0x88] sm:$0xf] }
 0x4a0   :  { %v1175_v3 = vpop.f32.mrf.mxu0  ;;  %v1188_v4 = vpop.f32.mrf.mxu1 }
 0x4a1   :  { %v1218_v43 = vadd.f32 %v1175_v3, %v4700_v35  ;;  %v1219_v45 = vadd.f32 %v1188_v4, %v4701_v58  ;;  %v2898_v4 = vor.u32 %v3247_v7, %v2895_v22  ;;  %v3127_v7 = vld [vmem:[#allocation9 + $0xd8] sm:$0xf0] }
 0x4a3   :  { %3390 = vtanh.f32 %v1218_v43  ;;  %1626 = vmatpush.bf16.msrb.mxu1 %v2898_v4  ;;  %v3300_v4 = vld [vmem:[#allocation9 + $0xac] sm:$0xf] }
 0x4a4   :  { %3392 = vtanh.f32 %v1219_v45 }
 0x4a7   :  { %v1201_v50 = vpop.f32.mrf.mxu2  ;;  %v1214_v53 = vpop.f32.mrf.mxu3 }
 0x4a8   :  { %v1220_v9 = vadd.f32 %v1201_v50, %v4702_v8  ;;  %v1177_v13 = vpop.f32.mrf.mxu0  ;;  %v1190_v20 = vpop.f32.mrf.mxu1  ;;  %v1221_v38 = vadd.f32 %v1214_v53, %v4703_v34  ;;  %v4157_v50 = vor.u32 %v3306_v41, %v3125_v44  ;;  %v4159_v53 = vor.u32 %v3305_v49, %v3117_v47  ;;  %v3101_v34 = vld [vmem:[#allocation9 + $0xa0] sm:$0xf]  ;;  %v3292_v44 = vld [vmem:[#allocation9 + $0x6c] sm:$0xf]  ;;  %v3079_v41 = vld [vmem:[#allocation9 + $0x78] sm:$0xf0] }
 0x4a9   :  { %v3391_v33 = vpop.eup %3390  ;;  %v4167_v8 = vor.u32 %v3304_v1, %v3127_v7  ;;  %v4705_v20 = vld [vmem:[#allocation32_spill] sm:$0xff]  ;;  %v3290_v1 = vld [vmem:[#allocation9 + $0x54] sm:$0xf0]  ;;  %v3053_v7 = vld [vmem:[#allocation9 + $0x40] sm:$0xf] }
 0x4aa   :  { %v3393_v48 = vpop.eup %3392  ;;  %3394 = vtanh.f32 %v1220_v9  ;;  %v1226_v63 = vmul.f32 0.5, %v3391_v33  ;;  %v4704_v9 = vld [vmem:[#allocation30_spill] sm:$0xff]  ;;  %v422_v21 = vadd.f32 %v4705_v20, %v3851_v36  ;;  %v3302_v33 = vld [vmem:[#allocation9 + $0xb4] sm:$0xf0]  ;;  %v3111_v36 = vld [vmem:[#allocation9 + $0xb8] sm:$0xf0]  ;;  %v4208_v20 = vor.u32 %v3292_v44, %v3079_v41 }
 0x4ab   :  { %v1228_v3 = vmul.f32 0.5, %v3393_v48  ;;  %3396 = vtanh.f32 %v1221_v38  ;;  %v393_v13 = vadd.f32 %v4704_v9, %v3847_v31  ;;  %v4174_v46 = vor.u32 %v3302_v33, %v3109_v32  ;;  %v3301_v48 = vld [vmem:[#allocation9 + $0xac] sm:$0xf0]  ;;  %v3288_v33 = vld [vmem:[#allocation9 + $0x4c] sm:$0xf] }
 0x4ac   :  { %v1227_v54 = vadd.f32 0.5, %v1226_v63  ;;  %v3103_v63 = vld [vmem:[#allocation9 + $0xb0] sm:$0xf0]  ;;  %v4181_v15 = vor.u32 %v3300_v4, %v3111_v36  ;;  %v3286_v36 = vld [vmem:[#allocation9 + $0x34] sm:$0xf0] }
 0x4ad   :  { %v1229_v17 = vadd.f32 0.5, %v1228_v3  ;;  %v4176_v3 = vor.u32 %v3301_v48, %v3101_v34  ;;  %v4178_v31 = vor.u32 %v3299_v55, %v3103_v63  ;;  %v3063_v34 = vld [vmem:[#allocation9 + $0x58] sm:$0xf0]  ;;  %v4211_v48 = vor.u32 %v3290_v1, %v3061_v52  ;;  %v3045_v55 = vld [vmem:[#allocation9 + $0x28] sm:$0xf] }
 0x4ae   :  { %v3021_v44 = vld [vmem:[#allocation9] sm:$0xf]  ;;  %v3281_v41 = vld [vmem:[#allocation9 + $0xc] sm:$0xf0]  ;;  %v3023_v1 = vld [vmem:[#allocation9 + $0x10] sm:$0xf0] }
 0x4af   :  { %v1203_v35 = vpop.f32.mrf.mxu2  ;;  %v1216_v43 = vpop.f32.mrf.mxu3  ;;  %v1232_v45 = vmul.f32 %v1229_v17, %v4135_v14  ;;  %v3141_v14 = vld [vmem:[#allocation9 + $0xe8] sm:$0xf]  ;;  %v3298_v17 = vld [vmem:[#allocation9 + $0x94] sm:$0xf0] }
 0x4b0   :  { %v3395_v58 = vpop.eup %3394  ;;  %v4146_v30 = vor.u32 %v3310_v6, %v3141_v14  ;;  %v3297_v35 = vld [vmem:[#allocation9 + $0x8c] sm:$0xf0]  ;;  %v4185_v43 = vor.u32 %v3298_v17, %v3093_v10  ;;  %v3069_v6 = vld [vmem:[#allocation9 + $0x60] sm:$0xf] }
 0x4b1   :  { %v1233_v39 = vmul.f32 %v3395_v58, %v1227_v54  ;;  %v3397_v2 = vpop.eup %3396  ;;  %v3085_v54 = vld [vmem:[#allocation9 + $0x80] sm:$0xf]  ;;  %v4203_v59 = vor.u32 %v3293_v11, %v3069_v6  ;;  %v3285_v17 = vld [vmem:[#allocation9 + $0x2c] sm:$0xf0]  ;;  %v3284_v11 = vld [vmem:[#allocation9 + $0x2c] sm:$0xf] }
 0x4b2   :  { %v1230_v19 = vmul.f32 0.5, %v3397_v2  ;;  %v4187_v58 = vor.u32 %v3297_v35, %v3085_v54  ;;  %v3296_v2 = vld [vmem:[#allocation9 + $0x8c] sm:$0xf]  ;;  %v3037_v10 = vld [vmem:[#allocation9 + $0x20] sm:$0xf]  ;;  %v4220_v35 = vor.u32 %v3288_v33, %v3063_v34 }
 0x4b3   :  { %v4143_v16 = vadd.f32 %v1233_v39, %v1232_v45  ;;  %v3295_v45 = vld [vmem:[#allocation9 + $0x84] sm:$0xf]  ;;  %v3087_v39 = vld [vmem:[#allocation9 + $0x90] sm:$0xf0] }
 0x4b4   :  { %v1231_v23 = vadd.f32 0.5, %v1230_v19  ;;  %v4190_v19 = vor.u32 %v3295_v45, %v3087_v39  ;;  %v3283_v45 = vld [vmem:[#allocation9 + $0x24] sm:$0xf]  ;;  %v3039_v39 = vld [vmem:[#allocation9 + $0x30] sm:$0xf0] }
 0x4b5   :  { %3398 = vtanh.f32 %v4143_v16  ;;  %v4229_v6 = vor.u32 %v3283_v45, %v3039_v39 }
 0x4bb   :  { %v3399_v24 = vpop.eup %3398 }
 0x4bc   :  { %v1236_v57 = vmul.f32 %v3399_v24, %v1231_v23  ;;  %v3095_v23 = vld [vmem:[#allocation9 + $0x98] sm:$0xf0]  ;;  %v3077_v24 = vld [vmem:[#allocation9 + $0x68] sm:$0xf] }
 0x4bd   :  { %v4194_v14 = vor.u32 %v3296_v2, %v3095_v23 }
 0x4be   :  { %v1237_v62 = vpack.c.bf16 %v1236_v57, %v1236_v57  ;;  %v3294_v57 = vld [vmem:[#allocation9 + $0x74] sm:$0xf0] }
 0x4bf   :  { %v4199_v5 = vor.u32 %v3294_v57, %v3077_v24  ;;  %v4223_v57 = vor.u32 %v3286_v36, %v3045_v55 }
 0x4c0   :  { %1239 = vst [vmem:[#allocation3 + $0x18] sm:$0xf] %v1237_v62  ;;  %1255 = vmatmul.bf16.vlgmr.msra.gmra.mxu0 %v1237_v62  ;;  %1268 = vmatmul.bf16.vlgmr.msra.gmra.mxu1 %v1237_v62 }
 0x4c1   :  { %1281 = vmatmul.bf16.vlgmr.msra.gmra.mxu2 %v1237_v62  ;;  %1294 = vmatmul.bf16.vlgmr.msra.gmra.mxu3 %v1237_v62  ;;  %v4706_v62 = vld [vmem:[#allocation33_spill] sm:$0xff] }
 0x4c2   :  { %1928 = vmatpush.bf16.msra.mxu2 %v4146_v30  ;;  %1902 = vmatpush.bf16.msra.mxu0 %v4148_v29 }
 0x4c3   :  { %1915 = vmatpush.bf16.msra.mxu1 %v4150_v27  ;;  %1941 = vmatpush.bf16.msra.mxu3 %v4155_v37 }
 0x4c6   :  { %1929 = vmatpush.bf16.msra.mxu2 %v4157_v50  ;;  %1903 = vmatpush.bf16.msra.mxu0 %v4159_v53 }
 0x4c7   :  { %1916 = vmatpush.bf16.msra.mxu1 %v4162_v61  ;;  %1942 = vmatpush.bf16.msra.mxu3 %v4167_v8 }
 0x4ca   :  { %1930 = vmatpush.bf16.msra.mxu2 %v4174_v46  ;;  %1904 = vmatpush.bf16.msra.mxu0 %v4176_v3 }
 0x4cb   :  { %1917 = vmatpush.bf16.msra.mxu1 %v4178_v31  ;;  %1943 = vmatpush.bf16.msra.mxu3 %v4181_v15 }
 0x4ce   :  { %1931 = vmatpush.bf16.msra.mxu2 %v4185_v43  ;;  %1905 = vmatpush.bf16.msra.mxu0 %v4187_v58 }
 0x4cf   :  { %1918 = vmatpush.bf16.msra.mxu1 %v4190_v19  ;;  %1944 = vmatpush.bf16.msra.mxu3 %v4194_v14 }
 0x4d0   :  { %1598 = vmatmul.bf16.vlgmr.msrb.gmra.mxu0 %v3311_v12  ;;  %1627 = vmatmul.bf16.vlgmr.msrb.gmra.mxu1 %v3311_v12 }
 0x4d1   :  { %1656 = vmatmul.bf16.vlgmr.msrb.gmra.mxu2 %v3311_v12  ;;  %1685 = vmatmul.bf16.vlgmr.msrb.gmra.mxu3 %v3311_v12  ;;  %v451_v12 = vadd.f32 %v4706_v62, %v3861_v51 }
 0x4d2   :  { %1932 = vmatpush.bf16.msra.mxu2 %v4199_v5  ;;  %1906 = vmatpush.bf16.msra.mxu0 %v4203_v59 }
 0x4d3   :  { %1919 = vmatpush.bf16.msra.mxu1 %v4205_v60  ;;  %1945 = vmatpush.bf16.msra.mxu3 %v4208_v20 }
 0x4d6   :  { %1933 = vmatpush.bf16.msra.mxu2 %v4211_v48 }
 0x4d7   :  { %1946 = vmatpush.bf16.msra.mxu3 %v4220_v35 }
 0x4da   :  { %1934 = vmatpush.bf16.msra.mxu2 %v4223_v57 }
 0x4e0   :  { %1603 = vmatmul.bf16.gmra.mxu0 %v3312_v56  ;;  %1632 = vmatmul.bf16.gmra.mxu1 %v3312_v56 }
 0x4e1   :  { %1661 = vmatmul.bf16.gmra.mxu2 %v3312_v56  ;;  %1690 = vmatmul.bf16.gmra.mxu3 %v3312_v56 }
 0x4f0   :  { %1608 = vmatmul.bf16.gmra.mxu0 %v3313_v40  ;;  %1637 = vmatmul.bf16.gmra.mxu1 %v3313_v40 }
 0x4f1   :  { %1666 = vmatmul.bf16.gmra.mxu2 %v3313_v40  ;;  %1695 = vmatmul.bf16.gmra.mxu3 %v3313_v40 }
 0x53d   :  { %v1256_v22 = vpop.f32.mrf.mxu0  ;;  %v1269_v26 = vpop.f32.mrf.mxu1 }
 0x53e   :  { %v1299_v38 = vadd.f32 %v1256_v22, %v393_v13  ;;  %v1300_v42 = vadd.f32 %v1269_v26, %v422_v21  ;;  %v3289_v21 = vld [vmem:[#allocation9 + $0x4c] sm:$0xf0]  ;;  %v3287_v22 = vld [vmem:[#allocation9 + $0x44] sm:$0xf]  ;;  %v3055_v26 = vld [vmem:[#allocation9 + $0x50] sm:$0xf0] }
 0x53f   :  { %v4215_v63 = vor.u32 %v3289_v21, %v3053_v7  ;;  %v4217_v4 = vor.u32 %v3287_v22, %v3055_v26 }
 0x540   :  { %3400 = vtanh.f32 %v1299_v38 }
 0x541   :  { %3402 = vtanh.f32 %v1300_v42  ;;  %1907 = vmatpush.bf16.msra.mxu0 %v4215_v63  ;;  %1920 = vmatpush.bf16.msra.mxu1 %v4217_v4 }
 0x544   :  { %v1282_v56 = vpop.f32.mrf.mxu2  ;;  %v1295_v40 = vpop.f32.mrf.mxu3 }
 0x545   :  { %v1301_v47 = vadd.f32 %v1282_v56, %v451_v12  ;;  %v1258_v49 = vpop.f32.mrf.mxu0  ;;  %v1271_v51 = vpop.f32.mrf.mxu1  ;;  %v1302_v13 = vadd.f32 %v1295_v40, %v480_v18  ;;  %v4227_v12 = vor.u32 %v3285_v17, %v3037_v10  ;;  %v4233_v56 = vor.u32 %v3284_v11, %v3047_v28  ;;  %v3029_v40 = vld [vmem:[#allocation9 + $0x8] sm:$0xf]  ;;  %1921 = vmatpush.bf16.msra.mxu1 %v4229_v6 }
 0x546   :  { %v3401_v9 = vpop.eup %3400  ;;  %v4236_v52 = vor.u32 %v3282_v0, %v3029_v40 }
 0x547   :  { %v3403_v32 = vpop.eup %3402  ;;  %3404 = vtanh.f32 %v1301_v47  ;;  %v1307_v38 = vmul.f32 0.5, %v3401_v9  ;;  %v3279_v47 = vld [vmem:[#allocation9 + $0x4] sm:$0xf]  ;;  %1908 = vmatpush.bf16.msra.mxu0 %v4227_v12  ;;  %v3280_v9 = vld [vmem:[#allocation9 + $0xc] sm:$0xf]  ;;  %1947 = vmatpush.bf16.msra.mxu3 %v4233_v56 }
 0x548   :  { %v1309_v42 = vmul.f32 0.5, %v3403_v32  ;;  %3406 = vtanh.f32 %v1302_v13  ;;  %v4242_v7 = vor.u32 %v3279_v47, %v3023_v1  ;;  %v3031_v13 = vld [vmem:[#allocation9 + $0x18] sm:$0xf0]  ;;  %1935 = vmatpush.bf16.msra.mxu2 %v4236_v52 }
 0x549   :  { %v1308_v2 = vadd.f32 0.5, %v1307_v38  ;;  %v4245_v21 = vor.u32 %v3280_v9, %v3031_v13 }
 0x54a   :  { %v1310_v54 = vadd.f32 0.5, %v1309_v42  ;;  %1922 = vmatpush.bf16.msra.mxu1 %v4242_v7  ;;  %v2874_v42 = vld [vmem:[%s4656_s1 + $0x8] sm:$0xff] }
 0x54b   :  { %1948 = vmatpush.bf16.msra.mxu3 %v4245_v21  ;;  %v1388_v55 = vpack.c.bf16 %v2874_v42, %v2874_v42 }
 0x54c   :  { %v1284_v23 = vpop.f32.mrf.mxu2  ;;  %v1297_v24 = vpop.f32.mrf.mxu3  ;;  %v1313_v25 = vmul.f32 %v1310_v54, %v4143_v16  ;;  %v4240_v16 = vor.u32 %v3281_v41, %v3021_v44  ;;  %2004 = vmatpush.bf16.msrb.mxu2 %v4146_v30 }
 0x54d   :  { %v3405_v62 = vpop.eup %3404  ;;  %v1599_v36 = vpop.f32.mrf.mxu0 }
 0x54e   :  { %v1314_v18 = vmul.f32 %v3405_v62, %v1308_v2  ;;  %v3407_v49 = vpop.eup %3406  ;;  %1909 = vmatpush.bf16.msra.mxu0 %v4240_v16  ;;  %1991 = vmatpush.bf16.msrb.mxu1 %v4150_v27  ;;  %v1628_v10 = vpop.f32.mrf.mxu1 }
 0x54f   :  { %v1311_v22 = vmul.f32 0.5, %v3407_v49  ;;  %2017 = vmatpush.bf16.msrb.mxu3 %v4155_v37 }
 0x550   :  { %v1315_v51 = vadd.f32 %v1314_v18, %v1313_v25  ;;  %2005 = vmatpush.bf16.msrb.mxu2 %v4157_v50 }
 0x551   :  { %v1312_v26 = vadd.f32 0.5, %v1311_v22 }
 0x552   :  { %3408 = vtanh.f32 %v1315_v51  ;;  %1978 = vmatpush.bf16.msrb.mxu0 %v4148_v29  ;;  %1992 = vmatpush.bf16.msrb.mxu1 %v4162_v61 }
 0x553   :  { %2018 = vmatpush.bf16.msrb.mxu3 %v4167_v8 }
 0x554   :  { %2006 = vmatpush.bf16.msrb.mxu2 %v4174_v46  ;;  %v1657_v17 = vpop.f32.mrf.mxu2  ;;  %v1686_v54 = vpop.f32.mrf.mxu3 }
 0x555   :  { %v4318_v45 = vpop.f32.mrf.mxu0 }
 0x556   :  { %1979 = vmatpush.bf16.msrb.mxu0 %v4159_v53  ;;  %1993 = vmatpush.bf16.msrb.mxu1 %v4178_v31  ;;  %v4320_v39 = vpop.f32.mrf.mxu1 }
 0x557   :  { %2019 = vmatpush.bf16.msrb.mxu3 %v4181_v15 }
 0x558   :  { %v3409_v32 = vpop.eup %3408  ;;  %2007 = vmatpush.bf16.msrb.mxu2 %v4185_v43 }
 0x559   :  { %v1317_v33 = vmul.f32 %v3409_v32, %v1312_v26 }
 0x55a   :  { %1980 = vmatpush.bf16.msrb.mxu0 %v4176_v3  ;;  %1994 = vmatpush.bf16.msrb.mxu1 %v4190_v19 }
 0x55b   :  { %v1318_v34 = vpack.c.bf16 %v1317_v33, %v1317_v33  ;;  %2020 = vmatpush.bf16.msrb.mxu3 %v4194_v14 }
 0x55c   :  { %2008 = vmatpush.bf16.msrb.mxu2 %v4199_v5  ;;  %v4322_v2 = vpop.f32.mrf.mxu2  ;;  %v4324_v23 = vpop.f32.mrf.mxu3 }
 0x55d   :  { %1320 = vst [vmem:[#allocation3 + $0x1c] sm:$0xf] %v1318_v34  ;;  %v4326_v24 = vpop.f32.mrf.mxu0  ;;  %v1385_v34 = vld [vmem:[%s4662_s7] sm:$0xf] }
 0x55e   :  { %1981 = vmatpush.bf16.msrb.mxu0 %v4187_v58  ;;  %1995 = vmatpush.bf16.msrb.mxu1 %v4205_v60  ;;  %v4328_v62 = vpop.f32.mrf.mxu1 }
 0x55f   :  { %2021 = vmatpush.bf16.msrb.mxu3 %v4208_v20 }
 0x560   :  { %2009 = vmatpush.bf16.msrb.mxu2 %v4211_v48 }
 0x562   :  { %1982 = vmatpush.bf16.msrb.mxu0 %v4203_v59  ;;  %1996 = vmatpush.bf16.msrb.mxu1 %v4217_v4 }
 0x563   :  { %2022 = vmatpush.bf16.msrb.mxu3 %v4220_v35 }
 0x564   :  { %v3314_v38 = vld [vmem:[#allocation3 + $0x18] sm:$0xff]  ;;  %2010 = vmatpush.bf16.msrb.mxu2 %v4223_v57  ;;  %v4330_v11 = vpop.f32.mrf.mxu2  ;;  %v4332_v28 = vpop.f32.mrf.mxu3 }
 0x565   :  { %1613 = vmatmul.bf16.gmra.mxu0 %v3314_v38  ;;  %1642 = vmatmul.bf16.gmra.mxu1 %v3314_v38  ;;  %4708 = vst [vmem:[#allocation15_spill] sm:$0xff] %v4332_v28  ;;  %v4334_v25 = vpop.f32.mrf.mxu0 }
 0x566   :  { %1671 = vmatmul.bf16.gmra.mxu2 %v3314_v38  ;;  %1700 = vmatmul.bf16.gmra.mxu3 %v3314_v38  ;;  %4709 = vst [vmem:[#allocation14_spill] sm:$0xff] %v4334_v25  ;;  %v4336_v18 = vpop.f32.mrf.mxu1 }
 0x567   :  { %1983 = vmatpush.bf16.msrb.mxu0 %v4215_v63  ;;  %1997 = vmatpush.bf16.msrb.mxu1 %v4229_v6  ;;  %4710 = vst [vmem:[#allocation16_spill] sm:$0xff] %v4336_v18 }
 0x568   :  { %2023 = vmatpush.bf16.msrb.mxu3 %v4233_v56  ;;  %2011 = vmatpush.bf16.msrb.mxu2 %v4236_v52 }
 0x56b   :  { %1984 = vmatpush.bf16.msrb.mxu0 %v4227_v12  ;;  %1998 = vmatpush.bf16.msrb.mxu1 %v4242_v7 }
 0x56c   :  { %2024 = vmatpush.bf16.msrb.mxu3 %v4245_v21  ;;  %v4338_v40 = vpop.f32.mrf.mxu2  ;;  %v4340_v0 = vpop.f32.mrf.mxu3 }
 0x56d   :  { %4711 = vst [vmem:[#allocation17_spill] sm:$0xff] %v4338_v40  ;;  %v4342_v44 = vpop.f32.mrf.mxu0 }
 0x56e   :  { %4712 = vst [vmem:[#allocation18_spill] sm:$0xff] %v4340_v0  ;;  %v4344_v41 = vpop.f32.mrf.mxu1 }
 0x56f   :  { %1985 = vmatpush.bf16.msrb.mxu0 %v4240_v16  ;;  %4713 = vst [vmem:[#allocation19_spill] sm:$0xff] %v4342_v44 }
 0x570   :  { %4714 = vst [vmem:[#allocation20_spill] sm:$0xff] %v4344_v41 }
 0x574   :  { %v4346_v47 = vpop.f32.mrf.mxu2  ;;  %v4348_v49 = vpop.f32.mrf.mxu3 }
 0x575   :  { %1910 = vmatmul.bf16.vlgmr.msra.gmra.mxu0 %v1388_v55  ;;  %1923 = vmatmul.bf16.vlgmr.msra.gmra.mxu1 %v1388_v55  ;;  %4715 = vst [vmem:[#allocation21_spill] sm:$0xff] %v4346_v47  ;;  %v4350_v51 = vpop.f32.mrf.mxu0  ;;  %v4383_v47 = vperm.slane %v1385_v34, 2 }
 0x576   :  { %1936 = vmatmul.bf16.vlgmr.msra.gmra.mxu2 %v1388_v55  ;;  %1949 = vmatmul.bf16.vlgmr.msra.gmra.mxu3 %v1388_v55  ;;  %4716 = vst [vmem:[#allocation23_spill] sm:$0xff] %v4348_v49  ;;  %v4352_v1 = vpop.f32.mrf.mxu1  ;;  %v4373_v55 = vperm.slane %v1385_v34, 0 }
 0x577   :  { %2054 = vmatpush.bf16.msra.mxu0 %v4148_v29  ;;  %2067 = vmatpush.bf16.msra.mxu1 %v4150_v27  ;;  %4717 = vst [vmem:[#allocation22_spill] sm:$0xff] %v4350_v51 }
 0x578   :  { %2080 = vmatpush.bf16.msra.mxu2 %v4146_v30  ;;  %2093 = vmatpush.bf16.msra.mxu3 %v4155_v37  ;;  %4718 = vst [vmem:[#allocation24_spill] sm:$0xff] %v4352_v1 }
 0x57b   :  { %2055 = vmatpush.bf16.msra.mxu0 %v4159_v53  ;;  %2068 = vmatpush.bf16.msra.mxu1 %v4162_v61 }
 0x57c   :  { %2081 = vmatpush.bf16.msra.mxu2 %v4157_v50  ;;  %2094 = vmatpush.bf16.msra.mxu3 %v4167_v8  ;;  %v4354_v9 = vpop.f32.mrf.mxu2  ;;  %v4356_v13 = vpop.f32.mrf.mxu3 }
 0x57d   :  { %4719 = vst [vmem:[#allocation25_spill] sm:$0xff] %v4354_v9  ;;  %v4375_v9 = vperm.slane %v1385_v34, 1 }
 0x57e   :  { %4720 = vst [vmem:[#allocation26_spill] sm:$0xff] %v4356_v13 }
 0x57f   :  { %2056 = vmatpush.bf16.msra.mxu0 %v4176_v3  ;;  %2069 = vmatpush.bf16.msra.mxu1 %v4178_v31 }
 0x580   :  { %2082 = vmatpush.bf16.msra.mxu2 %v4174_v46  ;;  %2095 = vmatpush.bf16.msra.mxu3 %v4181_v15 }
 0x583   :  { %2057 = vmatpush.bf16.msra.mxu0 %v4187_v58  ;;  %2070 = vmatpush.bf16.msra.mxu1 %v4190_v19 }
 0x584   :  { %2083 = vmatpush.bf16.msra.mxu2 %v4185_v43  ;;  %2096 = vmatpush.bf16.msra.mxu3 %v4194_v14 }
 0x587   :  { %2058 = vmatpush.bf16.msra.mxu0 %v4203_v59  ;;  %2071 = vmatpush.bf16.msra.mxu1 %v4205_v60 }
 0x588   :  { %2084 = vmatpush.bf16.msra.mxu2 %v4199_v5  ;;  %2097 = vmatpush.bf16.msra.mxu3 %v4208_v20 }
 0x58b   :  { %2059 = vmatpush.bf16.msra.mxu0 %v4215_v63  ;;  %2072 = vmatpush.bf16.msra.mxu1 %v4217_v4 }
 0x58c   :  { %2085 = vmatpush.bf16.msra.mxu2 %v4211_v48  ;;  %2098 = vmatpush.bf16.msra.mxu3 %v4220_v35 }
 0x58f   :  { %2060 = vmatpush.bf16.msra.mxu0 %v4227_v12  ;;  %2073 = vmatpush.bf16.msra.mxu1 %v4229_v6 }
 0x590   :  { %2086 = vmatpush.bf16.msra.mxu2 %v4223_v57  ;;  %2099 = vmatpush.bf16.msra.mxu3 %v4233_v56 }
 0x593   :  { %2061 = vmatpush.bf16.msra.mxu0 %v4240_v16  ;;  %2074 = vmatpush.bf16.msra.mxu1 %v4242_v7 }
 0x594   :  { %2087 = vmatpush.bf16.msra.mxu2 %v4236_v52  ;;  %2100 = vmatpush.bf16.msra.mxu3 %v4245_v21 }
 0x5e2   :  { %v4358_v22 = vpop.f32.mrf.mxu0  ;;  %v4360_v26 = vpop.f32.mrf.mxu1 }
 0x5e3   :  { %4721 = vst [vmem:[#allocation27_spill] sm:$0xff] %v4358_v22  ;;  %v1600_v22 = vadd.f32 %v1599_v36, %v4373_v55 }
 0x5e4   :  { %4722 = vst [vmem:[#allocation28_spill] sm:$0xff] %v4360_v26  ;;  %v1629_v26 = vadd.f32 %v1628_v10, %v4375_v9 }
 0x5e9   :  { %v4362_v32 = vpop.f32.mrf.mxu2  ;;  %v4364_v33 = vpop.f32.mrf.mxu3 }
 0x5ea   :  { %4723 = vst [vmem:[#allocation29_spill] sm:$0xff] %v4362_v32  ;;  %v4369_v38 = vpop.f32.mrf.mxu0  ;;  %v4371_v42 = vpop.f32.mrf.mxu1 }
 0x5eb   :  { %4724 = vst [vmem:[#allocation31_spill] sm:$0xff] %v4364_v33 }
 0x5ec   :  { %4725 = vst [vmem:[#allocation30_spill] sm:$0xff] %v4369_v38  ;;  %v4385_v38 = vperm.slane %v1385_v34, 3 }
 0x5ed   :  { %4726 = vst [vmem:[#allocation32_spill] sm:$0xff] %v4371_v42  ;;  %v1658_v42 = vadd.f32 %v1657_v17, %v4383_v47 }
 0x5ee   :  { %v1687_v36 = vadd.f32 %v1686_v54, %v4385_v38 }
 0x5f1   :  { %v4379_v13 = vpop.f32.mrf.mxu2  ;;  %v4381_v32 = vpop.f32.mrf.mxu3 }
 0x5f2   :  { %4727 = vst [vmem:[#allocation33_spill] sm:$0xff] %v4379_v13  ;;  %v1911_v33 = vpop.f32.mrf.mxu0  ;;  %v1924_v1 = vpop.f32.mrf.mxu1 }
 0x5f3   :  { %4728 = vst [vmem:[#allocation34_spill] sm:$0xff] %v4381_v32  ;;  %v1954_v51 = vadd.f32 %v1911_v33, %v1600_v22  ;;  %v1955_v49 = vadd.f32 %v1924_v1, %v1629_v26 }
 0x5f5   :  { %3410 = vtanh.f32 %v1954_v51 }
 0x5f6   :  { %3412 = vtanh.f32 %v1955_v49 }
 0x5f9   :  { %v1937_v41 = vpop.f32.mrf.mxu2  ;;  %v1950_v10 = vpop.f32.mrf.mxu3 }
 0x5fa   :  { %v1956_v44 = vadd.f32 %v1937_v41, %v1658_v42  ;;  %v1913_v13 = vpop.f32.mrf.mxu0  ;;  %v1926_v0 = vpop.f32.mrf.mxu1  ;;  %v1957_v40 = vadd.f32 %v1950_v10, %v1687_v36 }
 0x5fb   :  { %v3411_v32 = vpop.eup %3410 }
 0x5fc   :  { %v3413_v18 = vpop.eup %3412  ;;  %3414 = vtanh.f32 %v1956_v44  ;;  %v1962_v1 = vmul.f32 0.5, %v3411_v32 }
 0x5fd   :  { %v1964_v22 = vmul.f32 0.5, %v3413_v18  ;;  %3416 = vtanh.f32 %v1957_v40  ;;  %v1631_v18 = vadd.f32 %v4320_v39, %v4375_v9 }
 0x5fe   :  { %v1963_v33 = vadd.f32 0.5, %v1962_v1  ;;  %v1660_v1 = vadd.f32 %v4322_v2, %v4383_v47 }
 0x5ff   :  { %v1965_v26 = vadd.f32 0.5, %v1964_v22  ;;  %v1689_v22 = vadd.f32 %v4324_v23, %v4385_v38 }
 0x601   :  { %v1939_v51 = vpop.f32.mrf.mxu2  ;;  %v1952_v49 = vpop.f32.mrf.mxu3  ;;  %v1968_v17 = vmul.f32 0.0, %v1965_v26 }
 0x602   :  { %v3415_v34 = vpop.eup %3414 }
 0x603   :  { %v1969_v25 = vmul.f32 %v3415_v34, %v1963_v33  ;;  %v3417_v54 = vpop.eup %3416 }
 0x604   :  { %v1966_v0 = vmul.f32 0.5, %v3417_v54 }
 0x605   :  { %v4389_v28 = vadd.f32 %v1969_v25, %v1968_v17  ;;  %v1602_v25 = vadd.f32 %v4318_v45, %v4373_v55 }
 0x606   :  { %v1967_v41 = vadd.f32 0.5, %v1966_v0 }
 0x607   :  { %3418 = vtanh.f32 %v4389_v28 }
 0x60d   :  { %v3419_v13 = vpop.eup %3418 }
 0x60e   :  { %v1972_v42 = vmul.f32 %v3419_v13, %v1967_v41 }
 0x610   :  { %v1973_v44 = vpack.c.bf16 %v1972_v42, %v1972_v42 }
 0x612   :  { %1986 = vmatmul.bf16.vlgmr.msrb.gmra.mxu0 %v1973_v44  ;;  %1999 = vmatmul.bf16.vlgmr.msrb.gmra.mxu1 %v1973_v44 }
 0x613   :  { %2012 = vmatmul.bf16.vlgmr.msrb.gmra.mxu2 %v1973_v44  ;;  %2025 = vmatmul.bf16.vlgmr.msrb.gmra.mxu3 %v1973_v44 }
 0x614   :  { %2130 = vmatpush.bf16.msrb.mxu0 %v4148_v29  ;;  %2143 = vmatpush.bf16.msrb.mxu1 %v4150_v27 }
 0x615   :  { %2156 = vmatpush.bf16.msrb.mxu2 %v4146_v30  ;;  %2169 = vmatpush.bf16.msrb.mxu3 %v4155_v37 }
 0x618   :  { %2131 = vmatpush.bf16.msrb.mxu0 %v4159_v53  ;;  %2144 = vmatpush.bf16.msrb.mxu1 %v4162_v61 }
 0x619   :  { %2157 = vmatpush.bf16.msrb.mxu2 %v4157_v50  ;;  %2170 = vmatpush.bf16.msrb.mxu3 %v4167_v8 }
 0x61c   :  { %2132 = vmatpush.bf16.msrb.mxu0 %v4176_v3  ;;  %2145 = vmatpush.bf16.msrb.mxu1 %v4178_v31 }
 0x61d   :  { %2158 = vmatpush.bf16.msrb.mxu2 %v4174_v46  ;;  %2171 = vmatpush.bf16.msrb.mxu3 %v4181_v15 }
 0x620   :  { %2133 = vmatpush.bf16.msrb.mxu0 %v4187_v58  ;;  %2146 = vmatpush.bf16.msrb.mxu1 %v4190_v19 }
 0x621   :  { %2159 = vmatpush.bf16.msrb.mxu2 %v4185_v43  ;;  %2172 = vmatpush.bf16.msrb.mxu3 %v4194_v14 }
 0x624   :  { %2134 = vmatpush.bf16.msrb.mxu0 %v4203_v59  ;;  %2147 = vmatpush.bf16.msrb.mxu1 %v4205_v60 }
 0x625   :  { %2160 = vmatpush.bf16.msrb.mxu2 %v4199_v5  ;;  %2173 = vmatpush.bf16.msrb.mxu3 %v4208_v20 }
 0x628   :  { %2135 = vmatpush.bf16.msrb.mxu0 %v4215_v63  ;;  %2148 = vmatpush.bf16.msrb.mxu1 %v4217_v4 }
 0x629   :  { %2161 = vmatpush.bf16.msrb.mxu2 %v4211_v48  ;;  %2174 = vmatpush.bf16.msrb.mxu3 %v4220_v35 }
 0x62c   :  { %2136 = vmatpush.bf16.msrb.mxu0 %v4227_v12  ;;  %2149 = vmatpush.bf16.msrb.mxu1 %v4229_v6 }
 0x62d   :  { %2162 = vmatpush.bf16.msrb.mxu2 %v4223_v57  ;;  %2175 = vmatpush.bf16.msrb.mxu3 %v4233_v56 }
 0x630   :  { %2137 = vmatpush.bf16.msrb.mxu0 %v4240_v16  ;;  %2150 = vmatpush.bf16.msrb.mxu1 %v4242_v7 }
 0x631   :  { %2163 = vmatpush.bf16.msrb.mxu2 %v4236_v52  ;;  %2176 = vmatpush.bf16.msrb.mxu3 %v4245_v21 }
 0x68f   :  { %v1987_v40 = vpop.f32.mrf.mxu0  ;;  %v2000_v32 = vpop.f32.mrf.mxu1 }
 0x690   :  { %v2030_v36 = vadd.f32 %v1987_v40, %v1602_v25  ;;  %v2031_v10 = vadd.f32 %v2000_v32, %v1631_v18 }
 0x692   :  { %3420 = vtanh.f32 %v2030_v36 }
 0x693   :  { %3422 = vtanh.f32 %v2031_v10 }
 0x696   :  { %v2013_v26 = vpop.f32.mrf.mxu2  ;;  %v2026_v33 = vpop.f32.mrf.mxu3 }
 0x697   :  { %v2032_v51 = vadd.f32 %v2013_v26, %v1660_v1  ;;  %v1989_v49 = vpop.f32.mrf.mxu0  ;;  %v2002_v45 = vpop.f32.mrf.mxu1  ;;  %v2033_v17 = vadd.f32 %v2026_v33, %v1689_v22  ;;  %v1634_v26 = vadd.f32 %v4328_v62, %v4375_v9 }
 0x698   :  { %v3421_v34 = vpop.eup %3420 }
 0x699   :  { %v3423_v39 = vpop.eup %3422  ;;  %3424 = vtanh.f32 %v2032_v51  ;;  %v2038_v54 = vmul.f32 0.5, %v3421_v34  ;;  %v1663_v34 = vadd.f32 %v4330_v11, %v4383_v47 }
 0x69a   :  { %v2040_v0 = vmul.f32 0.5, %v3423_v39  ;;  %3426 = vtanh.f32 %v2033_v17  ;;  %v4729_v17 = vld [vmem:[#allocation15_spill] sm:$0xff] }
 0x69b   :  { %v2039_v13 = vadd.f32 0.5, %v2038_v54  ;;  %v1692_v39 = vadd.f32 %v4729_v17, %v4385_v38  ;;  %v4731_v17 = vld [vmem:[#allocation16_spill] sm:$0xff] }
 0x69c   :  { %v2041_v41 = vadd.f32 0.5, %v2040_v0 }
 0x69e   :  { %v2015_v42 = vpop.f32.mrf.mxu2  ;;  %v2028_v44 = vpop.f32.mrf.mxu3  ;;  %v2044_v25 = vmul.f32 %v2041_v41, %v4389_v28  ;;  %v1605_v28 = vadd.f32 %v4326_v24, %v4373_v55 }
 0x69f   :  { %v3425_v2 = vpop.eup %3424 }
 0x6a0   :  { %v2045_v23 = vmul.f32 %v3425_v2, %v2039_v13  ;;  %v3427_v18 = vpop.eup %3426 }
 0x6a1   :  { %v2042_v32 = vmul.f32 0.5, %v3427_v18 }
 0x6a2   :  { %v4433_v40 = vadd.f32 %v2045_v23, %v2044_v25 }
 0x6a3   :  { %v2043_v36 = vadd.f32 0.5, %v2042_v32 }
 0x6a4   :  { %3428 = vtanh.f32 %v4433_v40 }
 0x6aa   :  { %v3429_v10 = vpop.eup %3428 }
 0x6ab   :  { %v2048_v1 = vmul.f32 %v3429_v10, %v2043_v36 }
 0x6ad   :  { %v2049_v22 = vpack.c.bf16 %v2048_v1, %v2048_v1 }
 0x6af   :  { %2062 = vmatmul.bf16.vlgmr.msra.gmra.mxu0 %v2049_v22  ;;  %2075 = vmatmul.bf16.vlgmr.msra.gmra.mxu1 %v2049_v22 }
 0x6b0   :  { %2088 = vmatmul.bf16.vlgmr.msra.gmra.mxu2 %v2049_v22  ;;  %2101 = vmatmul.bf16.vlgmr.msra.gmra.mxu3 %v2049_v22 }
 0x6b1   :  { %2206 = vmatpush.bf16.msra.mxu0 %v4148_v29  ;;  %2219 = vmatpush.bf16.msra.mxu1 %v4150_v27 }
 0x6b2   :  { %2232 = vmatpush.bf16.msra.mxu2 %v4146_v30  ;;  %2245 = vmatpush.bf16.msra.mxu3 %v4155_v37 }
 0x6b5   :  { %2207 = vmatpush.bf16.msra.mxu0 %v4159_v53  ;;  %2220 = vmatpush.bf16.msra.mxu1 %v4162_v61 }
 0x6b6   :  { %2233 = vmatpush.bf16.msra.mxu2 %v4157_v50  ;;  %2246 = vmatpush.bf16.msra.mxu3 %v4167_v8 }
 0x6b9   :  { %2208 = vmatpush.bf16.msra.mxu0 %v4176_v3  ;;  %2221 = vmatpush.bf16.msra.mxu1 %v4178_v31 }
 0x6ba   :  { %2234 = vmatpush.bf16.msra.mxu2 %v4174_v46  ;;  %2247 = vmatpush.bf16.msra.mxu3 %v4181_v15 }
 0x6bd   :  { %2209 = vmatpush.bf16.msra.mxu0 %v4187_v58  ;;  %2222 = vmatpush.bf16.msra.mxu1 %v4190_v19 }
 0x6be   :  { %2235 = vmatpush.bf16.msra.mxu2 %v4185_v43  ;;  %2248 = vmatpush.bf16.msra.mxu3 %v4194_v14 }
 0x6c1   :  { %2210 = vmatpush.bf16.msra.mxu0 %v4203_v59  ;;  %2223 = vmatpush.bf16.msra.mxu1 %v4205_v60 }
 0x6c2   :  { %2236 = vmatpush.bf16.msra.mxu2 %v4199_v5  ;;  %2249 = vmatpush.bf16.msra.mxu3 %v4208_v20 }
 0x6c5   :  { %2211 = vmatpush.bf16.msra.mxu0 %v4215_v63  ;;  %2224 = vmatpush.bf16.msra.mxu1 %v4217_v4 }
 0x6c6   :  { %2237 = vmatpush.bf16.msra.mxu2 %v4211_v48  ;;  %2250 = vmatpush.bf16.msra.mxu3 %v4220_v35 }
 0x6c9   :  { %2212 = vmatpush.bf16.msra.mxu0 %v4227_v12  ;;  %2225 = vmatpush.bf16.msra.mxu1 %v4229_v6 }
 0x6ca   :  { %2238 = vmatpush.bf16.msra.mxu2 %v4223_v57  ;;  %2251 = vmatpush.bf16.msra.mxu3 %v4233_v56 }
 0x6cd   :  { %2213 = vmatpush.bf16.msra.mxu0 %v4240_v16  ;;  %2226 = vmatpush.bf16.msra.mxu1 %v4242_v7 }
 0x6ce   :  { %2239 = vmatpush.bf16.msra.mxu2 %v4236_v52  ;;  %2252 = vmatpush.bf16.msra.mxu3 %v4245_v21 }
 0x72c   :  { %v2063_v33 = vpop.f32.mrf.mxu0  ;;  %v2076_v51 = vpop.f32.mrf.mxu1 }
 0x72d   :  { %v2106_v49 = vadd.f32 %v2063_v33, %v1605_v28  ;;  %v2107_v45 = vadd.f32 %v2076_v51, %v1634_v26 }
 0x72f   :  { %3430 = vtanh.f32 %v2106_v49 }
 0x730   :  { %3432 = vtanh.f32 %v2107_v45 }
 0x733   :  { %v2089_v54 = vpop.f32.mrf.mxu2  ;;  %v2102_v0 = vpop.f32.mrf.mxu3 }
 0x734   :  { %v2108_v41 = vadd.f32 %v2089_v54, %v1663_v34  ;;  %v2065_v13 = vpop.f32.mrf.mxu0  ;;  %v2078_v24 = vpop.f32.mrf.mxu1  ;;  %v2109_v44 = vadd.f32 %v2102_v0, %v1692_v39  ;;  %v1636_v39 = vadd.f32 %v4731_v17, %v4375_v9 }
 0x735   :  { %v3431_v42 = vpop.eup %3430  ;;  %v4732_v24 = vld [vmem:[#allocation17_spill] sm:$0xff] }
 0x736   :  { %v3433_v62 = vpop.eup %3432  ;;  %3434 = vtanh.f32 %v2108_v41  ;;  %v2114_v2 = vmul.f32 0.5, %v3431_v42  ;;  %v1665_v42 = vadd.f32 %v4732_v24, %v4383_v47 }
 0x737   :  { %v2116_v25 = vmul.f32 0.5, %v3433_v62  ;;  %3436 = vtanh.f32 %v2109_v44  ;;  %v4733_v44 = vld [vmem:[#allocation18_spill] sm:$0xff] }
 0x738   :  { %v2115_v18 = vadd.f32 0.5, %v2114_v2  ;;  %v1694_v62 = vadd.f32 %v4733_v44, %v4385_v38  ;;  %v4735_v44 = vld [vmem:[#allocation20_spill] sm:$0xff] }
 0x739   :  { %v2117_v23 = vadd.f32 0.5, %v2116_v25 }
 0x73b   :  { %v2091_v32 = vpop.f32.mrf.mxu2  ;;  %v2104_v36 = vpop.f32.mrf.mxu3  ;;  %v2120_v10 = vmul.f32 %v2117_v23, %v4433_v40  ;;  %v4730_v40 = vld [vmem:[#allocation14_spill] sm:$0xff] }
 0x73c   :  { %v3435_v11 = vpop.eup %3434  ;;  %v1607_v34 = vadd.f32 %v4730_v40, %v4373_v55 }
 0x73d   :  { %v2121_v1 = vmul.f32 %v3435_v11, %v2115_v18  ;;  %v3437_v22 = vpop.eup %3436 }
 0x73e   :  { %v2118_v26 = vmul.f32 0.5, %v3437_v22 }
 0x73f   :  { %v4477_v28 = vadd.f32 %v2121_v1, %v2120_v10 }
 0x740   :  { %v2119_v33 = vadd.f32 0.5, %v2118_v26 }
 0x741   :  { %3438 = vtanh.f32 %v4477_v28 }
 0x747   :  { %v3439_v51 = vpop.eup %3438 }
 0x748   :  { %v2124_v49 = vmul.f32 %v3439_v51, %v2119_v33 }
 0x74a   :  { %v2125_v45 = vpack.c.bf16 %v2124_v49, %v2124_v49 }
 0x74c   :  { %2138 = vmatmul.bf16.vlgmr.msrb.gmra.mxu0 %v2125_v45  ;;  %2151 = vmatmul.bf16.vlgmr.msrb.gmra.mxu1 %v2125_v45 }
 0x74d   :  { %2164 = vmatmul.bf16.vlgmr.msrb.gmra.mxu2 %v2125_v45  ;;  %2177 = vmatmul.bf16.vlgmr.msrb.gmra.mxu3 %v2125_v45 }
 0x74e   :  { %2282 = vmatpush.bf16.msrb.mxu0 %v4148_v29  ;;  %2295 = vmatpush.bf16.msrb.mxu1 %v4150_v27 }
 0x74f   :  { %2308 = vmatpush.bf16.msrb.mxu2 %v4146_v30  ;;  %2321 = vmatpush.bf16.msrb.mxu3 %v4155_v37 }
 0x752   :  { %2283 = vmatpush.bf16.msrb.mxu0 %v4159_v53  ;;  %2296 = vmatpush.bf16.msrb.mxu1 %v4162_v61 }
 0x753   :  { %2309 = vmatpush.bf16.msrb.mxu2 %v4157_v50  ;;  %2322 = vmatpush.bf16.msrb.mxu3 %v4167_v8 }
 0x756   :  { %2284 = vmatpush.bf16.msrb.mxu0 %v4176_v3  ;;  %2297 = vmatpush.bf16.msrb.mxu1 %v4178_v31 }
 0x757   :  { %2310 = vmatpush.bf16.msrb.mxu2 %v4174_v46  ;;  %2323 = vmatpush.bf16.msrb.mxu3 %v4181_v15 }
 0x75a   :  { %2285 = vmatpush.bf16.msrb.mxu0 %v4187_v58  ;;  %2298 = vmatpush.bf16.msrb.mxu1 %v4190_v19 }
 0x75b   :  { %2311 = vmatpush.bf16.msrb.mxu2 %v4185_v43  ;;  %2324 = vmatpush.bf16.msrb.mxu3 %v4194_v14 }
 0x75e   :  { %2286 = vmatpush.bf16.msrb.mxu0 %v4203_v59  ;;  %2299 = vmatpush.bf16.msrb.mxu1 %v4205_v60 }
 0x75f   :  { %2312 = vmatpush.bf16.msrb.mxu2 %v4199_v5  ;;  %2325 = vmatpush.bf16.msrb.mxu3 %v4208_v20 }
 0x762   :  { %2287 = vmatpush.bf16.msrb.mxu0 %v4215_v63  ;;  %2300 = vmatpush.bf16.msrb.mxu1 %v4217_v4 }
 0x763   :  { %2313 = vmatpush.bf16.msrb.mxu2 %v4211_v48  ;;  %2326 = vmatpush.bf16.msrb.mxu3 %v4220_v35 }
 0x766   :  { %2288 = vmatpush.bf16.msrb.mxu0 %v4227_v12  ;;  %2301 = vmatpush.bf16.msrb.mxu1 %v4229_v6 }
 0x767   :  { %2314 = vmatpush.bf16.msrb.mxu2 %v4223_v57  ;;  %2327 = vmatpush.bf16.msrb.mxu3 %v4233_v56 }
 0x76a   :  { %2289 = vmatpush.bf16.msrb.mxu0 %v4240_v16  ;;  %2302 = vmatpush.bf16.msrb.mxu1 %v4242_v7 }
 0x76b   :  { %2315 = vmatpush.bf16.msrb.mxu2 %v4236_v52  ;;  %2328 = vmatpush.bf16.msrb.mxu3 %v4245_v21 }
 0x7c9   :  { %v2139_v54 = vpop.f32.mrf.mxu0  ;;  %v2152_v0 = vpop.f32.mrf.mxu1 }
 0x7ca   :  { %v2182_v41 = vadd.f32 %v2139_v54, %v1607_v34  ;;  %v2183_v13 = vadd.f32 %v2152_v0, %v1636_v39 }
 0x7cc   :  { %3440 = vtanh.f32 %v2182_v41 }
 0x7cd   :  { %3442 = vtanh.f32 %v2183_v13 }
 0x7d0   :  { %v2165_v2 = vpop.f32.mrf.mxu2  ;;  %v2178_v25 = vpop.f32.mrf.mxu3 }
 0x7d1   :  { %v2184_v23 = vadd.f32 %v2165_v2, %v1665_v42  ;;  %v2141_v18 = vpop.f32.mrf.mxu0  ;;  %v2154_v32 = vpop.f32.mrf.mxu1  ;;  %v2185_v11 = vadd.f32 %v2178_v25, %v1694_v62  ;;  %v1639_v62 = vadd.f32 %v4735_v44, %v4375_v9 }
 0x7d2   :  { %v3441_v36 = vpop.eup %3440  ;;  %v4736_v32 = vld [vmem:[#allocation21_spill] sm:$0xff] }
 0x7d3   :  { %v3443_v10 = vpop.eup %3442  ;;  %3444 = vtanh.f32 %v2184_v23  ;;  %v2190_v1 = vmul.f32 0.5, %v3441_v36  ;;  %v1668_v36 = vadd.f32 %v4736_v32, %v4383_v47 }
 0x7d4   :  { %v2192_v22 = vmul.f32 0.5, %v3443_v10  ;;  %3446 = vtanh.f32 %v2185_v11  ;;  %v4737_v11 = vld [vmem:[#allocation23_spill] sm:$0xff] }
 0x7d5   :  { %v2191_v33 = vadd.f32 0.5, %v2190_v1  ;;  %v1697_v10 = vadd.f32 %v4737_v11, %v4385_v38 }
 0x7d6   :  { %v2193_v26 = vadd.f32 0.5, %v2192_v22 }
 0x7d8   :  { %v2167_v51 = vpop.f32.mrf.mxu2  ;;  %v2180_v49 = vpop.f32.mrf.mxu3  ;;  %v2196_v40 = vmul.f32 %v2193_v26, %v4477_v28  ;;  %v4734_v28 = vld [vmem:[#allocation19_spill] sm:$0xff] }
 0x7d9   :  { %v3445_v45 = vpop.eup %3444  ;;  %v1610_v42 = vadd.f32 %v4734_v28, %v4373_v55 }
 0x7da   :  { %v2197_v34 = vmul.f32 %v3445_v45, %v2191_v33  ;;  %v3447_v17 = vpop.eup %3446 }
 0x7db   :  { %v2194_v54 = vmul.f32 0.5, %v3447_v17 }
 0x7dc   :  { %v4521_v39 = vadd.f32 %v2197_v34, %v2196_v40 }
 0x7dd   :  { %v2195_v0 = vadd.f32 0.5, %v2194_v54 }
 0x7de   :  { %3448 = vtanh.f32 %v4521_v39 }
 0x7e4   :  { %v3449_v41 = vpop.eup %3448 }
 0x7e5   :  { %v2200_v13 = vmul.f32 %v3449_v41, %v2195_v0 }
 0x7e7   :  { %v2201_v24 = vpack.c.bf16 %v2200_v13, %v2200_v13 }
 0x7e9   :  { %2214 = vmatmul.bf16.vlgmr.msra.gmra.mxu0 %v2201_v24  ;;  %2227 = vmatmul.bf16.vlgmr.msra.gmra.mxu1 %v2201_v24 }
 0x7ea   :  { %2240 = vmatmul.bf16.vlgmr.msra.gmra.mxu2 %v2201_v24  ;;  %2253 = vmatmul.bf16.vlgmr.msra.gmra.mxu3 %v2201_v24 }
 0x7eb   :  { %2358 = vmatpush.bf16.msra.mxu0 %v4148_v29  ;;  %2371 = vmatpush.bf16.msra.mxu1 %v4150_v27 }
 0x7ec   :  { %2384 = vmatpush.bf16.msra.mxu2 %v4146_v30  ;;  %2397 = vmatpush.bf16.msra.mxu3 %v4155_v37 }
 0x7ef   :  { %2359 = vmatpush.bf16.msra.mxu0 %v4159_v53  ;;  %2372 = vmatpush.bf16.msra.mxu1 %v4162_v61 }
 0x7f0   :  { %2385 = vmatpush.bf16.msra.mxu2 %v4157_v50  ;;  %2398 = vmatpush.bf16.msra.mxu3 %v4167_v8 }
 0x7f3   :  { %2360 = vmatpush.bf16.msra.mxu0 %v4176_v3  ;;  %2373 = vmatpush.bf16.msra.mxu1 %v4178_v31 }
 0x7f4   :  { %2386 = vmatpush.bf16.msra.mxu2 %v4174_v46  ;;  %2399 = vmatpush.bf16.msra.mxu3 %v4181_v15 }
 0x7f7   :  { %2361 = vmatpush.bf16.msra.mxu0 %v4187_v58  ;;  %2374 = vmatpush.bf16.msra.mxu1 %v4190_v19 }
 0x7f8   :  { %2387 = vmatpush.bf16.msra.mxu2 %v4185_v43  ;;  %2400 = vmatpush.bf16.msra.mxu3 %v4194_v14 }
 0x7fb   :  { %2362 = vmatpush.bf16.msra.mxu0 %v4203_v59  ;;  %2375 = vmatpush.bf16.msra.mxu1 %v4205_v60 }
 0x7fc   :  { %2388 = vmatpush.bf16.msra.mxu2 %v4199_v5  ;;  %2401 = vmatpush.bf16.msra.mxu3 %v4208_v20 }
 0x7ff   :  { %2363 = vmatpush.bf16.msra.mxu0 %v4215_v63  ;;  %2376 = vmatpush.bf16.msra.mxu1 %v4217_v4 }
 0x800   :  { %2389 = vmatpush.bf16.msra.mxu2 %v4211_v48  ;;  %2402 = vmatpush.bf16.msra.mxu3 %v4220_v35 }
 0x803   :  { %2364 = vmatpush.bf16.msra.mxu0 %v4227_v12  ;;  %2377 = vmatpush.bf16.msra.mxu1 %v4229_v6 }
 0x804   :  { %2390 = vmatpush.bf16.msra.mxu2 %v4223_v57  ;;  %2403 = vmatpush.bf16.msra.mxu3 %v4233_v56 }
 0x807   :  { %2365 = vmatpush.bf16.msra.mxu0 %v4240_v16  ;;  %2378 = vmatpush.bf16.msra.mxu1 %v4242_v7 }
 0x808   :  { %2391 = vmatpush.bf16.msra.mxu2 %v4236_v52  ;;  %2404 = vmatpush.bf16.msra.mxu3 %v4245_v21 }
 0x866   :  { %v2215_v2 = vpop.f32.mrf.mxu0  ;;  %v2228_v25 = vpop.f32.mrf.mxu1 }
 0x867   :  { %v2258_v23 = vadd.f32 %v2215_v2, %v1610_v42  ;;  %v2259_v18 = vadd.f32 %v2228_v25, %v1639_v62 }
 0x869   :  { %3450 = vtanh.f32 %v2258_v23 }
 0x86a   :  { %3452 = vtanh.f32 %v2259_v18 }
 0x86d   :  { %v2241_v1 = vpop.f32.mrf.mxu2  ;;  %v2254_v22 = vpop.f32.mrf.mxu3 }
 0x86e   :  { %v2260_v26 = vadd.f32 %v2241_v1, %v1668_v36  ;;  %v2217_v33 = vpop.f32.mrf.mxu0  ;;  %v2230_v51 = vpop.f32.mrf.mxu1  ;;  %v2261_v45 = vadd.f32 %v2254_v22, %v1697_v10  ;;  %v4742_v1 = vld [vmem:[#allocation27_spill] sm:$0xff] }
 0x86f   :  { %v3451_v49 = vpop.eup %3450  ;;  %v1615_v22 = vadd.f32 %v4742_v1, %v4373_v55 }
 0x870   :  { %v3453_v40 = vpop.eup %3452  ;;  %3454 = vtanh.f32 %v2260_v26  ;;  %v2266_v34 = vmul.f32 0.5, %v3451_v49  ;;  %v4743_v26 = vld [vmem:[#allocation28_spill] sm:$0xff] }
 0x871   :  { %v2268_v17 = vmul.f32 0.5, %v3453_v40  ;;  %3456 = vtanh.f32 %v2261_v45  ;;  %v1644_v33 = vadd.f32 %v4743_v26, %v4375_v9 }
 0x872   :  { %v2267_v0 = vadd.f32 0.5, %v2266_v34  ;;  %v4744_v34 = vld [vmem:[#allocation29_spill] sm:$0xff] }
 0x873   :  { %v2269_v54 = vadd.f32 0.5, %v2268_v17  ;;  %v1673_v17 = vadd.f32 %v4744_v34, %v4383_v47 }
 0x875   :  { %v2243_v41 = vpop.f32.mrf.mxu2  ;;  %v2256_v13 = vpop.f32.mrf.mxu3  ;;  %v2272_v28 = vmul.f32 %v2269_v54, %v4521_v39  ;;  %v4745_v54 = vld [vmem:[#allocation31_spill] sm:$0xff] }
 0x876   :  { %v3455_v24 = vpop.eup %3454 }
 0x877   :  { %v2273_v42 = vmul.f32 %v3455_v24, %v2267_v0  ;;  %v3457_v44 = vpop.eup %3456  ;;  %v1702_v0 = vadd.f32 %v4745_v54, %v4385_v38 }
 0x878   :  { %v2270_v2 = vmul.f32 0.5, %v3457_v44 }
 0x879   :  { %v4565_v62 = vadd.f32 %v2273_v42, %v2272_v28 }
 0x87a   :  { %v2271_v25 = vadd.f32 0.5, %v2270_v2 }
 0x87b   :  { %3458 = vtanh.f32 %v4565_v62 }
 0x881   :  { %v3459_v23 = vpop.eup %3458 }
 0x882   :  { %v2276_v18 = vmul.f32 %v3459_v23, %v2271_v25 }
 0x884   :  { %v2277_v32 = vpack.c.bf16 %v2276_v18, %v2276_v18 }
 0x886   :  { %2290 = vmatmul.bf16.vlgmr.msrb.gmra.mxu0 %v2277_v32  ;;  %2303 = vmatmul.bf16.vlgmr.msrb.gmra.mxu1 %v2277_v32 }
 0x887   :  { %2316 = vmatmul.bf16.vlgmr.msrb.gmra.mxu2 %v2277_v32  ;;  %2329 = vmatmul.bf16.vlgmr.msrb.gmra.mxu3 %v2277_v32 }
 0x888   :  { %2434 = vmatpush.bf16.msrb.mxu0 %v4148_v29  ;;  %2447 = vmatpush.bf16.msrb.mxu1 %v4150_v27  ;;  %v4739_v27 = vld [vmem:[#allocation24_spill] sm:$0xff] }
 0x889   :  { %2460 = vmatpush.bf16.msrb.mxu2 %v4146_v30  ;;  %2473 = vmatpush.bf16.msrb.mxu3 %v4155_v37  ;;  %v4738_v30 = vld [vmem:[#allocation22_spill] sm:$0xff]  ;;  %v1641_v37 = vadd.f32 %v4739_v27, %v4375_v9 }
 0x88a   :  { %v1612_v29 = vadd.f32 %v4738_v30, %v4373_v55 }
 0x88c   :  { %2435 = vmatpush.bf16.msrb.mxu0 %v4159_v53  ;;  %2448 = vmatpush.bf16.msrb.mxu1 %v4162_v61 }
 0x88d   :  { %2461 = vmatpush.bf16.msrb.mxu2 %v4157_v50  ;;  %2474 = vmatpush.bf16.msrb.mxu3 %v4167_v8 }
 0x890   :  { %2436 = vmatpush.bf16.msrb.mxu0 %v4176_v3  ;;  %2449 = vmatpush.bf16.msrb.mxu1 %v4178_v31  ;;  %v4741_v31 = vld [vmem:[#allocation26_spill] sm:$0xff] }
 0x891   :  { %2462 = vmatpush.bf16.msrb.mxu2 %v4174_v46  ;;  %2475 = vmatpush.bf16.msrb.mxu3 %v4181_v15  ;;  %v4740_v46 = vld [vmem:[#allocation25_spill] sm:$0xff]  ;;  %v1699_v15 = vadd.f32 %v4741_v31, %v4385_v38 }
 0x892   :  { %v1670_v3 = vadd.f32 %v4740_v46, %v4383_v47 }
 0x894   :  { %2437 = vmatpush.bf16.msrb.mxu0 %v4187_v58  ;;  %2450 = vmatpush.bf16.msrb.mxu1 %v4190_v19 }
 0x895   :  { %2463 = vmatpush.bf16.msrb.mxu2 %v4185_v43  ;;  %2476 = vmatpush.bf16.msrb.mxu3 %v4194_v14 }
 0x898   :  { %2438 = vmatpush.bf16.msrb.mxu0 %v4203_v59  ;;  %2451 = vmatpush.bf16.msrb.mxu1 %v4205_v60 }
 0x899   :  { %2464 = vmatpush.bf16.msrb.mxu2 %v4199_v5  ;;  %2477 = vmatpush.bf16.msrb.mxu3 %v4208_v20 }
 0x89c   :  { %2439 = vmatpush.bf16.msrb.mxu0 %v4215_v63  ;;  %2452 = vmatpush.bf16.msrb.mxu1 %v4217_v4 }
 0x89d   :  { %2465 = vmatpush.bf16.msrb.mxu2 %v4211_v48  ;;  %2478 = vmatpush.bf16.msrb.mxu3 %v4220_v35 }
 0x8a0   :  { %2440 = vmatpush.bf16.msrb.mxu0 %v4227_v12  ;;  %2453 = vmatpush.bf16.msrb.mxu1 %v4229_v6 }
 0x8a1   :  { %2466 = vmatpush.bf16.msrb.mxu2 %v4223_v57  ;;  %2479 = vmatpush.bf16.msrb.mxu3 %v4233_v56 }
 0x8a4   :  { %2441 = vmatpush.bf16.msrb.mxu0 %v4240_v16  ;;  %2454 = vmatpush.bf16.msrb.mxu1 %v4242_v7 }
 0x8a5   :  { %2467 = vmatpush.bf16.msrb.mxu2 %v4236_v52  ;;  %2480 = vmatpush.bf16.msrb.mxu3 %v4245_v21 }
 0x903   :  { %v2291_v50 = vpop.f32.mrf.mxu0  ;;  %v2304_v53 = vpop.f32.mrf.mxu1 }
 0x904   :  { %v2334_v61 = vadd.f32 %v2291_v50, %v1612_v29  ;;  %v2335_v8 = vadd.f32 %v2304_v53, %v1641_v37 }
 0x906   :  { %3460 = vtanh.f32 %v2334_v61 }
 0x907   :  { %3462 = vtanh.f32 %v2335_v8 }
 0x90a   :  { %v2317_v43 = vpop.f32.mrf.mxu2  ;;  %v2330_v58 = vpop.f32.mrf.mxu3 }
 0x90b   :  { %v2336_v19 = vadd.f32 %v2317_v43, %v1670_v3  ;;  %v2293_v14 = vpop.f32.mrf.mxu0  ;;  %v2306_v5 = vpop.f32.mrf.mxu1  ;;  %v2337_v60 = vadd.f32 %v2330_v58, %v1699_v15  ;;  %v3322_v43 = vld [vmem:[%s4663_s8 + $0x38] sm:$0xff]  ;;  %v3321_v58 = vld [vmem:[%s4663_s8 + $0x30] sm:$0xff] }
 0x90c   :  { %v3461_v59 = vpop.eup %3460  ;;  %v3319_v14 = vld [vmem:[%s4663_s8 + $0x20] sm:$0xff]  ;;  %v3318_v5 = vld [vmem:[%s4663_s8 + $0x18] sm:$0xff] }
 0x90d   :  { %v3463_v20 = vpop.eup %3462  ;;  %3464 = vtanh.f32 %v2336_v19  ;;  %v2342_v48 = vmul.f32 0.5, %v3461_v59  ;;  %v3320_v19 = vld [vmem:[%s4663_s8 + $0x28] sm:$0xff]  ;;  %v3317_v59 = vld [vmem:[%s4663_s8 + $0x10] sm:$0xff] }
 0x90e   :  { %v2344_v63 = vmul.f32 0.5, %v3463_v20  ;;  %3466 = vtanh.f32 %v2337_v60  ;;  %v3316_v60 = vld [vmem:[%s4663_s8 + $0x8] sm:$0xff]  ;;  %v3315_v20 = vld [vmem:[%s4663_s8] sm:$0xff] }
 0x90f   :  { %v2343_v35 = vadd.f32 0.5, %v2342_v48  ;;  %v4746_v48 = vld [vmem:[#allocation30_spill] sm:$0xff] }
 0x910   :  { %v2345_v4 = vadd.f32 0.5, %v2344_v63  ;;  %v1617_v63 = vadd.f32 %v4746_v48, %v4373_v55 }
 0x912   :  { %v2319_v57 = vpop.f32.mrf.mxu2  ;;  %v2332_v12 = vpop.f32.mrf.mxu3  ;;  %v2348_v56 = vmul.f32 %v2345_v4, %v4565_v62  ;;  %v4747_v4 = vld [vmem:[#allocation32_spill] sm:$0xff] }
 0x913   :  { %v3465_v6 = vpop.eup %3464 }
 0x914   :  { %v2349_v52 = vmul.f32 %v3465_v6, %v2343_v35  ;;  %v3467_v16 = vpop.eup %3466  ;;  %v1646_v35 = vadd.f32 %v4747_v4, %v4375_v9 }
 0x915   :  { %v2346_v21 = vmul.f32 0.5, %v3467_v16 }
 0x916   :  { %v2350_v7 = vadd.f32 %v2349_v52, %v2348_v56  ;;  %v4748_v52 = vld [vmem:[#allocation33_spill] sm:$0xff] }
 0x917   :  { %v2347_v39 = vadd.f32 0.5, %v2346_v21  ;;  %v1675_v16 = vadd.f32 %v4748_v52, %v4383_v47 }
 0x918   :  { %3468 = vtanh.f32 %v2350_v7 }
 0x91e   :  { %v3469_v36 = vpop.eup %3468 }
 0x91f   :  { %v2352_v11 = vmul.f32 %v3469_v36, %v2347_v39 }
 0x921   :  { %v2353_v10 = vpack.c.bf16 %v2352_v11, %v2352_v11 }
 0x923   :  { %2366 = vmatmul.bf16.vlgmr.msra.gmra.mxu0 %v2353_v10  ;;  %2379 = vmatmul.bf16.vlgmr.msra.gmra.mxu1 %v2353_v10 }
 0x924   :  { %2392 = vmatmul.bf16.vlgmr.msra.gmra.mxu2 %v2353_v10  ;;  %2405 = vmatmul.bf16.vlgmr.msra.gmra.mxu3 %v2353_v10 }
 0x925   :  { %2574 = vmatpush.bf16.msra.mxu0 %v3322_v43 }
 0x929   :  { %2575 = vmatpush.bf16.msra.mxu0 %v3321_v58 }
 0x92d   :  { %2576 = vmatpush.bf16.msra.mxu0 %v3320_v19 }
 0x931   :  { %2577 = vmatpush.bf16.msra.mxu0 %v3319_v14 }
 0x935   :  { %2578 = vmatpush.bf16.msra.mxu0 %v3318_v5 }
 0x939   :  { %2579 = vmatpush.bf16.msra.mxu0 %v3317_v59 }
 0x93d   :  { %2580 = vmatpush.bf16.msra.mxu0 %v3316_v60 }
 0x941   :  { %2581 = vmatpush.bf16.msra.mxu0 %v3315_v20 }
 0x9a0   :  { %v2367_v51 = vpop.f32.mrf.mxu0  ;;  %v2380_v49 = vpop.f32.mrf.mxu1 }
 0x9a1   :  { %v2410_v45 = vadd.f32 %v2367_v51, %v1615_v22  ;;  %v2411_v40 = vadd.f32 %v2380_v49, %v1644_v33 }
 0x9a3   :  { %3470 = vtanh.f32 %v2410_v45 }
 0x9a4   :  { %3472 = vtanh.f32 %v2411_v40 }
 0x9a7   :  { %v2393_v41 = vpop.f32.mrf.mxu2  ;;  %v2406_v13 = vpop.f32.mrf.mxu3 }
 0x9a8   :  { %v2412_v24 = vadd.f32 %v2393_v41, %v1673_v17  ;;  %v2369_v28 = vpop.f32.mrf.mxu0  ;;  %v2382_v42 = vpop.f32.mrf.mxu1  ;;  %v2413_v62 = vadd.f32 %v2406_v13, %v1702_v0 }
 0x9a9   :  { %v3471_v44 = vpop.eup %3470  ;;  %v3329_v42 = vld [vmem:[%s4664_s9] ss:$0 sm:$0xff] }
 0x9aa   :  { %v3473_v2 = vpop.eup %3472  ;;  %3474 = vtanh.f32 %v2412_v24  ;;  %v2418_v25 = vmul.f32 0.5, %v3471_v44 }
 0x9ab   :  { %v2420_v23 = vmul.f32 0.5, %v3473_v2  ;;  %3476 = vtanh.f32 %v2413_v62 }
 0x9ac   :  { %v2419_v32 = vadd.f32 0.5, %v2418_v25 }
 0x9ad   :  { %v2421_v18 = vadd.f32 0.5, %v2420_v23 }
 0x9af   :  { %v2395_v30 = vpop.f32.mrf.mxu2  ;;  %v2408_v29 = vpop.f32.mrf.mxu3  ;;  %v2424_v37 = vmul.f32 %v2421_v18, %v2350_v7  ;;  %v4749_v7 = vld [vmem:[#allocation34_spill] sm:$0xff] }
 0x9b0   :  { %v3475_v27 = vpop.eup %3474  ;;  %v1704_v21 = vadd.f32 %v4749_v7, %v4385_v38 }
 0x9b1   :  { %v2425_v50 = vmul.f32 %v3475_v27, %v2419_v32  ;;  %v3477_v53 = vpop.eup %3476 }
 0x9b2   :  { %v2422_v8 = vmul.f32 0.5, %v3477_v53 }
 0x9b3   :  { %v2426_v61 = vadd.f32 %v2425_v50, %v2424_v37 }
 0x9b4   :  { %v2423_v46 = vadd.f32 0.5, %v2422_v8 }
 0x9b5   :  { %3478 = vtanh.f32 %v2426_v61 }
 0x9bb   :  { %v3479_v3 = vpop.eup %3478 }
 0x9bc   :  { %v2428_v31 = vmul.f32 %v3479_v3, %v2423_v46 }
 0x9be   :  { %v2429_v15 = vpack.c.bf16 %v2428_v31, %v2428_v31 }
 0x9c0   :  { %2442 = vmatmul.bf16.vlgmr.msrb.gmra.mxu0 %v2429_v15  ;;  %2455 = vmatmul.bf16.vlgmr.msrb.gmra.mxu1 %v2429_v15 }
 0x9c1   :  { %2468 = vmatmul.bf16.vlgmr.msrb.gmra.mxu2 %v2429_v15  ;;  %2481 = vmatmul.bf16.vlgmr.msrb.gmra.mxu3 %v2429_v15 }
 0xa3d   :  { %v2443_v57 = vpop.f32.mrf.mxu0  ;;  %v2456_v12 = vpop.f32.mrf.mxu1 }
 0xa3e   :  { %v2486_v6 = vadd.f32 %v2443_v57, %v1617_v63  ;;  %v2487_v56 = vadd.f32 %v2456_v12, %v1646_v35 }
 0xa40   :  { %3480 = vtanh.f32 %v2486_v6 }
 0xa41   :  { %3482 = vtanh.f32 %v2487_v56 }
 0xa44   :  { %v2469_v39 = vpop.f32.mrf.mxu2  ;;  %v2482_v36 = vpop.f32.mrf.mxu3 }
 0xa45   :  { %v2488_v11 = vadd.f32 %v2469_v39, %v1675_v16  ;;  %v2445_v10 = vpop.f32.mrf.mxu0  ;;  %v2458_v55 = vpop.f32.mrf.mxu1  ;;  %v2489_v22 = vadd.f32 %v2482_v36, %v1704_v21 }
 0xa46   :  { %v3481_v1 = vpop.eup %3480 }
 0xa47   :  { %v3483_v9 = vpop.eup %3482  ;;  %3484 = vtanh.f32 %v2488_v11  ;;  %v2494_v26 = vmul.f32 0.5, %v3481_v1 }
 0xa48   :  { %v2496_v33 = vmul.f32 0.5, %v3483_v9  ;;  %3486 = vtanh.f32 %v2489_v22 }
 0xa49   :  { %v2495_v49 = vadd.f32 0.5, %v2494_v26 }
 0xa4a   :  { %v2497_v51 = vadd.f32 0.5, %v2496_v33 }
 0xa4c   :  { %v2471_v45 = vpop.f32.mrf.mxu2  ;;  %v2484_v40 = vpop.f32.mrf.mxu3  ;;  %v2500_v34 = vmul.f32 %v2497_v51, %v2426_v61 }
 0xa4d   :  { %v3485_v47 = vpop.eup %3484 }
 0xa4e   :  { %v2501_v17 = vmul.f32 %v3485_v47, %v2495_v49  ;;  %v3487_v38 = vpop.eup %3486 }
 0xa4f   :  { %v2498_v0 = vmul.f32 0.5, %v3487_v38 }
 0xa50   :  { %v2502_v54 = vadd.f32 %v2501_v17, %v2500_v34 }
 0xa51   :  { %v2499_v41 = vadd.f32 0.5, %v2498_v0 }
 0xa52   :  { %3488 = vtanh.f32 %v2502_v54 }
 0xa58   :  { %v3489_v13 = vpop.eup %3488 }
 0xa59   :  { %v2504_v24 = vmul.f32 %v3489_v13, %v2499_v41 }
 0xa5b   :  { %v2505_v28 = vpack.c.bf16 %v2504_v24, %v2504_v24 }
 0xa5d   :  { %2582 = vmatmul.bf16.vlgmr.msra.gmra.mxu0 %v2505_v28 }
 0xada   :  { %v2583_v44 = vpop.f32.mrf.mxu0 }
 0xadb   :  { %v2584_v62 = vadd.f32 %v3329_v42, %v2583_v44 }
 0xadd   :  { %2587 = vst [vmem:[%s4665_s10] sm:$0xff] %v2584_v62 }
 0xae2   :  { %v2585_v2 = vpop.f32.mrf.mxu0 }
 0xae3   :  { %2592 = vsyncpa [#allocation5], 1 }
 0xae4   :  { %2593 = vsyncpa [#allocation7], 1 }
 0xae5   :  { %2594 = vsyncpa [#allocation10], 1 }

</bundles_post_ra>
